<compile_context>
chip_gen: v7x
topology: tpu7x:2x2x1
jax: 0.10.0
libtpu: 0.0.40
codegen_flags: <defaults>
</compile_context>

<pallas_src>
import math
from typing import NamedTuple

import numpy as np
import jax
import jax.numpy as jnp
from jax.experimental import pallas as pl
from jax.experimental.pallas import tpu as pltpu

LRELU_SLOPE = 0.2
ACT_GAIN = math.sqrt(2.0)          # BiasedActivation.Gain
LANE = 128                         # channel dims padded to multiples of this
VMEM_LIMIT = 32 * 1024 * 1024


class GenConfig(NamedTuple):
    noise_dim: int
    widths: tuple
    blocks: tuple
    compression: int
    rf: int
    filt: tuple


# --------------------------------------------------------------------------------------
# small helpers
# --------------------------------------------------------------------------------------

def _cparams(n_axes=1):
    return pltpu.CompilerParams(dimension_semantics=("parallel",) * n_axes,
                                vmem_limit_bytes=VMEM_LIMIT)


def _row_tile(m):
    for t in (512, 256, 128, 64, 32, 16, 8):
        if m % t == 0:
            return t
    return m


def _lrelu_gain(v):
    return jnp.where(v >= 0.0, v, LRELU_SLOPE * v) * ACT_GAIN


def _rup(c):
    return ((c + LANE - 1) // LANE) * LANE


def _pad2(w, r, c):
    return jnp.zeros((r, c), w.dtype).at[:w.shape[0], :w.shape[1]].set(w)


def _pad1(v, n):
    return jnp.zeros((n,), v.dtype).at[:v.shape[0]].set(v)


def _make_lowpass_2d(resampling_filter):
    f = np.asarray(resampling_filter, dtype=np.float64)
    k = np.outer(f, f)
    return k / k.sum()


# --------------------------------------------------------------------------------------
# Pallas primitives
# --------------------------------------------------------------------------------------

def pw_matmul(x2d, w, use_pallas=True):
    """1x1 conv == per-pixel matmul.  bf16 operands, f32 accumulation."""
    xb = x2d.astype(jnp.bfloat16)
    wb = w.astype(jnp.bfloat16)
    if not use_pallas:
        return jnp.dot(xb, wb, preferred_element_type=jnp.float32)
    M, Ci = x2d.shape
    Co = w.shape[1]
    tm = _row_tile(M)

    def kernel(x_ref, w_ref, o_ref):
        o_ref[...] = jnp.dot(x_ref[...], w_ref[...], preferred_element_type=jnp.float32)

    return pl.pallas_call(
        kernel,
        out_shape=jax.ShapeDtypeStruct((M, Co), jnp.float32),
        grid=(M // tm,),
        in_specs=[pl.BlockSpec((tm, Ci), lambda i: (i, 0)),
                  pl.BlockSpec((Ci, Co), lambda i: (0, 0))],       # resident weight
        out_specs=pl.BlockSpec((tm, Co), lambda i: (i, 0)),
        compiler_params=_cparams(1),
    )(xb, wb)


def pw_bias_act_matmul(x2d, w, b, use_pallas=True):
    """LinearLayer1 fused with NonLinearity1:  lrelu(x @ W + b, 0.2) * sqrt(2)."""
    xb = x2d.astype(jnp.bfloat16)
    wb = w.astype(jnp.bfloat16)
    if not use_pallas:
        y = jnp.dot(xb, wb, preferred_element_type=jnp.float32) + b[None, :]
        return _lrelu_gain(y)
    M, Ci = x2d.shape
    Co = w.shape[1]
    tm = _row_tile(M)

    def kernel(x_ref, w_ref, b_ref, o_ref):
        y = jnp.dot(x_ref[...], w_ref[...], preferred_element_type=jnp.float32) + b_ref[...]
        o_ref[...] = _lrelu_gain(y)

    return pl.pallas_call(
        kernel,
        out_shape=jax.ShapeDtypeStruct((M, Co), jnp.float32),
        grid=(M // tm,),
        in_specs=[pl.BlockSpec((tm, Ci), lambda i: (i, 0)),
                  pl.BlockSpec((Ci, Co), lambda i: (0, 0)),
                  pl.BlockSpec((1, Co), lambda i: (0, 0))],
        out_specs=pl.BlockSpec((tm, Co), lambda i: (i, 0)),
        compiler_params=_cparams(1),
    )(xb, wb, b.reshape(1, -1))


def act_matmul_add(y2d, b, w, id2d, use_pallas=True):
    """NonLinearity2 + LinearLayer3 + residual:  id + (lrelu(y + b)*g) @ W."""
    wb = w.astype(jnp.bfloat16)
    if not use_pallas:
        a = _lrelu_gain(y2d + b[None, :])
        return id2d + jnp.dot(a.astype(jnp.bfloat16), wb, preferred_element_type=jnp.float32)
    M, Ci = y2d.shape
    Co = w.shape[1]
    tm = _row_tile(M)

    def kernel(y_ref, b_ref, w_ref, id_ref, o_ref):
        a = _lrelu_gain(y_ref[...] + b_ref[...])
        o_ref[...] = id_ref[...] + jnp.dot(a.astype(jnp.bfloat16), w_ref[...],
                                           preferred_element_type=jnp.float32)

    return pl.pallas_call(
        kernel,
        out_shape=jax.ShapeDtypeStruct((M, Co), jnp.float32),
        grid=(M // tm,),
        in_specs=[pl.BlockSpec((tm, Ci), lambda i: (i, 0)),
                  pl.BlockSpec((1, Ci), lambda i: (0, 0)),
                  pl.BlockSpec((Ci, Co), lambda i: (0, 0)),
                  pl.BlockSpec((tm, Co), lambda i: (i, 0))],
        out_specs=pl.BlockSpec((tm, Co), lambda i: (i, 0)),
        compiler_params=_cparams(1),
    )(y2d, b.reshape(1, -1), wb, id2d)


def conv_kxk(x_nhwc, w_hwio, pad, use_pallas=True):
    """LinearLayer2: KxK conv, stride 1, reflect padding.  Weight layout HWIO."""
    N, H, W, Ci = x_nhwc.shape
    K = w_hwio.shape[0]
    Co = w_hwio.shape[-1]
    xp = jnp.pad(x_nhwc, ((0, 0), (pad, pad), (pad, pad), (0, 0)), mode='reflect')
    xpb = xp.astype(jnp.bfloat16)
    wb = w_hwio.astype(jnp.bfloat16)
    if not use_pallas:
        acc = jnp.zeros((N, H, W, Co), jnp.float32)
        for kh in range(K):
            for kw in range(K):
                acc = acc + jnp.einsum('nhwi,io->nhwo',
                                       xpb[:, kh:kh + H, kw:kw + W, :], wb[kh, kw],
                                       preferred_element_type=jnp.float32)
        return acc

    Hp, Wp = H + 2 * pad, W + 2 * pad
    HW = H * W
    w2d = wb.reshape(K * K * Ci, Co)           # (kh, kw, ci) flattened into contraction

    def kernel(x_ref, w_ref, o_ref):
        xb = x_ref[0]                                           # (Hp, Wp, Ci)  bf16
        cols = [xb[kh:kh + H, kw:kw + W, :]
                for kh in range(K) for kw in range(K)]
        xcol = jnp.concatenate(cols, axis=-1)                   # (H, W, K*K*Ci) in VMEM
        xcol = xcol.reshape(HW, K * K * Ci)
        o_ref[0] = jnp.dot(xcol, w_ref[...], preferred_element_type=jnp.float32)

    out = pl.pallas_call(
        kernel,
        out_shape=jax.ShapeDtypeStruct((N, HW, Co), jnp.float32),
        grid=(N,),
        in_specs=[pl.BlockSpec((1, Hp, Wp, Ci), lambda n: (n, 0, 0, 0)),
                  pl.BlockSpec((K * K * Ci, Co), lambda n: (0, 0))],   # resident weight
        out_specs=pl.BlockSpec((1, HW, Co), lambda n: (n, 0, 0)),
        compiler_params=_cparams(1),
    )(xpb, w2d)
    return out.reshape(N, H, W, Co)


def interpolative_upsample(x_nhwc, resampling_filter, use_pallas=True):
    """upfirdn2d.upsample2d(x, f, up=2): zero-insert x2, pad, correlate flip(f), gain=4.

    Pallas path is polyphase: reads x at the original resolution and only evaluates
    the non-zero taps of each of the 4 output phases (no zero-stuffed HBM tensor)."""
    N, H, W, C = x_nhwc.shape
    k = _make_lowpass_2d(resampling_filter)
    F = k.shape[0]
    p0 = (F + 2 - 1) // 2
    p1 = (F - 2) // 2
    keff = k[::-1, ::-1] * 4.0      # filter flip (no-op for symmetric f), gain = up**2

    if not use_pallas:
        z = jnp.zeros((N, H, 2, W, 2, C), x_nhwc.dtype)
        z = z.at[:, :, 0, :, 0, :].set(x_nhwc).reshape(N, 2 * H, 2 * W, C)
        z = jnp.pad(z, ((0, 0), (p0, p1), (p0, p1), (0, 0)))
        acc = jnp.zeros((N, 2 * H, 2 * W, C), jnp.float32)
        for a in range(F):
            for b in range(F):
                acc = acc + float(keff[a, b]) * z[:, a:a + 2 * H, b:b + 2 * W, :]
        return acc

    # polyphase decomposition: taps / offsets per row(col) phase
    offs = {}
    for ph in range(2):
        offs[ph] = [(a, (a + ph - p0) // 2) for a in range(F) if (a + ph - p0) % 2 == 0]
    all_d = [d for ph in range(2) for (_, d) in offs[ph]]
    padL = max(0, -min(all_d))
    padR = max(0, max(all_d))
    xz = jnp.pad(x_nhwc, ((0, 0), (padL, padR), (padL, padR), (0, 0)))
    Hz = H + padL + padR
    Wz = W + padL + padR
    taps = {}
    for ph in range(2):
        for pw in range(2):
            taps[(ph, pw)] = [(da + padL, db + padL, float(keff[a, b]))
                              for (a, da) in offs[ph] for (b, db) in offs[pw]]

    def kernel(x_ref, o_ref):
        xb = x_ref[0]                                           # (Hz, Wz, C) f32
        for ph in range(2):
            parts = []
            for pw in range(2):
                acc = jnp.zeros((H, W, C), jnp.float32)
                for (ho, wo, cf) in taps[(ph, pw)]:
                    acc = acc + cf * xb[ho:ho + H, wo:wo + W, :]
                parts.append(acc)
            # full-lane (W, 2*C) store -> unmasked vst
            o_ref[0, :, ph, :, :] = jnp.concatenate(parts, axis=-1)

    # output layout (N, H, 2, W, 2*C) reshapes for free to interleaved (N, 2H, 2W, C)
    out = pl.pallas_call(
        kernel,
        out_shape=jax.ShapeDtypeStruct((N, H, 2, W, 2 * C), jnp.float32),
        grid=(N,),
        in_specs=[pl.BlockSpec((1, Hz, Wz, C), lambda n: (n, 0, 0, 0))],
        out_specs=pl.BlockSpec((1, H, 2, W, 2 * C), lambda n: (n, 0, 0, 0, 0)),
        compiler_params=_cparams(1),
    )(xz)
    return out.reshape(N, 2 * H, 2 * W, C)


def inplace_upsample(y_nhwc, resampling_filter, use_pallas=True):
    """pixel_shuffle(x, 2) followed by upfirdn2d.filter2d(., f).

    Pallas path expects the conv output in phase-block-major channel order
    (channels [q*C:(q+1)*C] hold shuffle phase q = 2*row_phase + col_phase), arranged
    by prepare_pallas_params() via a weight permutation; the pixel shuffle is then
    fused into the FIR kernel (no shuffled 4x intermediate in HBM).
    The reference path uses standard PyTorch pixel_shuffle channel order."""
    N, H, W, C4 = y_nhwc.shape
    C = C4 // 4
    k = _make_lowpass_2d(resampling_filter)
    F = k.shape[0]
    q0 = F // 2
    q1 = (F - 1) // 2
    keff = k[::-1, ::-1]

    if not use_pallas:
        ps = y_nhwc.reshape(N, H, W, C, 2, 2)
        ps = jnp.transpose(ps, (0, 1, 4, 2, 5, 3)).reshape(N, 2 * H, 2 * W, C)
        ps = jnp.pad(ps, ((0, 0), (q0, q1), (q0, q1), (0, 0)))
        acc = jnp.zeros((N, 2 * H, 2 * W, C), jnp.float32)
        for a in range(F):
            for b in range(F):
                acc = acc + float(keff[a, b]) * ps[:, a:a + 2 * H, b:b + 2 * W, :]
        return acc

    all_m = [(i + a - q0) // 2 for i in range(2) for a in range(F)]
    padL = max(0, -min(all_m))
    padR = max(0, max(all_m))
    yz = jnp.pad(y_nhwc, ((0, 0), (padL, padR), (padL, padR), (0, 0)))
    Hz = H + padL + padR
    Wz = W + padL + padR
    taps = {}
    for i in range(2):
        for j in range(2):
            lst = []
            for a in range(F):
                for b in range(F):
                    mh, s = divmod(i + a - q0, 2)
                    mw, t = divmod(j + b - q0, 2)
                    lst.append((mh + padL, mw + padL, 2 * s + t, float(keff[a, b])))
            taps[(i, j)] = lst

    def kernel(y_ref, o_ref):
        yb = y_ref[0]                                           # (Hz, Wz, 4*C) f32
        for i in range(2):
            parts = []
            for j in range(2):
                acc = jnp.zeros((H, W, C), jnp.float32)
                for (mh, mw, q, cf) in taps[(i, j)]:
                    acc = acc + cf * yb[mh:mh + H, mw:mw + W, q * C:(q + 1) * C]
                parts.append(acc)
            o_ref[0, :, i, :, :] = jnp.concatenate(parts, axis=-1)

    out = pl.pallas_call(
        kernel,
        out_shape=jax.ShapeDtypeStruct((N, H, 2, W, 2 * C), jnp.float32),
        grid=(N,),
        in_specs=[pl.BlockSpec((1, Hz, Wz, C4), lambda n: (n, 0, 0, 0))],
        out_specs=pl.BlockSpec((1, H, 2, W, 2 * C), lambda n: (n, 0, 0, 0, 0)),
        compiler_params=_cparams(1),
    )(yz)
    return out.reshape(N, 2 * H, 2 * W, C)


# --------------------------------------------------------------------------------------
# Blocks / stages / generator
# --------------------------------------------------------------------------------------

def general_block_forward(x, p, rf, use_pallas=True):
    N, H, W, C = x.shape
    Cc = p['W1'].shape[1]
    y = pw_bias_act_matmul(x.reshape(-1, C), p['W1'], p['b1'], use_pallas)
    y = conv_kxk(y.reshape(N, H, W, Cc), p['W2'], (rf - 1) // 2, use_pallas)
    Cc2 = y.shape[-1]
    out = act_matmul_add(y.reshape(-1, Cc2), p['b2'], p['W3'],
                         x.reshape(-1, C), use_pallas)
    return out.reshape(N, H, W, p['W3'].shape[1])


def upsample_block_forward(x, p, rf, filt, use_pallas=True):
    N, H, W, Cin = x.shape
    Cout = p['W3'].shape[1]
    # shortcut branch
    if 'Wsc' in p:
        ident = pw_matmul(x.reshape(-1, Cin), p['Wsc'], use_pallas).reshape(N, H, W, Cout)
    else:
        ident = x
    ident = interpolative_upsample(ident, filt, use_pallas)             # (N,2H,2W,Cout)
    # main branch
    Cci = p['W1'].shape[1]
    y = pw_bias_act_matmul(x.reshape(-1, Cin), p['W1'], p['b1'], use_pallas)
    y = conv_kxk(y.reshape(N, H, W, Cci), p['W2'], (rf - 1) // 2, use_pallas)
    y = inplace_upsample(y, filt, use_pallas)                           # (N,2H,2W,Cco)
    Cco = y.shape[-1]
    out = act_matmul_add(y.reshape(-1, Cco), p['b2'], p['W3'],
                         ident.reshape(-1, Cout), use_pallas)
    return out.reshape(N, 2 * H, 2 * W, Cout)


def generator_forward(z, params, cfg, use_pallas=True):
    rf, filt = cfg.rf, cfg.filt
    # PrologLayer: Basis * Linear(z)   (basis broadcast multiply is tiny XLA glue)
    lin = pw_matmul(z, params['prolog']['W'], use_pallas)                    # (N, C0)
    x = params['prolog']['basis'][None, :, :, :] * lin[:, None, None, :]     # (N,4,4,C0)

    agg = None
    for s, blocks in enumerate(params['stages']):
        if s == 0:
            for bp in blocks:
                x = general_block_forward(x, bp, rf, use_pallas)
        else:
            x = upsample_block_forward(x, blocks[0], rf, filt, use_pallas)
            for bp in blocks[1:]:
                x = general_block_forward(x, bp, rf, use_pallas)
        n, h, w, c = x.shape
        a = pw_matmul(x.reshape(-1, c), params['agg'][s], use_pallas).reshape(n, h, w, -1)
        agg = a if s == 0 else interpolative_upsample(agg, filt, use_pallas) + a
    out = agg[:, :, :, :3]               # drop padded lanes (no-op for reference path)
    return jnp.transpose(out, (0, 3, 1, 2))     # NHWC -> NCHW


# --------------------------------------------------------------------------------------
# Parameter initialization (raw) and Pallas preparation (pad / permute / bf16)
# --------------------------------------------------------------------------------------

def init_generator_params(key, cfg):
    """Deterministic MSR-style init.

    NOTE: layers the original initializes with ActivationGain=0 (LinearLayer3 in every
    block, AggregationLayers[1:]) and the BiasedActivation biases (zero in the original)
    get small nonzero values here so every code path is numerically exercised; the
    forward-pass semantics are unchanged for any given parameter values."""
    cf, rf = cfg.compression, cfg.rf
    keys = iter(jax.random.split(key, 512))

    def nrm(shape, std):
        return std * jax.random.normal(next(keys), shape, jnp.float32)

    def general_block(c):
        cc = c // cf
        return {'W1': nrm((c, cc), ACT_GAIN / math.sqrt(c)),
                'b1': 0.1 * nrm((cc,), 1.0),
                'W2': nrm((rf, rf, cc, cc), ACT_GAIN / math.sqrt(cc * rf * rf)),
                'b2': 0.1 * nrm((cc,), 1.0),
                'W3': nrm((cc, c), 1.0 / math.sqrt(cc))}

    def upsample_block(cin, cout):
        cci, cco = cin // cf, cout // cf
        p = {'W1': nrm((cin, cci), ACT_GAIN / math.sqrt(cin)),
             'b1': 0.1 * nrm((cci,), 1.0),
             'W2': nrm((rf, rf, cci, 4 * cco), ACT_GAIN / math.sqrt(cci * rf * rf)),
             'b2': 0.1 * nrm((cco,), 1.0),
             'W3': nrm((cco, cout), 1.0 / math.sqrt(cco))}
        if cin != cout:
            p['Wsc'] = nrm((cin, cout), 1.0 / math.sqrt(cin))
        return p

    c0 = cfg.widths[0]
    params = {'prolog': {'W': nrm((cfg.noise_dim, c0), 1.0 / math.sqrt(cfg.noise_dim)),
                         'basis': nrm((4, 4, c0), 1.0)},
              'stages': [], 'agg': []}
    params['stages'].append([general_block(c0) for _ in range(cfg.blocks[0])])
    for s in range(1, len(cfg.widths)):
        cin, cout = cfg.widths[s - 1], cfg.widths[s]
        st = [upsample_block(cin, cout)]
        st += [general_block(cout) for _ in range(cfg.blocks[s] - 1)]
        params['stages'].append(st)
    params['agg'].append(nrm((c0, 3), 1.0 / math.sqrt(c0)))
    for s in range(1, len(cfg.widths)):
        params['agg'].append(nrm((cfg.widths[s], 3), 1.0 / math.sqrt(cfg.widths[s])))
    return params


def prepare_pallas_params(raw, cfg):
    """Pad channel dims to multiples of 128 (lane-dense), cast GEMM weights to bf16 and
    permute the UpsampleBlock conv weight's output channels to phase-block-major order
    for the fused pixel-shuffle/FIR kernel.  Padded lanes are zero and stay zero."""
    rf = cfg.rf
    bf16 = jnp.bfloat16

    def prep_general(p):
        c, cc = p['W1'].shape
        cp, ccp = _rup(c), _rup(cc)
        w2 = jnp.zeros((rf, rf, ccp, ccp), jnp.float32).at[:, :, :cc, :cc].set(p['W2'])
        return {'W1': _pad2(p['W1'], cp, ccp).astype(bf16),
                'b1': _pad1(p['b1'], ccp),
                'W2': w2.astype(bf16),
                'b2': _pad1(p['b2'], ccp),
                'W3': _pad2(p['W3'], ccp, cp).astype(bf16)}

    def prep_upsample(p):
        cin, cci = p['W1'].shape
        cco, cout = p['W3'].shape
        cinp, ccip, ccop, coutp = _rup(cin), _rup(cci), _rup(cco), _rup(cout)
        # PyTorch pixel_shuffle consumes conv channel (c*4 + 2*s + t); reorder to
        # (q*Ccop + c) with q = 2*s + t so each shuffle phase is a contiguous block.
        w2 = p['W2'].reshape(rf, rf, cci, cco, 4).transpose(0, 1, 2, 4, 3)
        w2p = jnp.zeros((rf, rf, ccip, 4, ccop), jnp.float32)
        w2p = w2p.at[:, :, :cci, :, :cco].set(w2).reshape(rf, rf, ccip, 4 * ccop)
        out = {'W1': _pad2(p['W1'], cinp, ccip).astype(bf16),
               'b1': _pad1(p['b1'], ccip),
               'W2': w2p.astype(bf16),
               'b2': _pad1(p['b2'], ccop),
               'W3': _pad2(p['W3'], ccop, coutp).astype(bf16)}
        if 'Wsc' in p:
            out['Wsc'] = _pad2(p['Wsc'], cinp, coutp).astype(bf16)
        return out

    c0 = raw['prolog']['W'].shape[1]
    c0p = _rup(c0)
    prepared = {'prolog': {'W': _pad2(raw['prolog']['W'],
                                      raw['prolog']['W'].shape[0], c0p).astype(bf16),
                           'basis': jnp.zeros((4, 4, c0p), jnp.float32)
                                       .at[:, :, :c0].set(raw['prolog']['basis'])},
                'stages': [], 'agg': []}
    for s, st in enumerate(raw['stages']):
        if s == 0:
            prepared['stages'].append([prep_general(b) for b in st])
        else:
            prepared['stages'].append([prep_upsample(st[0])] +
                                      [prep_general(b) for b in st[1:]])
    for wa in raw['agg']:
        prepared['agg'].append(_pad2(wa, _rup(wa.shape[0]), _rup(wa.shape[1])).astype(bf16))
    return prepared


# --------------------------------------------------------------------------------------
# Self-test
# --------------------------------------------------------------------------------------

if __name__ == "__main__":
    # small config: 2 stages (general-only stage at 4x4, upsample stage to 8x8),
    # covers every block type while keeping compile time short.
    cfg = GenConfig(noise_dim=64, widths=(32, 16), blocks=(1, 2),
                    compression=4, rf=3, filt=(1, 2, 1))
    key = jax.random.PRNGKey(0)
    kz, kp = jax.random.split(key)
    N = 2
    z = jax.random.normal(kz, (N, cfg.noise_dim), jnp.float32)

    raw_params = init_generator_params(kp, cfg)
    pal_params = prepare_pallas_params(raw_params, cfg)

    fwd = jax.jit(generator_forward, static_argnames=("cfg", "use_pallas"))
    out = jax.block_until_ready(fwd(z, pal_params, cfg=cfg, use_pallas=True))
    # pure-JAX reference of the same math (straightforward zero-insert / pixel-shuffle
    # formulation, unpadded channels, same bf16 GEMM operand rounding) validates the
    # Pallas kernels including the polyphase / weight-permutation optimizations.
    ref = jax.block_until_ready(fwd(z, raw_params, cfg=cfg, use_pallas=False))

    side = 4 * (2 ** (len(cfg.widths) - 1))
    assert out.shape == (N, 3, side, side), out.shape
    assert bool(jnp.all(jnp.isfinite(out)))
    err = float(jnp.max(jnp.abs(out - ref)))
    scale = float(jnp.max(jnp.abs(ref)))
    assert err <= 3e-3 * (scale + 1.0), (err, scale)
    print("KERNEL_OK")
</pallas_src>

<mosaic_0001>
module attributes {stable_mosaic.version = 11 : i64} {
  func.func @kernel(%arg0: i32, %arg1: memref<2x64xbf16, #tpu.memory_space<vmem>>, %arg2: memref<64x128xbf16, #tpu.memory_space<vmem>>, %arg3: memref<2x128xf32, #tpu.memory_space<vmem>>) attributes {dimension_semantics = [#tpu.dimension_semantics<parallel>], iteration_bounds = array<i64: 1>, scalar_prefetch = 0 : i64, scratch_operands = 0 : i64, tpu.core_type = #tpu.core_type<tc>, window_params = [{transform_indices = @transform_0, window_bounds = array<i64: 2, 64>}, {pipeline_mode = #tpu.pipeline_mode<synchronous>, transform_indices = @transform_1, window_bounds = array<i64: 64, 128>}, {transform_indices = @transform_2, window_bounds = array<i64: 2, 128>}]} {
    %c0 = arith.constant 0 : index
    %c0_0 = arith.constant 0 : index
    %0 = vector.load %arg1[%c0, %c0_0] : memref<2x64xbf16, #tpu.memory_space<vmem>>, vector<2x64xbf16>
    %c0_1 = arith.constant 0 : index
    %c0_2 = arith.constant 0 : index
    %1 = vector.load %arg2[%c0_1, %c0_2] : memref<64x128xbf16, #tpu.memory_space<vmem>>, vector<64x128xbf16>
    %cst = arith.constant dense<0.000000e+00> : vector<2x128xf32>
    %2 = tpu.matmul %0, %1, %cst {dimension_numbers = #tpu.dot_dimension_numbers<[1], [0], [0], [1], [0, 0, 1, 1], [], []>} : vector<2x64xbf16>, vector<64x128xbf16>, vector<2x128xf32> -> vector<2x128xf32>
    %c0_3 = arith.constant 0 : index
    %c0_4 = arith.constant 0 : index
    %3 = vector.load %arg3[%c0_3, %c0_4] : memref<2x128xf32, #tpu.memory_space<vmem>>, vector<2x128xf32>
    tpu.vector_store %arg3[%c0_3, %c0_4], %2 {strides = array<i32>} : memref<2x128xf32, #tpu.memory_space<vmem>>, vector<2x128xf32>,
    return
  }
  func.func @transform_0(%arg0: i32) -> (i32, i32) {
    %c0_i32 = arith.constant 0 : i32
    %c0_i32_0 = arith.constant 0 : i32
    return %arg0, %c0_i32 : i32, i32
  }
  func.func @transform_1(%arg0: i32) -> (i32, i32) {
    %c0_i32 = arith.constant 0 : i32
    %c0_i32_0 = arith.constant 0 : i32
    %c0_i32_1 = arith.constant 0 : i32
    return %c0_i32, %c0_i32_0 : i32, i32
  }
  func.func @transform_2(%arg0: i32) -> (i32, i32) {
    %c0_i32 = arith.constant 0 : i32
    %c0_i32_0 = arith.constant 0 : i32
    return %arg0, %c0_i32 : i32, i32
  }
}

module attributes {stable_mosaic.version = 11 : i64} {
  func.func @kernel(%arg0: i32, %arg1: memref<32x128xbf16, #tpu.memory_space<vmem>>, %arg2: memref<128x128xbf16, #tpu.memory_space<vmem>>, %arg3: memref<1x128xf32, #tpu.memory_space<vmem>>, %arg4: memref<32x128xf32, #tpu.memory_space<vmem>>) attributes {dimension_semantics = [#tpu.dimension_semantics<parallel>], iteration_bounds = array<i64: 1>, scalar_prefetch = 0 : i64, scratch_operands = 0 : i64, tpu.core_type = #tpu.core_type<tc>, window_params = [{transform_indices = @transform_0, window_bounds = array<i64: 32, 128>}, {pipeline_mode = #tpu.pipeline_mode<synchronous>, transform_indices = @transform_1, window_bounds = array<i64: 128, 128>}, {pipeline_mode = #tpu.pipeline_mode<synchronous>, transform_indices = @transform_2, window_bounds = array<i64: 1, 128>}, {transform_indices = @transform_3, window_bounds = array<i64: 32, 128>}]} {
    %c0 = arith.constant 0 : index
    %c0_0 = arith.constant 0 : index
    %0 = vector.load %arg1[%c0, %c0_0] : memref<32x128xbf16, #tpu.memory_space<vmem>>, vector<32x128xbf16>
    %c0_1 = arith.constant 0 : index
    %c0_2 = arith.constant 0 : index
    %1 = vector.load %arg2[%c0_1, %c0_2] : memref<128x128xbf16, #tpu.memory_space<vmem>>, vector<128x128xbf16>
    %cst = arith.constant dense<0.000000e+00> : vector<32x128xf32>
    %2 = tpu.matmul %0, %1, %cst {dimension_numbers = #tpu.dot_dimension_numbers<[1], [0], [0], [1], [0, 0, 1, 1], [], []>} : vector<32x128xbf16>, vector<128x128xbf16>, vector<32x128xf32> -> vector<32x128xf32>
    %c0_3 = arith.constant 0 : index
    %c0_4 = arith.constant 0 : index
    %3 = vector.load %arg3[%c0_3, %c0_4] : memref<1x128xf32, #tpu.memory_space<vmem>>, vector<1x128xf32>
    %4 = vector.broadcast %3 : vector<1x128xf32> to vector<32x128xf32>
    %5 = arith.addf %2, %4 : vector<32x128xf32>
    %cst_5 = arith.constant 0.000000e+00 : f32
    %6 = vector.broadcast %cst_5 : f32 to vector<32x128xf32>
    %7 = arith.cmpf oge, %5, %6 : vector<32x128xf32>
    %cst_6 = arith.constant 2.000000e-01 : f32
    %8 = vector.broadcast %cst_6 : f32 to vector<32x128xf32>
    %9 = arith.mulf %8, %5 : vector<32x128xf32>
    %10 = arith.select %7, %5, %9 : vector<32x128xi1>, vector<32x128xf32>
    %cst_7 = arith.constant 1.41421354 : f32
    %11 = vector.broadcast %cst_7 : f32 to vector<32x128xf32>
    %12 = arith.mulf %10, %11 : vector<32x128xf32>
    %c0_8 = arith.constant 0 : index
    %c0_9 = arith.constant 0 : index
    %13 = vector.load %arg4[%c0_8, %c0_9] : memref<32x128xf32, #tpu.memory_space<vmem>>, vector<32x128xf32>
    tpu.vector_store %arg4[%c0_8, %c0_9], %12 {strides = array<i32>} : memref<32x128xf32, #tpu.memory_space<vmem>>, vector<32x128xf32>,
    return
  }
  func.func @transform_0(%arg0: i32) -> (i32, i32) {
    %c0_i32 = arith.constant 0 : i32
    %c0_i32_0 = arith.constant 0 : i32
    return %arg0, %c0_i32 : i32, i32
  }
  func.func @transform_1(%arg0: i32) -> (i32, i32) {
    %c0_i32 = arith.constant 0 : i32
    %c0_i32_0 = arith.constant 0 : i32
    %c0_i32_1 = arith.constant 0 : i32
    return %c0_i32, %c0_i32_0 : i32, i32
  }
  func.func @transform_2(%arg0: i32) -> (i32, i32) {
    %c0_i32 = arith.constant 0 : i32
    %c0_i32_0 = arith.constant 0 : i32
    %c0_i32_1 = arith.constant 0 : i32
    return %c0_i32, %c0_i32_0 : i32, i32
  }
  func.func @transform_3(%arg0: i32) -> (i32, i32) {
    %c0_i32 = arith.constant 0 : i32
    %c0_i32_0 = arith.constant 0 : i32
    return %arg0, %c0_i32 : i32, i32
  }
}

module attributes {stable_mosaic.version = 11 : i64} {
  func.func @kernel(%arg0: i32, %arg1: memref<1x6x6x128xbf16, #tpu.memory_space<vmem>>, %arg2: memref<1152x128xbf16, #tpu.memory_space<vmem>>, %arg3: memref<1x16x128xf32, #tpu.memory_space<vmem>>) attributes {dimension_semantics = [#tpu.dimension_semantics<parallel>], iteration_bounds = array<i64: 2>, scalar_prefetch = 0 : i64, scratch_operands = 0 : i64, tpu.core_type = #tpu.core_type<tc>, window_params = [{transform_indices = @transform_0, window_bounds = array<i64: 1, 6, 6, 128>}, {pipeline_mode = #tpu.pipeline_mode<synchronous>, transform_indices = @transform_1, window_bounds = array<i64: 1152, 128>}, {transform_indices = @transform_2, window_bounds = array<i64: 1, 16, 128>}]} {
    %c0 = arith.constant 0 : index
    %c0_0 = arith.constant 0 : index
    %c0_1 = arith.constant 0 : index
    %c0_2 = arith.constant 0 : index
    %0 = vector.load %arg1[%c0, %c0_0, %c0_1, %c0_2] : memref<1x6x6x128xbf16, #tpu.memory_space<vmem>>, vector<1x6x6x128xbf16>
    %1 = vector.shape_cast %0 : vector<1x6x6x128xbf16> to vector<6x6x128xbf16>
    %2 = vector.extract_strided_slice %1 {offsets = [0, 0, 0], sizes = [4, 4, 128], strides = [1, 1, 1]} : vector<6x6x128xbf16> to vector<4x4x128xbf16>
    %3 = vector.extract_strided_slice %1 {offsets = [0, 1, 0], sizes = [4, 4, 128], strides = [1, 1, 1]} : vector<6x6x128xbf16> to vector<4x4x128xbf16>
    %4 = vector.extract_strided_slice %1 {offsets = [0, 2, 0], sizes = [4, 4, 128], strides = [1, 1, 1]} : vector<6x6x128xbf16> to vector<4x4x128xbf16>
    %5 = vector.extract_strided_slice %1 {offsets = [1, 0, 0], sizes = [4, 4, 128], strides = [1, 1, 1]} : vector<6x6x128xbf16> to vector<4x4x128xbf16>
    %6 = vector.extract_strided_slice %1 {offsets = [1, 1, 0], sizes = [4, 4, 128], strides = [1, 1, 1]} : vector<6x6x128xbf16> to vector<4x4x128xbf16>
    %7 = vector.extract_strided_slice %1 {offsets = [1, 2, 0], sizes = [4, 4, 128], strides = [1, 1, 1]} : vector<6x6x128xbf16> to vector<4x4x128xbf16>
    %8 = vector.extract_strided_slice %1 {offsets = [2, 0, 0], sizes = [4, 4, 128], strides = [1, 1, 1]} : vector<6x6x128xbf16> to vector<4x4x128xbf16>
    %9 = vector.extract_strided_slice %1 {offsets = [2, 1, 0], sizes = [4, 4, 128], strides = [1, 1, 1]} : vector<6x6x128xbf16> to vector<4x4x128xbf16>
    %10 = vector.extract_strided_slice %1 {offsets = [2, 2, 0], sizes = [4, 4, 128], strides = [1, 1, 1]} : vector<6x6x128xbf16> to vector<4x4x128xbf16>
    %11 = tpu.concatenate %2, %3, %4, %5, %6, %7, %8, %9, %10 in 2 : vector<4x4x128xbf16>, vector<4x4x128xbf16>, vector<4x4x128xbf16>, vector<4x4x128xbf16>, vector<4x4x128xbf16>, vector<4x4x128xbf16>, vector<4x4x128xbf16>, vector<4x4x128xbf16>, vector<4x4x128xbf16> -> vector<4x4x1152xbf16>
    %12 = vector.shape_cast %11 : vector<4x4x1152xbf16> to vector<16x1152xbf16>
    %c0_3 = arith.constant 0 : index
    %c0_4 = arith.constant 0 : index
    %13 = vector.load %arg2[%c0_3, %c0_4] : memref<1152x128xbf16, #tpu.memory_space<vmem>>, vector<1152x128xbf16>
    %cst = arith.constant dense<0.000000e+00> : vector<16x128xf32>
    %14 = tpu.matmul %12, %13, %cst {dimension_numbers = #tpu.dot_dimension_numbers<[1], [0], [0], [1], [0, 0, 1, 1], [], []>} : vector<16x1152xbf16>, vector<1152x128xbf16>, vector<16x128xf32> -> vector<16x128xf32>
    %c0_5 = arith.constant 0 : index
    %c0_6 = arith.constant 0 : index
    %c0_7 = arith.constant 0 : index
    %15 = vector.load %arg3[%c0_5, %c0_6, %c0_7] : memref<1x16x128xf32, #tpu.memory_space<vmem>>, vector<1x16x128xf32>
    %16 = vector.shape_cast %15 : vector<1x16x128xf32> to vector<16x128xf32>
    %17 = vector.shape_cast %14 : vector<16x128xf32> to vector<1x16x128xf32>
    tpu.vector_store %arg3[%c0_5, %c0_6, %c0_7], %17 {strides = array<i32>} : memref<1x16x128xf32, #tpu.memory_space<vmem>>, vector<1x16x128xf32>,
    return
  }
  func.func @transform_0(%arg0: i32) -> (i32, i32, i32, i32) {
    %c0_i32 = arith.constant 0 : i32
    %c0_i32_0 = arith.constant 0 : i32
    %c0_i32_1 = arith.constant 0 : i32
    %c0_i32_2 = arith.constant 0 : i32
    return %arg0, %c0_i32, %c0_i32_0, %c0_i32_1 : i32, i32, i32, i32
  }
  func.func @transform_1(%arg0: i32) -> (i32, i32) {
    %c0_i32 = arith.constant 0 : i32
    %c0_i32_0 = arith.constant 0 : i32
    %c0_i32_1 = arith.constant 0 : i32
    return %c0_i32, %c0_i32_0 : i32, i32
  }
  func.func @transform_2(%arg0: i32) -> (i32, i32, i32) {
    %c0_i32 = arith.constant 0 : i32
    %c0_i32_0 = arith.constant 0 : i32
    %c0_i32_1 = arith.constant 0 : i32
    return %arg0, %c0_i32, %c0_i32_0 : i32, i32, i32
  }
}

module attributes {stable_mosaic.version = 11 : i64} {
  func.func @kernel(%arg0: i32, %arg1: memref<32x128xf32, #tpu.memory_space<vmem>>, %arg2: memref<1x128xf32, #tpu.memory_space<vmem>>, %arg3: memref<128x128xbf16, #tpu.memory_space<vmem>>, %arg4: memref<32x128xf32, #tpu.memory_space<vmem>>, %arg5: memref<32x128xf32, #tpu.memory_space<vmem>>) attributes {dimension_semantics = [#tpu.dimension_semantics<parallel>], iteration_bounds = array<i64: 1>, scalar_prefetch = 0 : i64, scratch_operands = 0 : i64, tpu.core_type = #tpu.core_type<tc>, window_params = [{transform_indices = @transform_0, window_bounds = array<i64: 32, 128>}, {pipeline_mode = #tpu.pipeline_mode<synchronous>, transform_indices = @transform_1, window_bounds = array<i64: 1, 128>}, {pipeline_mode = #tpu.pipeline_mode<synchronous>, transform_indices = @transform_2, window_bounds = array<i64: 128, 128>}, {transform_indices = @transform_3, window_bounds = array<i64: 32, 128>}, {transform_indices = @transform_4, window_bounds = array<i64: 32, 128>}]} {
    %c0 = arith.constant 0 : index
    %c0_0 = arith.constant 0 : index
    %0 = vector.load %arg1[%c0, %c0_0] : memref<32x128xf32, #tpu.memory_space<vmem>>, vector<32x128xf32>
    %c0_1 = arith.constant 0 : index
    %c0_2 = arith.constant 0 : index
    %1 = vector.load %arg2[%c0_1, %c0_2] : memref<1x128xf32, #tpu.memory_space<vmem>>, vector<1x128xf32>
    %2 = vector.broadcast %1 : vector<1x128xf32> to vector<32x128xf32>
    %3 = arith.addf %0, %2 : vector<32x128xf32>
    %cst = arith.constant 0.000000e+00 : f32
    %4 = vector.broadcast %cst : f32 to vector<32x128xf32>
    %5 = arith.cmpf oge, %3, %4 : vector<32x128xf32>
    %cst_3 = arith.constant 2.000000e-01 : f32
    %6 = vector.broadcast %cst_3 : f32 to vector<32x128xf32>
    %7 = arith.mulf %6, %3 : vector<32x128xf32>
    %8 = arith.select %5, %3, %7 : vector<32x128xi1>, vector<32x128xf32>
    %cst_4 = arith.constant 1.41421354 : f32
    %9 = vector.broadcast %cst_4 : f32 to vector<32x128xf32>
    %10 = arith.mulf %8, %9 : vector<32x128xf32>
    %c0_5 = arith.constant 0 : index
    %c0_6 = arith.constant 0 : index
    %11 = vector.load %arg4[%c0_5, %c0_6] : memref<32x128xf32, #tpu.memory_space<vmem>>, vector<32x128xf32>
    %12 = arith.truncf %10 : vector<32x128xf32> to vector<32x128xbf16>
    %c0_7 = arith.constant 0 : index
    %c0_8 = arith.constant 0 : index
    %13 = vector.load %arg3[%c0_7, %c0_8] : memref<128x128xbf16, #tpu.memory_space<vmem>>, vector<128x128xbf16>
    %cst_9 = arith.constant dense<0.000000e+00> : vector<32x128xf32>
    %14 = tpu.matmul %12, %13, %cst_9 {dimension_numbers = #tpu.dot_dimension_numbers<[1], [0], [0], [1], [0, 0, 1, 1], [], []>} : vector<32x128xbf16>, vector<128x128xbf16>, vector<32x128xf32> -> vector<32x128xf32>
    %15 = arith.addf %11, %14 : vector<32x128xf32>
    %c0_10 = arith.constant 0 : index
    %c0_11 = arith.constant 0 : index
    %16 = vector.load %arg5[%c0_10, %c0_11] : memref<32x128xf32, #tpu.memory_space<vmem>>, vector<32x128xf32>
    tpu.vector_store %arg5[%c0_10, %c0_11], %15 {strides = array<i32>} : memref<32x128xf32, #tpu.memory_space<vmem>>, vector<32x128xf32>,
    return
  }
  func.func @transform_0(%arg0: i32) -> (i32, i32) {
    %c0_i32 = arith.constant 0 : i32
    %c0_i32_0 = arith.constant 0 : i32
    return %arg0, %c0_i32 : i32, i32
  }
  func.func @transform_1(%arg0: i32) -> (i32, i32) {
    %c0_i32 = arith.constant 0 : i32
    %c0_i32_0 = arith.constant 0 : i32
    %c0_i32_1 = arith.constant 0 : i32
    return %c0_i32, %c0_i32_0 : i32, i32
  }
  func.func @transform_2(%arg0: i32) -> (i32, i32) {
    %c0_i32 = arith.constant 0 : i32
    %c0_i32_0 = arith.constant 0 : i32
    %c0_i32_1 = arith.constant 0 : i32
    return %c0_i32, %c0_i32_0 : i32, i32
  }
  func.func @transform_3(%arg0: i32) -> (i32, i32) {
    %c0_i32 = arith.constant 0 : i32
    %c0_i32_0 = arith.constant 0 : i32
    return %arg0, %c0_i32 : i32, i32
  }
  func.func @transform_4(%arg0: i32) -> (i32, i32) {
    %c0_i32 = arith.constant 0 : i32
    %c0_i32_0 = arith.constant 0 : i32
    return %arg0, %c0_i32 : i32, i32
  }
}

module attributes {stable_mosaic.version = 11 : i64} {
  func.func @kernel(%arg0: i32, %arg1: memref<1x6x6x128xbf16, #tpu.memory_space<vmem>>, %arg2: memref<1152x512xbf16, #tpu.memory_space<vmem>>, %arg3: memref<1x16x512xf32, #tpu.memory_space<vmem>>) attributes {dimension_semantics = [#tpu.dimension_semantics<parallel>], iteration_bounds = array<i64: 2>, scalar_prefetch = 0 : i64, scratch_operands = 0 : i64, tpu.core_type = #tpu.core_type<tc>, window_params = [{transform_indices = @transform_0, window_bounds = array<i64: 1, 6, 6, 128>}, {pipeline_mode = #tpu.pipeline_mode<synchronous>, transform_indices = @transform_1, window_bounds = array<i64: 1152, 512>}, {transform_indices = @transform_2, window_bounds = array<i64: 1, 16, 512>}]} {
    %c0 = arith.constant 0 : index
    %c0_0 = arith.constant 0 : index
    %c0_1 = arith.constant 0 : index
    %c0_2 = arith.constant 0 : index
    %0 = vector.load %arg1[%c0, %c0_0, %c0_1, %c0_2] : memref<1x6x6x128xbf16, #tpu.memory_space<vmem>>, vector<1x6x6x128xbf16>
    %1 = vector.shape_cast %0 : vector<1x6x6x128xbf16> to vector<6x6x128xbf16>
    %2 = vector.extract_strided_slice %1 {offsets = [0, 0, 0], sizes = [4, 4, 128], strides = [1, 1, 1]} : vector<6x6x128xbf16> to vector<4x4x128xbf16>
    %3 = vector.extract_strided_slice %1 {offsets = [0, 1, 0], sizes = [4, 4, 128], strides = [1, 1, 1]} : vector<6x6x128xbf16> to vector<4x4x128xbf16>
    %4 = vector.extract_strided_slice %1 {offsets = [0, 2, 0], sizes = [4, 4, 128], strides = [1, 1, 1]} : vector<6x6x128xbf16> to vector<4x4x128xbf16>
    %5 = vector.extract_strided_slice %1 {offsets = [1, 0, 0], sizes = [4, 4, 128], strides = [1, 1, 1]} : vector<6x6x128xbf16> to vector<4x4x128xbf16>
    %6 = vector.extract_strided_slice %1 {offsets = [1, 1, 0], sizes = [4, 4, 128], strides = [1, 1, 1]} : vector<6x6x128xbf16> to vector<4x4x128xbf16>
    %7 = vector.extract_strided_slice %1 {offsets = [1, 2, 0], sizes = [4, 4, 128], strides = [1, 1, 1]} : vector<6x6x128xbf16> to vector<4x4x128xbf16>
    %8 = vector.extract_strided_slice %1 {offsets = [2, 0, 0], sizes = [4, 4, 128], strides = [1, 1, 1]} : vector<6x6x128xbf16> to vector<4x4x128xbf16>
    %9 = vector.extract_strided_slice %1 {offsets = [2, 1, 0], sizes = [4, 4, 128], strides = [1, 1, 1]} : vector<6x6x128xbf16> to vector<4x4x128xbf16>
    %10 = vector.extract_strided_slice %1 {offsets = [2, 2, 0], sizes = [4, 4, 128], strides = [1, 1, 1]} : vector<6x6x128xbf16> to vector<4x4x128xbf16>
    %11 = tpu.concatenate %2, %3, %4, %5, %6, %7, %8, %9, %10 in 2 : vector<4x4x128xbf16>, vector<4x4x128xbf16>, vector<4x4x128xbf16>, vector<4x4x128xbf16>, vector<4x4x128xbf16>, vector<4x4x128xbf16>, vector<4x4x128xbf16>, vector<4x4x128xbf16>, vector<4x4x128xbf16> -> vector<4x4x1152xbf16>
    %12 = vector.shape_cast %11 : vector<4x4x1152xbf16> to vector<16x1152xbf16>
    %c0_3 = arith.constant 0 : index
    %c0_4 = arith.constant 0 : index
    %13 = vector.load %arg2[%c0_3, %c0_4] : memref<1152x512xbf16, #tpu.memory_space<vmem>>, vector<1152x512xbf16>
    %cst = arith.constant dense<0.000000e+00> : vector<16x512xf32>
    %14 = tpu.matmul %12, %13, %cst {dimension_numbers = #tpu.dot_dimension_numbers<[1], [0], [0], [1], [0, 0, 1, 1], [], []>} : vector<16x1152xbf16>, vector<1152x512xbf16>, vector<16x512xf32> -> vector<16x512xf32>
    %c0_5 = arith.constant 0 : index
    %c0_6 = arith.constant 0 : index
    %c0_7 = arith.constant 0 : index
    %15 = vector.load %arg3[%c0_5, %c0_6, %c0_7] : memref<1x16x512xf32, #tpu.memory_space<vmem>>, vector<1x16x512xf32>
    %16 = vector.shape_cast %15 : vector<1x16x512xf32> to vector<16x512xf32>
    %17 = vector.shape_cast %14 : vector<16x512xf32> to vector<1x16x512xf32>
    tpu.vector_store %arg3[%c0_5, %c0_6, %c0_7], %17 {strides = array<i32>} : memref<1x16x512xf32, #tpu.memory_space<vmem>>, vector<1x16x512xf32>,
    return
  }
  func.func @transform_0(%arg0: i32) -> (i32, i32, i32, i32) {
    %c0_i32 = arith.constant 0 : i32
    %c0_i32_0 = arith.constant 0 : i32
    %c0_i32_1 = arith.constant 0 : i32
    %c0_i32_2 = arith.constant 0 : i32
    return %arg0, %c0_i32, %c0_i32_0, %c0_i32_1 : i32, i32, i32, i32
  }
  func.func @transform_1(%arg0: i32) -> (i32, i32) {
    %c0_i32 = arith.constant 0 : i32
    %c0_i32_0 = arith.constant 0 : i32
    %c0_i32_1 = arith.constant 0 : i32
    return %c0_i32, %c0_i32_0 : i32, i32
  }
  func.func @transform_2(%arg0: i32) -> (i32, i32, i32) {
    %c0_i32 = arith.constant 0 : i32
    %c0_i32_0 = arith.constant 0 : i32
    %c0_i32_1 = arith.constant 0 : i32
    return %arg0, %c0_i32, %c0_i32_0 : i32, i32, i32
  }
}

module attributes {stable_mosaic.version = 11 : i64} {
  func.func @kernel(%arg0: i32, %arg1: memref<1x6x6x512xf32, #tpu.memory_space<vmem>>, %arg2: memref<1x4x2x4x256xf32, #tpu.memory_space<vmem>>) attributes {dimension_semantics = [#tpu.dimension_semantics<parallel>], iteration_bounds = array<i64: 2>, scalar_prefetch = 0 : i64, scratch_operands = 0 : i64, tpu.core_type = #tpu.core_type<tc>, window_params = [{transform_indices = @transform_0, window_bounds = array<i64: 1, 6, 6, 512>}, {transform_indices = @transform_1, window_bounds = array<i64: 1, 4, 2, 4, 256>}]} {
    %c0 = arith.constant 0 : index
    %c0_0 = arith.constant 0 : index
    %c0_1 = arith.constant 0 : index
    %c0_2 = arith.constant 0 : index
    %0 = vector.load %arg1[%c0, %c0_0, %c0_1, %c0_2] : memref<1x6x6x512xf32, #tpu.memory_space<vmem>>, vector<1x6x6x512xf32>
    %1 = vector.shape_cast %0 : vector<1x6x6x512xf32> to vector<6x6x512xf32>
    %cst = arith.constant 0.000000e+00 : f32
    %2 = vector.broadcast %cst : f32 to vector<4x4x128xf32>
    %3 = vector.extract_strided_slice %1 {offsets = [0, 0, 384], sizes = [4, 4, 128], strides = [1, 1, 1]} : vector<6x6x512xf32> to vector<4x4x128xf32>
    %cst_3 = arith.constant 6.250000e-02 : f32
    %4 = vector.broadcast %cst_3 : f32 to vector<4x4x128xf32>
    %5 = arith.mulf %4, %3 : vector<4x4x128xf32>
    %6 = arith.addf %2, %5 : vector<4x4x128xf32>
    %7 = vector.extract_strided_slice %1 {offsets = [0, 1, 256], sizes = [4, 4, 128], strides = [1, 1, 1]} : vector<6x6x512xf32> to vector<4x4x128xf32>
    %cst_4 = arith.constant 1.250000e-01 : f32
    %8 = vector.broadcast %cst_4 : f32 to vector<4x4x128xf32>
    %9 = arith.mulf %8, %7 : vector<4x4x128xf32>
    %10 = arith.addf %6, %9 : vector<4x4x128xf32>
    %11 = vector.extract_strided_slice %1 {offsets = [0, 1, 384], sizes = [4, 4, 128], strides = [1, 1, 1]} : vector<6x6x512xf32> to vector<4x4x128xf32>
    %cst_5 = arith.constant 6.250000e-02 : f32
    %12 = vector.broadcast %cst_5 : f32 to vector<4x4x128xf32>
    %13 = arith.mulf %12, %11 : vector<4x4x128xf32>
    %14 = arith.addf %10, %13 : vector<4x4x128xf32>
    %15 = vector.extract_strided_slice %1 {offsets = [1, 0, 128], sizes = [4, 4, 128], strides = [1, 1, 1]} : vector<6x6x512xf32> to vector<4x4x128xf32>
    %cst_6 = arith.constant 1.250000e-01 : f32
    %16 = vector.broadcast %cst_6 : f32 to vector<4x4x128xf32>
    %17 = arith.mulf %16, %15 : vector<4x4x128xf32>
    %18 = arith.addf %14, %17 : vector<4x4x128xf32>
    %19 = vector.extract_strided_slice %1 {offsets = [1, 1, 0], sizes = [4, 4, 128], strides = [1, 1, 1]} : vector<6x6x512xf32> to vector<4x4x128xf32>
    %cst_7 = arith.constant 2.500000e-01 : f32
    %20 = vector.broadcast %cst_7 : f32 to vector<4x4x128xf32>
    %21 = arith.mulf %20, %19 : vector<4x4x128xf32>
    %22 = arith.addf %18, %21 : vector<4x4x128xf32>
    %23 = vector.extract_strided_slice %1 {offsets = [1, 1, 128], sizes = [4, 4, 128], strides = [1, 1, 1]} : vector<6x6x512xf32> to vector<4x4x128xf32>
    %cst_8 = arith.constant 1.250000e-01 : f32
    %24 = vector.broadcast %cst_8 : f32 to vector<4x4x128xf32>
    %25 = arith.mulf %24, %23 : vector<4x4x128xf32>
    %26 = arith.addf %22, %25 : vector<4x4x128xf32>
    %27 = vector.extract_strided_slice %1 {offsets = [1, 0, 384], sizes = [4, 4, 128], strides = [1, 1, 1]} : vector<6x6x512xf32> to vector<4x4x128xf32>
    %cst_9 = arith.constant 6.250000e-02 : f32
    %28 = vector.broadcast %cst_9 : f32 to vector<4x4x128xf32>
    %29 = arith.mulf %28, %27 : vector<4x4x128xf32>
    %30 = arith.addf %26, %29 : vector<4x4x128xf32>
    %31 = vector.extract_strided_slice %1 {offsets = [1, 1, 256], sizes = [4, 4, 128], strides = [1, 1, 1]} : vector<6x6x512xf32> to vector<4x4x128xf32>
    %cst_10 = arith.constant 1.250000e-01 : f32
    %32 = vector.broadcast %cst_10 : f32 to vector<4x4x128xf32>
    %33 = arith.mulf %32, %31 : vector<4x4x128xf32>
    %34 = arith.addf %30, %33 : vector<4x4x128xf32>
    %35 = vector.extract_strided_slice %1 {offsets = [1, 1, 384], sizes = [4, 4, 128], strides = [1, 1, 1]} : vector<6x6x512xf32> to vector<4x4x128xf32>
    %cst_11 = arith.constant 6.250000e-02 : f32
    %36 = vector.broadcast %cst_11 : f32 to vector<4x4x128xf32>
    %37 = arith.mulf %36, %35 : vector<4x4x128xf32>
    %38 = arith.addf %34, %37 : vector<4x4x128xf32>
    %cst_12 = arith.constant 0.000000e+00 : f32
    %39 = vector.broadcast %cst_12 : f32 to vector<4x4x128xf32>
    %40 = vector.extract_strided_slice %1 {offsets = [0, 1, 256], sizes = [4, 4, 128], strides = [1, 1, 1]} : vector<6x6x512xf32> to vector<4x4x128xf32>
    %cst_13 = arith.constant 6.250000e-02 : f32
    %41 = vector.broadcast %cst_13 : f32 to vector<4x4x128xf32>
    %42 = arith.mulf %41, %40 : vector<4x4x128xf32>
    %43 = arith.addf %39, %42 : vector<4x4x128xf32>
    %44 = vector.extract_strided_slice %1 {offsets = [0, 1, 384], sizes = [4, 4, 128], strides = [1, 1, 1]} : vector<6x6x512xf32> to vector<4x4x128xf32>
    %cst_14 = arith.constant 1.250000e-01 : f32
    %45 = vector.broadcast %cst_14 : f32 to vector<4x4x128xf32>
    %46 = arith.mulf %45, %44 : vector<4x4x128xf32>
    %47 = arith.addf %43, %46 : vector<4x4x128xf32>
    %48 = vector.extract_strided_slice %1 {offsets = [0, 2, 256], sizes = [4, 4, 128], strides = [1, 1, 1]} : vector<6x6x512xf32> to vector<4x4x128xf32>
    %cst_15 = arith.constant 6.250000e-02 : f32
    %49 = vector.broadcast %cst_15 : f32 to vector<4x4x128xf32>
    %50 = arith.mulf %49, %48 : vector<4x4x128xf32>
    %51 = arith.addf %47, %50 : vector<4x4x128xf32>
    %52 = vector.extract_strided_slice %1 {offsets = [1, 1, 0], sizes = [4, 4, 128], strides = [1, 1, 1]} : vector<6x6x512xf32> to vector<4x4x128xf32>
    %cst_16 = arith.constant 1.250000e-01 : f32
    %53 = vector.broadcast %cst_16 : f32 to vector<4x4x128xf32>
    %54 = arith.mulf %53, %52 : vector<4x4x128xf32>
    %55 = arith.addf %51, %54 : vector<4x4x128xf32>
    %56 = vector.extract_strided_slice %1 {offsets = [1, 1, 128], sizes = [4, 4, 128], strides = [1, 1, 1]} : vector<6x6x512xf32> to vector<4x4x128xf32>
    %cst_17 = arith.constant 2.500000e-01 : f32
    %57 = vector.broadcast %cst_17 : f32 to vector<4x4x128xf32>
    %58 = arith.mulf %57, %56 : vector<4x4x128xf32>
    %59 = arith.addf %55, %58 : vector<4x4x128xf32>
    %60 = vector.extract_strided_slice %1 {offsets = [1, 2, 0], sizes = [4, 4, 128], strides = [1, 1, 1]} : vector<6x6x512xf32> to vector<4x4x128xf32>
    %cst_18 = arith.constant 1.250000e-01 : f32
    %61 = vector.broadcast %cst_18 : f32 to vector<4x4x128xf32>
    %62 = arith.mulf %61, %60 : vector<4x4x128xf32>
    %63 = arith.addf %59, %62 : vector<4x4x128xf32>
    %64 = vector.extract_strided_slice %1 {offsets = [1, 1, 256], sizes = [4, 4, 128], strides = [1, 1, 1]} : vector<6x6x512xf32> to vector<4x4x128xf32>
    %cst_19 = arith.constant 6.250000e-02 : f32
    %65 = vector.broadcast %cst_19 : f32 to vector<4x4x128xf32>
    %66 = arith.mulf %65, %64 : vector<4x4x128xf32>
    %67 = arith.addf %63, %66 : vector<4x4x128xf32>
    %68 = vector.extract_strided_slice %1 {offsets = [1, 1, 384], sizes = [4, 4, 128], strides = [1, 1, 1]} : vector<6x6x512xf32> to vector<4x4x128xf32>
    %cst_20 = arith.constant 1.250000e-01 : f32
    %69 = vector.broadcast %cst_20 : f32 to vector<4x4x128xf32>
    %70 = arith.mulf %69, %68 : vector<4x4x128xf32>
    %71 = arith.addf %67, %70 : vector<4x4x128xf32>
    %72 = vector.extract_strided_slice %1 {offsets = [1, 2, 256], sizes = [4, 4, 128], strides = [1, 1, 1]} : vector<6x6x512xf32> to vector<4x4x128xf32>
    %cst_21 = arith.constant 6.250000e-02 : f32
    %73 = vector.broadcast %cst_21 : f32 to vector<4x4x128xf32>
    %74 = arith.mulf %73, %72 : vector<4x4x128xf32>
    %75 = arith.addf %71, %74 : vector<4x4x128xf32>
    %76 = tpu.concatenate %38, %75 in 2 : vector<4x4x128xf32>, vector<4x4x128xf32> -> vector<4x4x256xf32>
    %c0_22 = arith.constant 0 : index
    %c0_23 = arith.constant 0 : index
    %c0_24 = arith.constant 0 : index
    %c0_25 = arith.constant 0 : index
    %c0_26 = arith.constant 0 : index
    %77 = vector.load %arg2[%c0_22, %c0_23, %c0_24, %c0_25, %c0_26] : memref<1x4x2x4x256xf32, #tpu.memory_space<vmem>>, vector<1x4x1x4x256xf32>
    %78 = vector.shape_cast %77 : vector<1x4x1x4x256xf32> to vector<4x4x256xf32>
    %79 = vector.shape_cast %76 : vector<4x4x256xf32> to vector<1x4x1x4x256xf32>
    tpu.vector_store %arg2[%c0_22, %c0_23, %c0_24, %c0_25, %c0_26], %79 {strides = array<i32>} : memref<1x4x2x4x256xf32, #tpu.memory_space<vmem>>, vector<1x4x1x4x256xf32>,
    %cst_27 = arith.constant 0.000000e+00 : f32
    %80 = vector.broadcast %cst_27 : f32 to vector<4x4x128xf32>
    %81 = vector.extract_strided_slice %1 {offsets = [1, 0, 128], sizes = [4, 4, 128], strides = [1, 1, 1]} : vector<6x6x512xf32> to vector<4x4x128xf32>
    %cst_28 = arith.constant 6.250000e-02 : f32
    %82 = vector.broadcast %cst_28 : f32 to vector<4x4x128xf32>
    %83 = arith.mulf %82, %81 : vector<4x4x128xf32>
    %84 = arith.addf %80, %83 : vector<4x4x128xf32>
    %85 = vector.extract_strided_slice %1 {offsets = [1, 1, 0], sizes = [4, 4, 128], strides = [1, 1, 1]} : vector<6x6x512xf32> to vector<4x4x128xf32>
    %cst_29 = arith.constant 1.250000e-01 : f32
    %86 = vector.broadcast %cst_29 : f32 to vector<4x4x128xf32>
    %87 = arith.mulf %86, %85 : vector<4x4x128xf32>
    %88 = arith.addf %84, %87 : vector<4x4x128xf32>
    %89 = vector.extract_strided_slice %1 {offsets = [1, 1, 128], sizes = [4, 4, 128], strides = [1, 1, 1]} : vector<6x6x512xf32> to vector<4x4x128xf32>
    %cst_30 = arith.constant 6.250000e-02 : f32
    %90 = vector.broadcast %cst_30 : f32 to vector<4x4x128xf32>
    %91 = arith.mulf %90, %89 : vector<4x4x128xf32>
    %92 = arith.addf %88, %91 : vector<4x4x128xf32>
    %93 = vector.extract_strided_slice %1 {offsets = [1, 0, 384], sizes = [4, 4, 128], strides = [1, 1, 1]} : vector<6x6x512xf32> to vector<4x4x128xf32>
    %cst_31 = arith.constant 1.250000e-01 : f32
    %94 = vector.broadcast %cst_31 : f32 to vector<4x4x128xf32>
    %95 = arith.mulf %94, %93 : vector<4x4x128xf32>
    %96 = arith.addf %92, %95 : vector<4x4x128xf32>
    %97 = vector.extract_strided_slice %1 {offsets = [1, 1, 256], sizes = [4, 4, 128], strides = [1, 1, 1]} : vector<6x6x512xf32> to vector<4x4x128xf32>
    %cst_32 = arith.constant 2.500000e-01 : f32
    %98 = vector.broadcast %cst_32 : f32 to vector<4x4x128xf32>
    %99 = arith.mulf %98, %97 : vector<4x4x128xf32>
    %100 = arith.addf %96, %99 : vector<4x4x128xf32>
    %101 = vector.extract_strided_slice %1 {offsets = [1, 1, 384], sizes = [4, 4, 128], strides = [1, 1, 1]} : vector<6x6x512xf32> to vector<4x4x128xf32>
    %cst_33 = arith.constant 1.250000e-01 : f32
    %102 = vector.broadcast %cst_33 : f32 to vector<4x4x128xf32>
    %103 = arith.mulf %102, %101 : vector<4x4x128xf32>
    %104 = arith.addf %100, %103 : vector<4x4x128xf32>
    %105 = vector.extract_strided_slice %1 {offsets = [2, 0, 128], sizes = [4, 4, 128], strides = [1, 1, 1]} : vector<6x6x512xf32> to vector<4x4x128xf32>
    %cst_34 = arith.constant 6.250000e-02 : f32
    %106 = vector.broadcast %cst_34 : f32 to vector<4x4x128xf32>
    %107 = arith.mulf %106, %105 : vector<4x4x128xf32>
    %108 = arith.addf %104, %107 : vector<4x4x128xf32>
    %109 = vector.extract_strided_slice %1 {offsets = [2, 1, 0], sizes = [4, 4, 128], strides = [1, 1, 1]} : vector<6x6x512xf32> to vector<4x4x128xf32>
    %cst_35 = arith.constant 1.250000e-01 : f32
    %110 = vector.broadcast %cst_35 : f32 to vector<4x4x128xf32>
    %111 = arith.mulf %110, %109 : vector<4x4x128xf32>
    %112 = arith.addf %108, %111 : vector<4x4x128xf32>
    %113 = vector.extract_strided_slice %1 {offsets = [2, 1, 128], sizes = [4, 4, 128], strides = [1, 1, 1]} : vector<6x6x512xf32> to vector<4x4x128xf32>
    %cst_36 = arith.constant 6.250000e-02 : f32
    %114 = vector.broadcast %cst_36 : f32 to vector<4x4x128xf32>
    %115 = arith.mulf %114, %113 : vector<4x4x128xf32>
    %116 = arith.addf %112, %115 : vector<4x4x128xf32>
    %cst_37 = arith.constant 0.000000e+00 : f32
    %117 = vector.broadcast %cst_37 : f32 to vector<4x4x128xf32>
    %118 = vector.extract_strided_slice %1 {offsets = [1, 1, 0], sizes = [4, 4, 128], strides = [1, 1, 1]} : vector<6x6x512xf32> to vector<4x4x128xf32>
    %cst_38 = arith.constant 6.250000e-02 : f32
    %119 = vector.broadcast %cst_38 : f32 to vector<4x4x128xf32>
    %120 = arith.mulf %119, %118 : vector<4x4x128xf32>
    %121 = arith.addf %117, %120 : vector<4x4x128xf32>
    %122 = vector.extract_strided_slice %1 {offsets = [1, 1, 128], sizes = [4, 4, 128], strides = [1, 1, 1]} : vector<6x6x512xf32> to vector<4x4x128xf32>
    %cst_39 = arith.constant 1.250000e-01 : f32
    %123 = vector.broadcast %cst_39 : f32 to vector<4x4x128xf32>
    %124 = arith.mulf %123, %122 : vector<4x4x128xf32>
    %125 = arith.addf %121, %124 : vector<4x4x128xf32>
    %126 = vector.extract_strided_slice %1 {offsets = [1, 2, 0], sizes = [4, 4, 128], strides = [1, 1, 1]} : vector<6x6x512xf32> to vector<4x4x128xf32>
    %cst_40 = arith.constant 6.250000e-02 : f32
    %127 = vector.broadcast %cst_40 : f32 to vector<4x4x128xf32>
    %128 = arith.mulf %127, %126 : vector<4x4x128xf32>
    %129 = arith.addf %125, %128 : vector<4x4x128xf32>
    %130 = vector.extract_strided_slice %1 {offsets = [1, 1, 256], sizes = [4, 4, 128], strides = [1, 1, 1]} : vector<6x6x512xf32> to vector<4x4x128xf32>
    %cst_41 = arith.constant 1.250000e-01 : f32
    %131 = vector.broadcast %cst_41 : f32 to vector<4x4x128xf32>
    %132 = arith.mulf %131, %130 : vector<4x4x128xf32>
    %133 = arith.addf %129, %132 : vector<4x4x128xf32>
    %134 = vector.extract_strided_slice %1 {offsets = [1, 1, 384], sizes = [4, 4, 128], strides = [1, 1, 1]} : vector<6x6x512xf32> to vector<4x4x128xf32>
    %cst_42 = arith.constant 2.500000e-01 : f32
    %135 = vector.broadcast %cst_42 : f32 to vector<4x4x128xf32>
    %136 = arith.mulf %135, %134 : vector<4x4x128xf32>
    %137 = arith.addf %133, %136 : vector<4x4x128xf32>
    %138 = vector.extract_strided_slice %1 {offsets = [1, 2, 256], sizes = [4, 4, 128], strides = [1, 1, 1]} : vector<6x6x512xf32> to vector<4x4x128xf32>
    %cst_43 = arith.constant 1.250000e-01 : f32
    %139 = vector.broadcast %cst_43 : f32 to vector<4x4x128xf32>
    %140 = arith.mulf %139, %138 : vector<4x4x128xf32>
    %141 = arith.addf %137, %140 : vector<4x4x128xf32>
    %142 = vector.extract_strided_slice %1 {offsets = [2, 1, 0], sizes = [4, 4, 128], strides = [1, 1, 1]} : vector<6x6x512xf32> to vector<4x4x128xf32>
    %cst_44 = arith.constant 6.250000e-02 : f32
    %143 = vector.broadcast %cst_44 : f32 to vector<4x4x128xf32>
    %144 = arith.mulf %143, %142 : vector<4x4x128xf32>
    %145 = arith.addf %141, %144 : vector<4x4x128xf32>
    %146 = vector.extract_strided_slice %1 {offsets = [2, 1, 128], sizes = [4, 4, 128], strides = [1, 1, 1]} : vector<6x6x512xf32> to vector<4x4x128xf32>
    %cst_45 = arith.constant 1.250000e-01 : f32
    %147 = vector.broadcast %cst_45 : f32 to vector<4x4x128xf32>
    %148 = arith.mulf %147, %146 : vector<4x4x128xf32>
    %149 = arith.addf %145, %148 : vector<4x4x128xf32>
    %150 = vector.extract_strided_slice %1 {offsets = [2, 2, 0], sizes = [4, 4, 128], strides = [1, 1, 1]} : vector<6x6x512xf32> to vector<4x4x128xf32>
    %cst_46 = arith.constant 6.250000e-02 : f32
    %151 = vector.broadcast %cst_46 : f32 to vector<4x4x128xf32>
    %152 = arith.mulf %151, %150 : vector<4x4x128xf32>
    %153 = arith.addf %149, %152 : vector<4x4x128xf32>
    %154 = tpu.concatenate %116, %153 in 2 : vector<4x4x128xf32>, vector<4x4x128xf32> -> vector<4x4x256xf32>
    %c0_47 = arith.constant 0 : index
    %c0_48 = arith.constant 0 : index
    %c1 = arith.constant 1 : index
    %c0_49 = arith.constant 0 : index
    %c0_50 = arith.constant 0 : index
    %155 = vector.load %arg2[%c0_47, %c0_48, %c1, %c0_49, %c0_50] : memref<1x4x2x4x256xf32, #tpu.memory_space<vmem>>, vector<1x4x1x4x256xf32>
    %156 = vector.shape_cast %155 : vector<1x4x1x4x256xf32> to vector<4x4x256xf32>
    %157 = vector.shape_cast %154 : vector<4x4x256xf32> to vector<1x4x1x4x256xf32>
    tpu.vector_store %arg2[%c0_47, %c0_48, %c1, %c0_49, %c0_50], %157 {strides = array<i32>} : memref<1x4x2x4x256xf32, #tpu.memory_space<vmem>>, vector<1x4x1x4x256xf32>,
    return
  }
  func.func @transform_0(%arg0: i32) -> (i32, i32, i32, i32) {
    %c0_i32 = arith.constant 0 : i32
    %c0_i32_0 = arith.constant 0 : i32
    %c0_i32_1 = arith.constant 0 : i32
    %c0_i32_2 = arith.constant 0 : i32
    return %arg0, %c0_i32, %c0_i32_0, %c0_i32_1 : i32, i32, i32, i32
  }
  func.func @transform_1(%arg0: i32) -> (i32, i32, i32, i32, i32) {
    %c0_i32 = arith.constant 0 : i32
    %c0_i32_0 = arith.constant 0 : i32
    %c0_i32_1 = arith.constant 0 : i32
    %c0_i32_2 = arith.constant 0 : i32
    %c0_i32_3 = arith.constant 0 : i32
    return %arg0, %c0_i32, %c0_i32_0, %c0_i32_1, %c0_i32_2 : i32, i32, i32, i32, i32
  }
}

module attributes {stable_mosaic.version = 11 : i64} {
  func.func @kernel(%arg0: i32, %arg1: memref<32x128xbf16, #tpu.memory_space<vmem>>, %arg2: memref<128x128xbf16, #tpu.memory_space<vmem>>, %arg3: memref<32x128xf32, #tpu.memory_space<vmem>>) attributes {dimension_semantics = [#tpu.dimension_semantics<parallel>], iteration_bounds = array<i64: 1>, scalar_prefetch = 0 : i64, scratch_operands = 0 : i64, tpu.core_type = #tpu.core_type<tc>, window_params = [{transform_indices = @transform_0, window_bounds = array<i64: 32, 128>}, {pipeline_mode = #tpu.pipeline_mode<synchronous>, transform_indices = @transform_1, window_bounds = array<i64: 128, 128>}, {transform_indices = @transform_2, window_bounds = array<i64: 32, 128>}]} {
    %c0 = arith.constant 0 : index
    %c0_0 = arith.constant 0 : index
    %0 = vector.load %arg1[%c0, %c0_0] : memref<32x128xbf16, #tpu.memory_space<vmem>>, vector<32x128xbf16>
    %c0_1 = arith.constant 0 : index
    %c0_2 = arith.constant 0 : index
    %1 = vector.load %arg2[%c0_1, %c0_2] : memref<128x128xbf16, #tpu.memory_space<vmem>>, vector<128x128xbf16>
    %cst = arith.constant dense<0.000000e+00> : vector<32x128xf32>
    %2 = tpu.matmul %0, %1, %cst {dimension_numbers = #tpu.dot_dimension_numbers<[1], [0], [0], [1], [0, 0, 1, 1], [], []>} : vector<32x128xbf16>, vector<128x128xbf16>, vector<32x128xf32> -> vector<32x128xf32>
    %c0_3 = arith.constant 0 : index
    %c0_4 = arith.constant 0 : index
    %3 = vector.load %arg3[%c0_3, %c0_4] : memref<32x128xf32, #tpu.memory_space<vmem>>, vector<32x128xf32>
    tpu.vector_store %arg3[%c0_3, %c0_4], %2 {strides = array<i32>} : memref<32x128xf32, #tpu.memory_space<vmem>>, vector<32x128xf32>,
    return
  }
  func.func @transform_0(%arg0: i32) -> (i32, i32) {
    %c0_i32 = arith.constant 0 : i32
    %c0_i32_0 = arith.constant 0 : i32
    return %arg0, %c0_i32 : i32, i32
  }
  func.func @transform_1(%arg0: i32) -> (i32, i32) {
    %c0_i32 = arith.constant 0 : i32
    %c0_i32_0 = arith.constant 0 : i32
    %c0_i32_1 = arith.constant 0 : i32
    return %c0_i32, %c0_i32_0 : i32, i32
  }
  func.func @transform_2(%arg0: i32) -> (i32, i32) {
    %c0_i32 = arith.constant 0 : i32
    %c0_i32_0 = arith.constant 0 : i32
    return %arg0, %c0_i32 : i32, i32
  }
}

module attributes {stable_mosaic.version = 11 : i64} {
  func.func @kernel(%arg0: i32, %arg1: memref<1x5x5x128xf32, #tpu.memory_space<vmem>>, %arg2: memref<1x4x2x4x256xf32, #tpu.memory_space<vmem>>) attributes {dimension_semantics = [#tpu.dimension_semantics<parallel>], iteration_bounds = array<i64: 2>, scalar_prefetch = 0 : i64, scratch_operands = 0 : i64, tpu.core_type = #tpu.core_type<tc>, window_params = [{transform_indices = @transform_0, window_bounds = array<i64: 1, 5, 5, 128>}, {transform_indices = @transform_1, window_bounds = array<i64: 1, 4, 2, 4, 256>}]} {
    %c0 = arith.constant 0 : index
    %c0_0 = arith.constant 0 : index
    %c0_1 = arith.constant 0 : index
    %c0_2 = arith.constant 0 : index
    %0 = vector.load %arg1[%c0, %c0_0, %c0_1, %c0_2] : memref<1x5x5x128xf32, #tpu.memory_space<vmem>>, vector<1x5x5x128xf32>
    %1 = vector.shape_cast %0 : vector<1x5x5x128xf32> to vector<5x5x128xf32>
    %cst = arith.constant 0.000000e+00 : f32
    %2 = vector.broadcast %cst : f32 to vector<4x4x128xf32>
    %3 = vector.extract_strided_slice %1 {offsets = [0, 0, 0], sizes = [4, 4, 128], strides = [1, 1, 1]} : vector<5x5x128xf32> to vector<4x4x128xf32>
    %cst_3 = arith.constant 2.500000e-01 : f32
    %4 = vector.broadcast %cst_3 : f32 to vector<4x4x128xf32>
    %5 = arith.mulf %4, %3 : vector<4x4x128xf32>
    %6 = arith.addf %2, %5 : vector<4x4x128xf32>
    %7 = vector.extract_strided_slice %1 {offsets = [0, 1, 0], sizes = [4, 4, 128], strides = [1, 1, 1]} : vector<5x5x128xf32> to vector<4x4x128xf32>
    %cst_4 = arith.constant 2.500000e-01 : f32
    %8 = vector.broadcast %cst_4 : f32 to vector<4x4x128xf32>
    %9 = arith.mulf %8, %7 : vector<4x4x128xf32>
    %10 = arith.addf %6, %9 : vector<4x4x128xf32>
    %11 = vector.extract_strided_slice %1 {offsets = [1, 0, 0], sizes = [4, 4, 128], strides = [1, 1, 1]} : vector<5x5x128xf32> to vector<4x4x128xf32>
    %cst_5 = arith.constant 2.500000e-01 : f32
    %12 = vector.broadcast %cst_5 : f32 to vector<4x4x128xf32>
    %13 = arith.mulf %12, %11 : vector<4x4x128xf32>
    %14 = arith.addf %10, %13 : vector<4x4x128xf32>
    %15 = vector.extract_strided_slice %1 {offsets = [1, 1, 0], sizes = [4, 4, 128], strides = [1, 1, 1]} : vector<5x5x128xf32> to vector<4x4x128xf32>
    %cst_6 = arith.constant 2.500000e-01 : f32
    %16 = vector.broadcast %cst_6 : f32 to vector<4x4x128xf32>
    %17 = arith.mulf %16, %15 : vector<4x4x128xf32>
    %18 = arith.addf %14, %17 : vector<4x4x128xf32>
    %cst_7 = arith.constant 0.000000e+00 : f32
    %19 = vector.broadcast %cst_7 : f32 to vector<4x4x128xf32>
    %20 = vector.extract_strided_slice %1 {offsets = [0, 1, 0], sizes = [4, 4, 128], strides = [1, 1, 1]} : vector<5x5x128xf32> to vector<4x4x128xf32>
    %cst_8 = arith.constant 5.000000e-01 : f32
    %21 = vector.broadcast %cst_8 : f32 to vector<4x4x128xf32>
    %22 = arith.mulf %21, %20 : vector<4x4x128xf32>
    %23 = arith.addf %19, %22 : vector<4x4x128xf32>
    %24 = vector.extract_strided_slice %1 {offsets = [1, 1, 0], sizes = [4, 4, 128], strides = [1, 1, 1]} : vector<5x5x128xf32> to vector<4x4x128xf32>
    %cst_9 = arith.constant 5.000000e-01 : f32
    %25 = vector.broadcast %cst_9 : f32 to vector<4x4x128xf32>
    %26 = arith.mulf %25, %24 : vector<4x4x128xf32>
    %27 = arith.addf %23, %26 : vector<4x4x128xf32>
    %28 = tpu.concatenate %18, %27 in 2 : vector<4x4x128xf32>, vector<4x4x128xf32> -> vector<4x4x256xf32>
    %c0_10 = arith.constant 0 : index
    %c0_11 = arith.constant 0 : index
    %c0_12 = arith.constant 0 : index
    %c0_13 = arith.constant 0 : index
    %c0_14 = arith.constant 0 : index
    %29 = vector.load %arg2[%c0_10, %c0_11, %c0_12, %c0_13, %c0_14] : memref<1x4x2x4x256xf32, #tpu.memory_space<vmem>>, vector<1x4x1x4x256xf32>
    %30 = vector.shape_cast %29 : vector<1x4x1x4x256xf32> to vector<4x4x256xf32>
    %31 = vector.shape_cast %28 : vector<4x4x256xf32> to vector<1x4x1x4x256xf32>
    tpu.vector_store %arg2[%c0_10, %c0_11, %c0_12, %c0_13, %c0_14], %31 {strides = array<i32>} : memref<1x4x2x4x256xf32, #tpu.memory_space<vmem>>, vector<1x4x1x4x256xf32>,
    %cst_15 = arith.constant 0.000000e+00 : f32
    %32 = vector.broadcast %cst_15 : f32 to vector<4x4x128xf32>
    %33 = vector.extract_strided_slice %1 {offsets = [1, 0, 0], sizes = [4, 4, 128], strides = [1, 1, 1]} : vector<5x5x128xf32> to vector<4x4x128xf32>
    %cst_16 = arith.constant 5.000000e-01 : f32
    %34 = vector.broadcast %cst_16 : f32 to vector<4x4x128xf32>
    %35 = arith.mulf %34, %33 : vector<4x4x128xf32>
    %36 = arith.addf %32, %35 : vector<4x4x128xf32>
    %37 = vector.extract_strided_slice %1 {offsets = [1, 1, 0], sizes = [4, 4, 128], strides = [1, 1, 1]} : vector<5x5x128xf32> to vector<4x4x128xf32>
    %cst_17 = arith.constant 5.000000e-01 : f32
    %38 = vector.broadcast %cst_17 : f32 to vector<4x4x128xf32>
    %39 = arith.mulf %38, %37 : vector<4x4x128xf32>
    %40 = arith.addf %36, %39 : vector<4x4x128xf32>
    %cst_18 = arith.constant 0.000000e+00 : f32
    %41 = vector.broadcast %cst_18 : f32 to vector<4x4x128xf32>
    %42 = vector.extract_strided_slice %1 {offsets = [1, 1, 0], sizes = [4, 4, 128], strides = [1, 1, 1]} : vector<5x5x128xf32> to vector<4x4x128xf32>
    %cst_19 = arith.constant 1.000000e+00 : f32
    %43 = vector.broadcast %cst_19 : f32 to vector<4x4x128xf32>
    %44 = arith.mulf %43, %42 : vector<4x4x128xf32>
    %45 = arith.addf %41, %44 : vector<4x4x128xf32>
    %46 = tpu.concatenate %40, %45 in 2 : vector<4x4x128xf32>, vector<4x4x128xf32> -> vector<4x4x256xf32>
    %c0_20 = arith.constant 0 : index
    %c0_21 = arith.constant 0 : index
    %c1 = arith.constant 1 : index
    %c0_22 = arith.constant 0 : index
    %c0_23 = arith.constant 0 : index
    %47 = vector.load %arg2[%c0_20, %c0_21, %c1, %c0_22, %c0_23] : memref<1x4x2x4x256xf32, #tpu.memory_space<vmem>>, vector<1x4x1x4x256xf32>
    %48 = vector.shape_cast %47 : vector<1x4x1x4x256xf32> to vector<4x4x256xf32>
    %49 = vector.shape_cast %46 : vector<4x4x256xf32> to vector<1x4x1x4x256xf32>
    tpu.vector_store %arg2[%c0_20, %c0_21, %c1, %c0_22, %c0_23], %49 {strides = array<i32>} : memref<1x4x2x4x256xf32, #tpu.memory_space<vmem>>, vector<1x4x1x4x256xf32>,
    return
  }
  func.func @transform_0(%arg0: i32) -> (i32, i32, i32, i32) {
    %c0_i32 = arith.constant 0 : i32
    %c0_i32_0 = arith.constant 0 : i32
    %c0_i32_1 = arith.constant 0 : i32
    %c0_i32_2 = arith.constant 0 : i32
    return %arg0, %c0_i32, %c0_i32_0, %c0_i32_1 : i32, i32, i32, i32
  }
  func.func @transform_1(%arg0: i32) -> (i32, i32, i32, i32, i32) {
    %c0_i32 = arith.constant 0 : i32
    %c0_i32_0 = arith.constant 0 : i32
    %c0_i32_1 = arith.constant 0 : i32
    %c0_i32_2 = arith.constant 0 : i32
    %c0_i32_3 = arith.constant 0 : i32
    return %arg0, %c0_i32, %c0_i32_0, %c0_i32_1, %c0_i32_2 : i32, i32, i32, i32, i32
  }
}

module attributes {stable_mosaic.version = 11 : i64} {
  func.func @kernel(%arg0: i32, %arg1: memref<128x128xf32, #tpu.memory_space<vmem>>, %arg2: memref<1x128xf32, #tpu.memory_space<vmem>>, %arg3: memref<128x128xbf16, #tpu.memory_space<vmem>>, %arg4: memref<128x128xf32, #tpu.memory_space<vmem>>, %arg5: memref<128x128xf32, #tpu.memory_space<vmem>>) attributes {dimension_semantics = [#tpu.dimension_semantics<parallel>], iteration_bounds = array<i64: 1>, scalar_prefetch = 0 : i64, scratch_operands = 0 : i64, tpu.core_type = #tpu.core_type<tc>, window_params = [{transform_indices = @transform_0, window_bounds = array<i64: 128, 128>}, {pipeline_mode = #tpu.pipeline_mode<synchronous>, transform_indices = @transform_1, window_bounds = array<i64: 1, 128>}, {pipeline_mode = #tpu.pipeline_mode<synchronous>, transform_indices = @transform_2, window_bounds = array<i64: 128, 128>}, {transform_indices = @transform_3, window_bounds = array<i64: 128, 128>}, {transform_indices = @transform_4, window_bounds = array<i64: 128, 128>}]} {
    %c0 = arith.constant 0 : index
    %c0_0 = arith.constant 0 : index
    %0 = vector.load %arg1[%c0, %c0_0] : memref<128x128xf32, #tpu.memory_space<vmem>>, vector<128x128xf32>
    %c0_1 = arith.constant 0 : index
    %c0_2 = arith.constant 0 : index
    %1 = vector.load %arg2[%c0_1, %c0_2] : memref<1x128xf32, #tpu.memory_space<vmem>>, vector<1x128xf32>
    %2 = vector.broadcast %1 : vector<1x128xf32> to vector<128x128xf32>
    %3 = arith.addf %0, %2 : vector<128x128xf32>
    %cst = arith.constant 0.000000e+00 : f32
    %4 = vector.broadcast %cst : f32 to vector<128x128xf32>
    %5 = arith.cmpf oge, %3, %4 : vector<128x128xf32>
    %cst_3 = arith.constant 2.000000e-01 : f32
    %6 = vector.broadcast %cst_3 : f32 to vector<128x128xf32>
    %7 = arith.mulf %6, %3 : vector<128x128xf32>
    %8 = arith.select %5, %3, %7 : vector<128x128xi1>, vector<128x128xf32>
    %cst_4 = arith.constant 1.41421354 : f32
    %9 = vector.broadcast %cst_4 : f32 to vector<128x128xf32>
    %10 = arith.mulf %8, %9 : vector<128x128xf32>
    %c0_5 = arith.constant 0 : index
    %c0_6 = arith.constant 0 : index
    %11 = vector.load %arg4[%c0_5, %c0_6] : memref<128x128xf32, #tpu.memory_space<vmem>>, vector<128x128xf32>
    %12 = arith.truncf %10 : vector<128x128xf32> to vector<128x128xbf16>
    %c0_7 = arith.constant 0 : index
    %c0_8 = arith.constant 0 : index
    %13 = vector.load %arg3[%c0_7, %c0_8] : memref<128x128xbf16, #tpu.memory_space<vmem>>, vector<128x128xbf16>
    %cst_9 = arith.constant dense<0.000000e+00> : vector<128x128xf32>
    %14 = tpu.matmul %12, %13, %cst_9 {dimension_numbers = #tpu.dot_dimension_numbers<[1], [0], [0], [1], [0, 0, 1, 1], [], []>} : vector<128x128xbf16>, vector<128x128xbf16>, vector<128x128xf32> -> vector<128x128xf32>
    %15 = arith.addf %11, %14 : vector<128x128xf32>
    %c0_10 = arith.constant 0 : index
    %c0_11 = arith.constant 0 : index
    %16 = vector.load %arg5[%c0_10, %c0_11] : memref<128x128xf32, #tpu.memory_space<vmem>>, vector<128x128xf32>
    tpu.vector_store %arg5[%c0_10, %c0_11], %15 {strides = array<i32>} : memref<128x128xf32, #tpu.memory_space<vmem>>, vector<128x128xf32>,
    return
  }
  func.func @transform_0(%arg0: i32) -> (i32, i32) {
    %c0_i32 = arith.constant 0 : i32
    %c0_i32_0 = arith.constant 0 : i32
    return %arg0, %c0_i32 : i32, i32
  }
  func.func @transform_1(%arg0: i32) -> (i32, i32) {
    %c0_i32 = arith.constant 0 : i32
    %c0_i32_0 = arith.constant 0 : i32
    %c0_i32_1 = arith.constant 0 : i32
    return %c0_i32, %c0_i32_0 : i32, i32
  }
  func.func @transform_2(%arg0: i32) -> (i32, i32) {
    %c0_i32 = arith.constant 0 : i32
    %c0_i32_0 = arith.constant 0 : i32
    %c0_i32_1 = arith.constant 0 : i32
    return %c0_i32, %c0_i32_0 : i32, i32
  }
  func.func @transform_3(%arg0: i32) -> (i32, i32) {
    %c0_i32 = arith.constant 0 : i32
    %c0_i32_0 = arith.constant 0 : i32
    return %arg0, %c0_i32 : i32, i32
  }
  func.func @transform_4(%arg0: i32) -> (i32, i32) {
    %c0_i32 = arith.constant 0 : i32
    %c0_i32_0 = arith.constant 0 : i32
    return %arg0, %c0_i32 : i32, i32
  }
}

module attributes {stable_mosaic.version = 11 : i64} {
  func.func @kernel(%arg0: i32, %arg1: memref<128x128xbf16, #tpu.memory_space<vmem>>, %arg2: memref<128x128xbf16, #tpu.memory_space<vmem>>, %arg3: memref<1x128xf32, #tpu.memory_space<vmem>>, %arg4: memref<128x128xf32, #tpu.memory_space<vmem>>) attributes {dimension_semantics = [#tpu.dimension_semantics<parallel>], iteration_bounds = array<i64: 1>, scalar_prefetch = 0 : i64, scratch_operands = 0 : i64, tpu.core_type = #tpu.core_type<tc>, window_params = [{transform_indices = @transform_0, window_bounds = array<i64: 128, 128>}, {pipeline_mode = #tpu.pipeline_mode<synchronous>, transform_indices = @transform_1, window_bounds = array<i64: 128, 128>}, {pipeline_mode = #tpu.pipeline_mode<synchronous>, transform_indices = @transform_2, window_bounds = array<i64: 1, 128>}, {transform_indices = @transform_3, window_bounds = array<i64: 128, 128>}]} {
    %c0 = arith.constant 0 : index
    %c0_0 = arith.constant 0 : index
    %0 = vector.load %arg1[%c0, %c0_0] : memref<128x128xbf16, #tpu.memory_space<vmem>>, vector<128x128xbf16>
    %c0_1 = arith.constant 0 : index
    %c0_2 = arith.constant 0 : index
    %1 = vector.load %arg2[%c0_1, %c0_2] : memref<128x128xbf16, #tpu.memory_space<vmem>>, vector<128x128xbf16>
    %cst = arith.constant dense<0.000000e+00> : vector<128x128xf32>
    %2 = tpu.matmul %0, %1, %cst {dimension_numbers = #tpu.dot_dimension_numbers<[1], [0], [0], [1], [0, 0, 1, 1], [], []>} : vector<128x128xbf16>, vector<128x128xbf16>, vector<128x128xf32> -> vector<128x128xf32>
    %c0_3 = arith.constant 0 : index
    %c0_4 = arith.constant 0 : index
    %3 = vector.load %arg3[%c0_3, %c0_4] : memref<1x128xf32, #tpu.memory_space<vmem>>, vector<1x128xf32>
    %4 = vector.broadcast %3 : vector<1x128xf32> to vector<128x128xf32>
    %5 = arith.addf %2, %4 : vector<128x128xf32>
    %cst_5 = arith.constant 0.000000e+00 : f32
    %6 = vector.broadcast %cst_5 : f32 to vector<128x128xf32>
    %7 = arith.cmpf oge, %5, %6 : vector<128x128xf32>
    %cst_6 = arith.constant 2.000000e-01 : f32
    %8 = vector.broadcast %cst_6 : f32 to vector<128x128xf32>
    %9 = arith.mulf %8, %5 : vector<128x128xf32>
    %10 = arith.select %7, %5, %9 : vector<128x128xi1>, vector<128x128xf32>
    %cst_7 = arith.constant 1.41421354 : f32
    %11 = vector.broadcast %cst_7 : f32 to vector<128x128xf32>
    %12 = arith.mulf %10, %11 : vector<128x128xf32>
    %c0_8 = arith.constant 0 : index
    %c0_9 = arith.constant 0 : index
    %13 = vector.load %arg4[%c0_8, %c0_9] : memref<128x128xf32, #tpu.memory_space<vmem>>, vector<128x128xf32>
    tpu.vector_store %arg4[%c0_8, %c0_9], %12 {strides = array<i32>} : memref<128x128xf32, #tpu.memory_space<vmem>>, vector<128x128xf32>,
    return
  }
  func.func @transform_0(%arg0: i32) -> (i32, i32) {
    %c0_i32 = arith.constant 0 : i32
    %c0_i32_0 = arith.constant 0 : i32
    return %arg0, %c0_i32 : i32, i32
  }
  func.func @transform_1(%arg0: i32) -> (i32, i32) {
    %c0_i32 = arith.constant 0 : i32
    %c0_i32_0 = arith.constant 0 : i32
    %c0_i32_1 = arith.constant 0 : i32
    return %c0_i32, %c0_i32_0 : i32, i32
  }
  func.func @transform_2(%arg0: i32) -> (i32, i32) {
    %c0_i32 = arith.constant 0 : i32
    %c0_i32_0 = arith.constant 0 : i32
    %c0_i32_1 = arith.constant 0 : i32
    return %c0_i32, %c0_i32_0 : i32, i32
  }
  func.func @transform_3(%arg0: i32) -> (i32, i32) {
    %c0_i32 = arith.constant 0 : i32
    %c0_i32_0 = arith.constant 0 : i32
    return %arg0, %c0_i32 : i32, i32
  }
}

module attributes {stable_mosaic.version = 11 : i64} {
  func.func @kernel(%arg0: i32, %arg1: memref<1x10x10x128xbf16, #tpu.memory_space<vmem>>, %arg2: memref<1152x128xbf16, #tpu.memory_space<vmem>>, %arg3: memref<1x64x128xf32, #tpu.memory_space<vmem>>) attributes {dimension_semantics = [#tpu.dimension_semantics<parallel>], iteration_bounds = array<i64: 2>, scalar_prefetch = 0 : i64, scratch_operands = 0 : i64, tpu.core_type = #tpu.core_type<tc>, window_params = [{transform_indices = @transform_0, window_bounds = array<i64: 1, 10, 10, 128>}, {pipeline_mode = #tpu.pipeline_mode<synchronous>, transform_indices = @transform_1, window_bounds = array<i64: 1152, 128>}, {transform_indices = @transform_2, window_bounds = array<i64: 1, 64, 128>}]} {
    %c0 = arith.constant 0 : index
    %c0_0 = arith.constant 0 : index
    %c0_1 = arith.constant 0 : index
    %c0_2 = arith.constant 0 : index
    %0 = vector.load %arg1[%c0, %c0_0, %c0_1, %c0_2] : memref<1x10x10x128xbf16, #tpu.memory_space<vmem>>, vector<1x10x10x128xbf16>
    %1 = vector.shape_cast %0 : vector<1x10x10x128xbf16> to vector<10x10x128xbf16>
    %2 = vector.extract_strided_slice %1 {offsets = [0, 0, 0], sizes = [8, 8, 128], strides = [1, 1, 1]} : vector<10x10x128xbf16> to vector<8x8x128xbf16>
    %3 = vector.extract_strided_slice %1 {offsets = [0, 1, 0], sizes = [8, 8, 128], strides = [1, 1, 1]} : vector<10x10x128xbf16> to vector<8x8x128xbf16>
    %4 = vector.extract_strided_slice %1 {offsets = [0, 2, 0], sizes = [8, 8, 128], strides = [1, 1, 1]} : vector<10x10x128xbf16> to vector<8x8x128xbf16>
    %5 = vector.extract_strided_slice %1 {offsets = [1, 0, 0], sizes = [8, 8, 128], strides = [1, 1, 1]} : vector<10x10x128xbf16> to vector<8x8x128xbf16>
    %6 = vector.extract_strided_slice %1 {offsets = [1, 1, 0], sizes = [8, 8, 128], strides = [1, 1, 1]} : vector<10x10x128xbf16> to vector<8x8x128xbf16>
    %7 = vector.extract_strided_slice %1 {offsets = [1, 2, 0], sizes = [8, 8, 128], strides = [1, 1, 1]} : vector<10x10x128xbf16> to vector<8x8x128xbf16>
    %8 = vector.extract_strided_slice %1 {offsets = [2, 0, 0], sizes = [8, 8, 128], strides = [1, 1, 1]} : vector<10x10x128xbf16> to vector<8x8x128xbf16>
    %9 = vector.extract_strided_slice %1 {offsets = [2, 1, 0], sizes = [8, 8, 128], strides = [1, 1, 1]} : vector<10x10x128xbf16> to vector<8x8x128xbf16>
    %10 = vector.extract_strided_slice %1 {offsets = [2, 2, 0], sizes = [8, 8, 128], strides = [1, 1, 1]} : vector<10x10x128xbf16> to vector<8x8x128xbf16>
    %11 = tpu.concatenate %2, %3, %4, %5, %6, %7, %8, %9, %10 in 2 : vector<8x8x128xbf16>, vector<8x8x128xbf16>, vector<8x8x128xbf16>, vector<8x8x128xbf16>, vector<8x8x128xbf16>, vector<8x8x128xbf16>, vector<8x8x128xbf16>, vector<8x8x128xbf16>, vector<8x8x128xbf16> -> vector<8x8x1152xbf16>
    %12 = vector.shape_cast %11 : vector<8x8x1152xbf16> to vector<64x1152xbf16>
    %c0_3 = arith.constant 0 : index
    %c0_4 = arith.constant 0 : index
    %13 = vector.load %arg2[%c0_3, %c0_4] : memref<1152x128xbf16, #tpu.memory_space<vmem>>, vector<1152x128xbf16>
    %cst = arith.constant dense<0.000000e+00> : vector<64x128xf32>
    %14 = tpu.matmul %12, %13, %cst {dimension_numbers = #tpu.dot_dimension_numbers<[1], [0], [0], [1], [0, 0, 1, 1], [], []>} : vector<64x1152xbf16>, vector<1152x128xbf16>, vector<64x128xf32> -> vector<64x128xf32>
    %c0_5 = arith.constant 0 : index
    %c0_6 = arith.constant 0 : index
    %c0_7 = arith.constant 0 : index
    %15 = vector.load %arg3[%c0_5, %c0_6, %c0_7] : memref<1x64x128xf32, #tpu.memory_space<vmem>>, vector<1x64x128xf32>
    %16 = vector.shape_cast %15 : vector<1x64x128xf32> to vector<64x128xf32>
    %17 = vector.shape_cast %14 : vector<64x128xf32> to vector<1x64x128xf32>
    tpu.vector_store %arg3[%c0_5, %c0_6, %c0_7], %17 {strides = array<i32>} : memref<1x64x128xf32, #tpu.memory_space<vmem>>, vector<1x64x128xf32>,
    return
  }
  func.func @transform_0(%arg0: i32) -> (i32, i32, i32, i32) {
    %c0_i32 = arith.constant 0 : i32
    %c0_i32_0 = arith.constant 0 : i32
    %c0_i32_1 = arith.constant 0 : i32
    %c0_i32_2 = arith.constant 0 : i32
    return %arg0, %c0_i32, %c0_i32_0, %c0_i32_1 : i32, i32, i32, i32
  }
  func.func @transform_1(%arg0: i32) -> (i32, i32) {
    %c0_i32 = arith.constant 0 : i32
    %c0_i32_0 = arith.constant 0 : i32
    %c0_i32_1 = arith.constant 0 : i32
    return %c0_i32, %c0_i32_0 : i32, i32
  }
  func.func @transform_2(%arg0: i32) -> (i32, i32, i32) {
    %c0_i32 = arith.constant 0 : i32
    %c0_i32_0 = arith.constant 0 : i32
    %c0_i32_1 = arith.constant 0 : i32
    return %arg0, %c0_i32, %c0_i32_0 : i32, i32, i32
  }
}

module attributes {stable_mosaic.version = 11 : i64} {
  func.func @kernel(%arg0: i32, %arg1: memref<128x128xbf16, #tpu.memory_space<vmem>>, %arg2: memref<128x128xbf16, #tpu.memory_space<vmem>>, %arg3: memref<128x128xf32, #tpu.memory_space<vmem>>) attributes {dimension_semantics = [#tpu.dimension_semantics<parallel>], iteration_bounds = array<i64: 1>, scalar_prefetch = 0 : i64, scratch_operands = 0 : i64, tpu.core_type = #tpu.core_type<tc>, window_params = [{transform_indices = @transform_0, window_bounds = array<i64: 128, 128>}, {pipeline_mode = #tpu.pipeline_mode<synchronous>, transform_indices = @transform_1, window_bounds = array<i64: 128, 128>}, {transform_indices = @transform_2, window_bounds = array<i64: 128, 128>}]} {
    %c0 = arith.constant 0 : index
    %c0_0 = arith.constant 0 : index
    %0 = vector.load %arg1[%c0, %c0_0] : memref<128x128xbf16, #tpu.memory_space<vmem>>, vector<128x128xbf16>
    %c0_1 = arith.constant 0 : index
    %c0_2 = arith.constant 0 : index
    %1 = vector.load %arg2[%c0_1, %c0_2] : memref<128x128xbf16, #tpu.memory_space<vmem>>, vector<128x128xbf16>
    %cst = arith.constant dense<0.000000e+00> : vector<128x128xf32>
    %2 = tpu.matmul %0, %1, %cst {dimension_numbers = #tpu.dot_dimension_numbers<[1], [0], [0], [1], [0, 0, 1, 1], [], []>} : vector<128x128xbf16>, vector<128x128xbf16>, vector<128x128xf32> -> vector<128x128xf32>
    %c0_3 = arith.constant 0 : index
    %c0_4 = arith.constant 0 : index
    %3 = vector.load %arg3[%c0_3, %c0_4] : memref<128x128xf32, #tpu.memory_space<vmem>>, vector<128x128xf32>
    tpu.vector_store %arg3[%c0_3, %c0_4], %2 {strides = array<i32>} : memref<128x128xf32, #tpu.memory_space<vmem>>, vector<128x128xf32>,
    return
  }
  func.func @transform_0(%arg0: i32) -> (i32, i32) {
    %c0_i32 = arith.constant 0 : i32
    %c0_i32_0 = arith.constant 0 : i32
    return %arg0, %c0_i32 : i32, i32
  }
  func.func @transform_1(%arg0: i32) -> (i32, i32) {
    %c0_i32 = arith.constant 0 : i32
    %c0_i32_0 = arith.constant 0 : i32
    %c0_i32_1 = arith.constant 0 : i32
    return %c0_i32, %c0_i32_0 : i32, i32
  }
  func.func @transform_2(%arg0: i32) -> (i32, i32) {
    %c0_i32 = arith.constant 0 : i32
    %c0_i32_0 = arith.constant 0 : i32
    return %arg0, %c0_i32 : i32, i32
  }
}

</mosaic_0001>

<bundles_post_ra>
// kernel: generator_forward.16
= control target key start
LH: loop header
LB: loop body
LE: loop exit
PB: predicated region body
PF: predicated region fallthrough
CT: control target
= control target key end

     0   :  { %7 = vsyncpa [#allocation3], 0  ;;  %s164_s9 = smov [#allocation2]   ;;  %s202_s0 = inlined_call_operand.vmem [shape: bf16[2,64], index: 0, kind: input, shape index: {}]   ;;  %s203_s1 = inlined_call_operand.hbm [shape: bf16[64,128], index: 1, kind: input, shape index: {}]   ;;  %s204_s2 = inlined_call_operand.vmem [shape: f32[2,128], index: 2, kind: output, shape index: {}]  }
   0x1   :  { %s15_s10 = sshll.u32 %s164_s9, 4  ;;  %s140_s13 = scalar_lea.hbm %s203_s1, 512  ;;  %s16_s10 = int_to_ptr.vmem [resolvable:$true] %s15_s10 }
   0x2   :  { %p141_p0 = scmp.ne.s32.totalorder %s203_s1, %s140_s13  ;;  %p144_p1 = scmp.lt.u32.totalorder %s140_s13, %s203_s1 }
   0x4   :  { %p146_p2 = pnand %p144_p1, %p141_p0 }
   0x6   :  { %149 = shalt.err (!%p146_p2)
}
   0x7   :  { %s150_s18 = scalar_lea.vmem %s16_s10, 512  ;;  %p155_p4 = scmp.lt.s32.totalorder %s16_s10, %s16_s10 }
   0x8   :  { %p151_p3 = scmp.ne.s32.totalorder %s16_s10, %s150_s18  ;;  %p156_p5 = scmp.lt.s32.totalorder %s150_s18, %s150_s18 }
   0xa   :  { %p157_p6 = por %p156_p5, %p155_p4 }
   0xc   :  { %p158_p7 = pnand %p157_p6, %p151_p3 }
   0xe   :  { %161 = shalt.err (!%p158_p7)
}
   0xf   :  { %s165_s19 = smov 64   ;;  %s166_s20 = smov 4  }
  0x10   :  { %21 = dma.hbm_to_vmem [thread:$0]  %s203_s1, 512, %s16_s10, [#allocation3], %s165_s19, %s165_s19, %s166_s20  }
  0x11   :  { %162 = dma.done.wait [#allocation3], 512  }
  0x12   :  { %163 = vsyncadd [#allocation3], 4294966784  ;;  %v167_v0 = vmov 0.0   ;;  %vm168_vm0 = vmmov 0   ;;  %v136_v1 = vld [vmem:[#allocation2] sm:$0xff]   ;;  %v137_v2 = vld [vmem:[#allocation2 + $0x8] sm:$0xff]  }
  0x13   :  { %119 = vmatprep.subr.bf16.mxu0 %v167_v0  ;;  %127 = vmatprep.mubr.msk.bf16.mxu0 %vm168_vm0, %v167_v0  ;;  %v138_v3 = vld [vmem:[#allocation2 + $0x10] sm:$0xff]   ;;  %v139_v4 = vld [vmem:[#allocation2 + $0x18] sm:$0xff]   ;;  %v26_v5 = vld [vmem:[%s202_s0] sm:$0x1]  ;;  %vm59_vm1 = vcmask 523264  }
  0x14   :  { %120 = vmatpush3.bf16.msra.mxu0 %v136_v1 }
  0x15   :  { %121 = vmatprep.subr.bf16.mxu0 %v167_v0 }
  0x18   :  { %122 = vmatpush3.bf16.msra.mxu0 %v137_v2 }
  0x19   :  { %123 = vmatprep.subr.bf16.mxu0 %v167_v0 }
  0x1c   :  { %124 = vmatpush3.bf16.msra.mxu0 %v138_v3 }
  0x1d   :  { %125 = vmatprep.subr.bf16.mxu0 %v167_v0 }
  0x20   :  { %126 = vmatpush3.bf16.msra.mxu0 %v139_v4 }
  0x23   :  { %128 = vmatmul.mubr.msk.bf16.vlgmr.msra.gmra.mrb[0].mxu0 %vm59_vm1, %v26_v5 }
  0xf6   :  { %v97_v6 = vpop.f32.mrb[0].mxu0 }
  0xf7   :  { %103 = vst [vmem:[%s204_s2] sm:$0x3] %v97_v6  ;;  %v129_v7 = vpop.f32.mrb[1].mxu0 }
  0xf8   :  { %v100_v8 = vpop.f32.mrb[2].mxu0 }
  0xf9   :  { %v130_v9 = vpop.f32.mrb[3].mxu0 }
  0xfa   :  { %108 = vsyncpa [#allocation3], 1 }

// kernel: generator_forward.17
= control target key start
LH: loop header
LB: loop body
LE: loop exit
PB: predicated region body
PF: predicated region fallthrough
CT: control target
= control target key end

     0   :  { %8 = vsyncpa [#allocation3], 0  ;;  %s372_s0 = inlined_call_operand.vmem [shape: bf16[32,128], index: 0, kind: input, shape index: {}]   ;;  %s373_s1 = inlined_call_operand.hbm [shape: bf16[128,128], index: 1, kind: input, shape index: {}]   ;;  %s374_s2 = inlined_call_operand.hbm [shape: f32[1,128], index: 2, kind: input, shape index: {}]   ;;  %s375_s3 = inlined_call_operand.vmem [shape: f32[32,128], index: 3, kind: output, shape index: {}]  }
   0x1   :  { %9 = vsyncpa [#allocation5], 0  ;;  %s306_s12 = smov [#allocation2]   ;;  %s258_s16 = scalar_lea.hbm %s373_s1, 1024 }
   0x2   :  { %s17_s13 = sshll.u32 %s306_s12, 4  ;;  %p259_p0 = scmp.ne.s32.totalorder %s373_s1, %s258_s16  ;;  %s18_s13 = int_to_ptr.vmem [resolvable:$true] %s17_s13 }
   0x3   :  { %p262_p1 = scmp.lt.u32.totalorder %s258_s16, %s373_s1 }
   0x5   :  { %p264_p2 = pnand %p262_p1, %p259_p0 }
   0x7   :  { %267 = shalt.err (!%p264_p2)
}
   0x8   :  { %s268_s21 = scalar_lea.vmem %s18_s13, 1024  ;;  %p273_p4 = scmp.lt.s32.totalorder %s18_s13, %s18_s13 }
   0x9   :  { %p269_p3 = scmp.ne.s32.totalorder %s18_s13, %s268_s21  ;;  %p274_p5 = scmp.lt.s32.totalorder %s268_s21, %s268_s21 }
   0xb   :  { %p275_p6 = por %p274_p5, %p273_p4 }
   0xd   :  { %p276_p7 = pnand %p275_p6, %p269_p3 }
   0xf   :  { %279 = shalt.err (!%p276_p7)
}
  0x10   :  { %s307_s22 = smov 64   ;;  %s308_s23 = smov 4  }
  0x11   :  { %23 = dma.hbm_to_vmem [thread:$0]  %s373_s1, 1024, %s18_s13, [#allocation3], %s307_s22, %s307_s22, %s308_s23  }
  0x12   :  { %s309_s26 = smov [#allocation4]   ;;  %s280_s30 = scalar_lea.hbm %s374_s2, 16 }
  0x13   :  { %s30_s27 = sshll.u32 %s309_s26, 4  ;;  %p281_p8 = scmp.ne.s32.totalorder %s374_s2, %s280_s30  ;;  %s31_s27 = int_to_ptr.vmem [resolvable:$true] %s30_s27 }
  0x14   :  { %p284_p9 = scmp.lt.u32.totalorder %s280_s30, %s374_s2 }
  0x16   :  { %p286_p10 = pnand %p284_p9, %p281_p8 }
  0x18   :  { %289 = shalt.err (!%p286_p10)
}
  0x19   :  { %s290_s8 = scalar_lea.vmem %s31_s27, 16  ;;  %s294_s1 = scalar_lea.vmem %s31_s27, 32 }
  0x1a   :  { %p291_p11 = scmp.ne.s32.totalorder %s31_s27, %s290_s8  ;;  %p295_p12 = scmp.lt.s32.totalorder %s31_s27, %s31_s27 }
  0x1b   :  { %p296_p13 = scmp.lt.s32.totalorder %s294_s1, %s290_s8 }
  0x1d   :  { %p297_p0 = por %p296_p13, %p295_p12 }
  0x1f   :  { %p298_p1 = pnand %p297_p0, %p291_p11 }
  0x21   :  { %301 = shalt.err (!%p298_p1)
}
  0x22   :  { %33 = dma.hbm_to_vmem [thread:$0]  %s374_s2, 16, %s31_s27, [#allocation5]  }
  0x23   :  { %302 = dma.done.wait [#allocation3], 1024  }
  0x24   :  { %303 = vsyncadd [#allocation3], 4294966272 }
  0x25   :  { %304 = dma.done.wait [#allocation5], 16  }
  0x26   :  { %305 = vsyncadd [#allocation5], 4294967280  ;;  %v248_v0 = vld [vmem:[#allocation2] sm:$0xff]   ;;  %v249_v1 = vld [vmem:[#allocation2 + $0x8] sm:$0xff]  }
  0x27   :  { %224 = vmatprep.subr.bf16.mxu0 %v248_v0  ;;  %v250_v2 = vld [vmem:[#allocation2 + $0x10] sm:$0xff]   ;;  %v251_v3 = vld [vmem:[#allocation2 + $0x18] sm:$0xff]   ;;  %v256_v4 = vld [vmem:[%s372_s0] sm:$0xff]  }
  0x28   :  { %225 = vmatpush3.bf16.msra.mxu0 %v248_v0  ;;  %240 = vmatprep.mubr.bf16.mxu0 %v256_v4  ;;  %v252_v5 = vld [vmem:[#allocation2 + $0x20] sm:$0xff]   ;;  %v253_v6 = vld [vmem:[#allocation2 + $0x28] sm:$0xff]   ;;  %v254_v7 = vld [vmem:[#allocation2 + $0x30] sm:$0xff]  }
  0x29   :  { %226 = vmatprep.subr.bf16.mxu0 %v249_v1  ;;  %v255_v8 = vld [vmem:[#allocation2 + $0x38] sm:$0xff]   ;;  %v257_v9 = vld [vmem:[%s372_s0 + $0x8] sm:$0xff]   ;;  %v203_v10 = vld [vmem:[#allocation4] ss:$0 sm:$0xff] }
  0x2c   :  { %227 = vmatpush3.bf16.msra.mxu0 %v249_v1 }
  0x2d   :  { %228 = vmatprep.subr.bf16.mxu0 %v250_v2 }
  0x30   :  { %229 = vmatpush3.bf16.msra.mxu0 %v250_v2 }
  0x31   :  { %230 = vmatprep.subr.bf16.mxu0 %v251_v3 }
  0x34   :  { %231 = vmatpush3.bf16.msra.mxu0 %v251_v3 }
  0x35   :  { %232 = vmatprep.subr.bf16.mxu0 %v252_v5 }
  0x38   :  { %233 = vmatpush3.bf16.msra.mxu0 %v252_v5 }
  0x39   :  { %234 = vmatprep.subr.bf16.mxu0 %v253_v6 }
  0x3c   :  { %235 = vmatpush3.bf16.msra.mxu0 %v253_v6 }
  0x3d   :  { %236 = vmatprep.subr.bf16.mxu0 %v254_v7 }
  0x40   :  { %237 = vmatpush3.bf16.msra.mxu0 %v254_v7 }
  0x41   :  { %238 = vmatprep.subr.bf16.mxu0 %v255_v8 }
  0x44   :  { %239 = vmatpush3.bf16.msra.mxu0 %v255_v8 }
  0x47   :  { %241 = vmatmul.mubr.bf16.vlgmr.msra.gmra.mrb[0].mxu0 %v257_v9 }
 0x11a   :  { %v242_v11 = vpop.f32.mrb[0].mxu0 }
 0x11b   :  { %v171_v12 = vadd.f32 %v242_v11, %v203_v10  ;;  %v162_v13 = vpop.f32.mrb[1].mxu0 }
 0x11c   :  { %v163_v14 = vadd.f32 %v203_v10, %v162_v13  ;;  %v243_v15 = vpop.f32.mrb[2].mxu0 }
 0x11d   :  { %vm179_vm0 = vcmp.ge.f32.partialorder %v171_v12, 0.0  ;;  %v183_v16 = vmul.f32 0.2, %v171_v12  ;;  %v174_v17 = vadd.f32 %v243_v15, %v203_v10  ;;  %v165_v18 = vpop.f32.mrb[3].mxu0 }
 0x11e   :  { %vm177_vm1 = vcmp.ge.f32.partialorder %v163_v14, 0.0  ;;  %v181_v19 = vmul.f32 0.2, %v163_v14  ;;  %v166_v20 = vadd.f32 %v203_v10, %v165_v18 }
 0x11f   :  { %v187_v21 = vsel %vm179_vm0, %v171_v12, %v183_v16  ;;  %vm180_vm2 = vcmp.ge.f32.partialorder %v174_v17, 0.0  ;;  %v184_v22 = vmul.f32 0.2, %v174_v17 }
 0x120   :  { %v191_v23 = vmul.f32 1.4142135, %v187_v21  ;;  %v185_v24 = vsel %vm177_vm1, %v163_v14, %v181_v19  ;;  %vm178_vm3 = vcmp.ge.f32.partialorder %v166_v20, 0.0  ;;  %v182_v25 = vmul.f32 0.2, %v166_v20 }
 0x121   :  { %v189_v26 = vmul.f32 1.4142135, %v185_v24  ;;  %v188_v27 = vsel %vm180_vm2, %v174_v17, %v184_v22 }
 0x122   :  { %195 = vst [vmem:[%s375_s3 + $0x10] sm:$0xff] %v191_v23  ;;  %v192_v28 = vmul.f32 1.4142135, %v188_v27  ;;  %v186_v29 = vsel %vm178_vm3, %v166_v20, %v182_v25 }
 0x123   :  { %193 = vst [vmem:[%s375_s3] sm:$0xff] %v189_v26  ;;  %v190_v30 = vmul.f32 1.4142135, %v186_v29 }
 0x124   :  { %196 = vst [vmem:[%s375_s3 + $0x18] sm:$0xff] %v192_v28 }
 0x125   :  { %194 = vst [vmem:[%s375_s3 + $0x8] sm:$0xff] %v190_v30 }
 0x126   :  { %201 = vsyncpa [#allocation3], 1 }
 0x127   :  { %202 = vsyncpa [#allocation5], 1 }

// kernel: generator_forward.19
= control target key start
LH: loop header
LB: loop body
LE: loop exit
PB: predicated region body
PF: predicated region fallthrough
CT: control target
= control target key end

     0   :  { %9 = vsyncpa [#allocation3], 0  ;;  %s403_s0 = inlined_call_operand.vmem [shape: f32[32,128], index: 0, kind: input, shape index: {}]   ;;  %s404_s1 = inlined_call_operand.hbm [shape: f32[1,128], index: 1, kind: input, shape index: {}]   ;;  %s405_s2 = inlined_call_operand.hbm [shape: bf16[128,128], index: 2, kind: input, shape index: {}]   ;;  %s406_s3 = inlined_call_operand.vmem [shape: f32[32,128], index: 3, kind: input, shape index: {}]   ;;  %s407_s4 = inlined_call_operand.vmem [shape: f32[32,128], index: 4, kind: output, shape index: {}]  }
   0x1   :  { %10 = vsyncpa [#allocation5], 0  ;;  %s307_s15 = smov [#allocation2]   ;;  %s308_s17 = smov [#allocation4]  }
   0x2   :  { %s19_s16 = sshll.u32 %s307_s15, 4  ;;  %s28_s18 = sshll.u32 %s308_s17, 4  ;;  %s20_s16 = int_to_ptr.vmem [resolvable:$true] %s19_s16  ;;  %s336_s18 = int_to_ptr.vmem [resolvable:$true] %s28_s18 }
   0x3   :  { %s259_s21 = scalar_lea.hbm %s404_s1, 16 }
   0x4   :  { %p260_p0 = scmp.ne.s32.totalorder %s404_s1, %s259_s21  ;;  %p263_p1 = scmp.lt.u32.totalorder %s259_s21, %s404_s1 }
   0x6   :  { %p265_p2 = pnand %p263_p1, %p260_p0 }
   0x8   :  { %268 = shalt.err (!%p265_p2)
}
   0x9   :  { %s269_s26 = scalar_lea.vmem %s20_s16, 16  ;;  %s273_s27 = scalar_lea.vmem %s20_s16, 32 }
   0xa   :  { %p270_p3 = scmp.ne.s32.totalorder %s20_s16, %s269_s26  ;;  %p274_p4 = scmp.lt.s32.totalorder %s20_s16, %s20_s16 }
   0xb   :  { %p275_p5 = scmp.lt.s32.totalorder %s273_s27, %s269_s26 }
   0xd   :  { %p276_p6 = por %p275_p5, %p274_p4 }
   0xf   :  { %p277_p7 = pnand %p276_p6, %p270_p3 }
  0x11   :  { %280 = shalt.err (!%p277_p7)
}
  0x12   :  { %22 = dma.hbm_to_vmem [thread:$0]  %s404_s1, 16, %s20_s16, [#allocation3]  }
  0x13   :  { %s281_s6 = scalar_lea.hbm %s405_s2, 1024 }
  0x14   :  { %p282_p8 = scmp.ne.s32.totalorder %s405_s2, %s281_s6  ;;  %p285_p9 = scmp.lt.u32.totalorder %s281_s6, %s405_s2 }
  0x16   :  { %p287_p10 = pnand %p285_p9, %p282_p8 }
  0x18   :  { %290 = shalt.err (!%p287_p10)
}
  0x19   :  { %s291_s11 = scalar_lea.vmem %s336_s18, 1024  ;;  %p296_p12 = scmp.lt.s32.totalorder %s336_s18, %s336_s18 }
  0x1a   :  { %p292_p11 = scmp.ne.s32.totalorder %s336_s18, %s291_s11  ;;  %p297_p13 = scmp.lt.s32.totalorder %s291_s11, %s291_s11 }
  0x1c   :  { %p298_p0 = por %p297_p13, %p296_p12 }
  0x1e   :  { %p299_p1 = pnand %p298_p0, %p292_p11 }
  0x20   :  { %302 = shalt.err (!%p299_p1)
}
  0x21   :  { %s309_s1 = smov 64   ;;  %s310_s12 = smov 4  }
  0x22   :  { %34 = dma.hbm_to_vmem [thread:$0]  %s405_s2, 1024, %s336_s18, [#allocation5], %s309_s1, %s309_s1, %s310_s12  }
  0x23   :  { %303 = dma.done.wait [#allocation3], 16  }
  0x24   :  { %304 = vsyncadd [#allocation3], 4294967280 }
  0x25   :  { %305 = dma.done.wait [#allocation5], 1024  }
  0x26   :  { %306 = vsyncadd [#allocation5], 4294966272  ;;  %v251_v0 = vld [vmem:[#allocation4] sm:$0xff]   ;;  %v252_v1 = vld [vmem:[#allocation4 + $0x8] sm:$0xff]  }
  0x27   :  { %227 = vmatprep.subr.bf16.mxu0 %v251_v0  ;;  %v253_v2 = vld [vmem:[#allocation4 + $0x10] sm:$0xff]   ;;  %v254_v3 = vld [vmem:[#allocation4 + $0x18] sm:$0xff]   ;;  %v45_v5 = vld [vmem:[%s403_s0 + $0x8] sm:$0xff] }
  0x28   :  { %228 = vmatpush3.bf16.msra.mxu0 %v251_v0  ;;  %v44_v4 = vld [vmem:[%s403_s0] sm:$0xff]  ;;  %v46_v12 = vld [vmem:[%s403_s0 + $0x10] sm:$0xff]  ;;  %v47_v13 = vld [vmem:[%s403_s0 + $0x18] sm:$0xff] }
  0x29   :  { %229 = vmatprep.subr.bf16.mxu0 %v252_v1  ;;  %v208_v6 = vld [vmem:[#allocation2] ss:$0 sm:$0xff]  ;;  %v255_v11 = vld [vmem:[#allocation4 + $0x20] sm:$0xff]   ;;  %v256_v20 = vld [vmem:[#allocation4 + $0x28] sm:$0xff]  }
  0x2a   :  { %v55_v7 = vadd.f32 %v208_v6, %v44_v4  ;;  %v56_v8 = vadd.f32 %v208_v6, %v45_v5  ;;  %v57_v18 = vadd.f32 %v208_v6, %v46_v12  ;;  %v58_v19 = vadd.f32 %v208_v6, %v47_v13  ;;  %v257_v24 = vld [vmem:[#allocation4 + $0x30] sm:$0xff]   ;;  %v258_v27 = vld [vmem:[#allocation4 + $0x38] sm:$0xff]   ;;  %v76_v37 = vld [vmem:[%s406_s3 + $0x8] sm:$0xff] }
  0x2b   :  { %v77_v31 = vld [vmem:[%s406_s3 + $0x10] sm:$0xff]  ;;  %v75_v32 = vld [vmem:[%s406_s3] sm:$0xff]  ;;  %v78_v34 = vld [vmem:[%s406_s3 + $0x18] sm:$0xff] }
  0x2c   :  { %230 = vmatpush3.bf16.msra.mxu0 %v252_v1  ;;  %vm59_vm0 = vcmp.ge.f32.partialorder %v55_v7, 0.0  ;;  %vm60_vm1 = vcmp.ge.f32.partialorder %v56_v8, 0.0  ;;  %v63_v9 = vmul.f32 0.2, %v55_v7  ;;  %v64_v10 = vmul.f32 0.2, %v56_v8 }
  0x2d   :  { %231 = vmatprep.subr.bf16.mxu0 %v253_v2  ;;  %v65_v22 = vmul.f32 0.2, %v57_v18  ;;  %v66_v23 = vmul.f32 0.2, %v58_v19  ;;  %vm61_vm2 = vcmp.ge.f32.partialorder %v57_v18, 0.0  ;;  %vm62_vm3 = vcmp.ge.f32.partialorder %v58_v19, 0.0 }
  0x2e   :  { %v67_v14 = vsel %vm59_vm0, %v55_v7, %v63_v9  ;;  %v68_v15 = vsel %vm60_vm1, %v56_v8, %v64_v10 }
  0x2f   :  { %v71_v16 = vmul.f32 1.4142135, %v67_v14  ;;  %v72_v17 = vmul.f32 1.4142135, %v68_v15  ;;  %v69_v25 = vsel %vm61_vm2, %v57_v18, %v65_v22  ;;  %v70_v26 = vsel %vm62_vm3, %v58_v19, %v66_v23 }
  0x30   :  { %232 = vmatpush3.bf16.msra.mxu0 %v253_v2  ;;  %v73_v28 = vmul.f32 1.4142135, %v69_v25  ;;  %v74_v29 = vmul.f32 1.4142135, %v70_v26 }
  0x31   :  { %233 = vmatprep.subr.bf16.mxu0 %v254_v3  ;;  %v79_v21 = vpack.c.bf16 %v72_v17, %v71_v16 }
  0x32   :  { %v80_v30 = vpack.c.bf16 %v74_v29, %v73_v28 }
  0x33   :  { %243 = vmatprep.mubr.bf16.mxu0 %v79_v21 }
  0x34   :  { %234 = vmatpush3.bf16.msra.mxu0 %v254_v3 }
  0x35   :  { %235 = vmatprep.subr.bf16.mxu0 %v255_v11 }
  0x38   :  { %236 = vmatpush3.bf16.msra.mxu0 %v255_v11 }
  0x39   :  { %237 = vmatprep.subr.bf16.mxu0 %v256_v20 }
  0x3c   :  { %238 = vmatpush3.bf16.msra.mxu0 %v256_v20 }
  0x3d   :  { %239 = vmatprep.subr.bf16.mxu0 %v257_v24 }
  0x40   :  { %240 = vmatpush3.bf16.msra.mxu0 %v257_v24 }
  0x41   :  { %241 = vmatprep.subr.bf16.mxu0 %v258_v27 }
  0x44   :  { %242 = vmatpush3.bf16.msra.mxu0 %v258_v27 }
  0x47   :  { %244 = vmatmul.mubr.bf16.vlgmr.msra.gmra.mrb[0].mxu0 %v80_v30 }
 0x11a   :  { %v245_v33 = vpop.f32.mrb[0].mxu0 }
 0x11b   :  { %v196_v35 = vadd.f32 %v245_v33, %v77_v31  ;;  %v179_v36 = vpop.f32.mrb[1].mxu0 }
 0x11c   :  { %v194_v38 = vadd.f32 %v179_v36, %v75_v32  ;;  %v246_v39 = vpop.f32.mrb[2].mxu0 }
 0x11d   :  { %200 = vst [vmem:[%s407_s4 + $0x10] sm:$0xff] %v196_v35  ;;  %v197_v40 = vadd.f32 %v246_v39, %v78_v34  ;;  %v182_v41 = vpop.f32.mrb[3].mxu0 }
 0x11e   :  { %198 = vst [vmem:[%s407_s4] sm:$0xff] %v194_v38  ;;  %v195_v42 = vadd.f32 %v182_v41, %v76_v37 }
 0x11f   :  { %201 = vst [vmem:[%s407_s4 + $0x18] sm:$0xff] %v197_v40 }
 0x120   :  { %199 = vst [vmem:[%s407_s4 + $0x8] sm:$0xff] %v195_v42 }
 0x121   :  { %206 = vsyncpa [#allocation3], 1 }
 0x122   :  { %207 = vsyncpa [#allocation5], 1 }

// kernel: generator_forward.18
= control target key start
LH: loop header
LB: loop body
LE: loop exit
PB: predicated region body
PF: predicated region fallthrough
CT: control target
= control target key end

     0   :  { %7 = vsyncpa [#allocation3], 0  ;;  %s1708_s9 = smov 0   ;;  %s1844_s0 = inlined_call_operand.vmem [shape: bf16[2,6,6,128], index: 0, kind: input, shape index: {}]   ;;  %s1845_s1 = inlined_call_operand.hbm [shape: bf16[1152,128], index: 1, kind: input, shape index: {}]   ;;  %s1846_s2 = inlined_call_operand.vmem [shape: f32[2,16,128], index: 2, kind: output, shape index: {}]  }
   0x1 LB: > { %s1714_s10 = sadd.s32 4294967295, %s1685_s9   ;;  %p1330_p0 = scmp.ge.s32.totalorder %s1685_s9, 1  ;;  %s1685_s9 = sphi %s1708_s9, %s13_s9  }
   0x2   : > { %p91_p1 = scmp.lt.s32.totalorder %s1685_s9, 3  ;;  %s1687_s11 = smov [#allocation2]  }
   0x3   : > { %s103_s12 = sshll.u32 %s1687_s11, 4  ;;  %p1847_p3 = scmp.eq.s32.totalorder %s1714_s10, 0  ;;  %s104_s12 = int_to_ptr.vmem [resolvable:$true] %s103_s12 }
   0x4   : > { %p1718_p2 = pnand %p1330_p0, %p91_p1  ;;  %s1647_s17 = scalar_lea.hbm %s1845_s1, 9216 }
   0x5   : > { %p1648_p6 = scmp.ne.s32.totalorder %s1845_s1, %s1647_s17  ;;  %p1654_p10 = scmp.lt.u32.totalorder %s1647_s17, %s1845_s1 }
   0x6   : > { %s1849_s13 = scalar_select %p1718_p2, 1, 0 }
   0x7   : > { %p1549_p4 = pneg %p1718_p2 }
   0x9   : > { %p1727_p5 = pnand %p1847_p3, %p1549_p4 }
   0xb   : > { %p1649_p7 = pneg %p1727_p5 }
   0xd   : > { %p1650_p8 = pnand %p1649_p7, %p1648_p6 }
   0xf   : > { %p1651_p9 = pneg %p1650_p8 }
  0x11   : > { %p1656_p11 = pnand %p1654_p10, %p1651_p9 }
  0x13   : > { %1659 = shalt.err (!%p1656_p11)
}
  0x14   : > { %s1660_s22 = scalar_lea.vmem %s104_s12, 9216  ;;  %p1668_p1 = scmp.lt.s32.totalorder %s104_s12, %s104_s12 }
  0x15   : > { %p1661_p12 = scmp.ne.s32.totalorder %s104_s12, %s1660_s22  ;;  %p1669_p4 = scmp.lt.s32.totalorder %s1660_s22, %s1660_s22 }
  0x17   : > { %p1663_p13 = pnand %p1661_p12, %p1649_p7  ;;  %p1670_p3 = por %p1669_p4, %p1668_p1 }
  0x19   : > { %p1664_p0 = pneg %p1663_p13 }
  0x1b   : > { %p1671_p2 = pnand %p1670_p3, %p1664_p0 }
  0x1d   : > { %1674 = shalt.err (!%p1671_p2)
}
  0x1e   : > { %s1688_s23 = smov 64   ;;  %s1689_s24 = smov 4  }
  0x1f   : > { %1552 = dma.hbm_to_vmem [thread:$0]  (!%p1727_p5), %s1845_s1, 9216, %s104_s12, [#allocation3], %s1688_s23, %s1688_s23, %s1689_s24  }
  0x20   : > { %p1851_p6 = scmp.ne.s32.totalorder %s1849_s13, 0 }
  0x21   : > { %p1852_p8 = scmp.eq.s32.totalorder (!%p1851_p6), %s1714_s10, 0 }
  0x22   : > { %127 = sbr.rel (%p1851_p6) target bundleno = 358 (0x166), region = 28 }
  0x29   : > { %1680 = dma.done.wait (%p1852_p8), [#allocation3], 9216   ;;  %p1853_p7 = pmov %p1852_p8 }
  0x2a   : > { %v1569_v0 = vld [vmem:[#allocation2 + $0x40] sm:$0xff]   ;;  %v1573_v4 = vld [vmem:[#allocation2 + $0x48] sm:$0xff]   ;;  %v1577_v8 = vld [vmem:[#allocation2 + $0x50] sm:$0xff]   ;;  %p149_p2 = scmp.lt.s32.totalorder %s1714_s10, 1  ;;  %v1690_v27 = vmov 1983009808   ;;  %v237_v29 = vlaneseq }
  0x2b   : > { %1682 = vsyncadd (%p1853_p7), [#allocation3], 4294958080  ;;  %v1570_v1 = vld [vmem:[#allocation2 + $0xc0] sm:$0xff]   ;;  %1427 = vmatprep.subr.bf16.mxu0 %v1569_v0  ;;  %v1574_v5 = vld [vmem:[#allocation2 + $0xc8] sm:$0xff]   ;;  %v235_v28 = vunpack.c.l.s4 %v1690_v27  ;;  %vm1692_vm0 = vmmov 0  }
  0x2c   : > { %v1571_v2 = vld [vmem:[#allocation2] sm:$0xff]   ;;  %1449 = vmatprep.subr.bf16.mxu1 %v1570_v1  ;;  %v1575_v6 = vld [vmem:[#allocation2 + $0x8] sm:$0xff]   ;;  %v1578_v9 = vld [vmem:[#allocation2 + $0xd0] sm:$0xff]   ;;  %s1855_s10 = smov (!%p149_p2, %s1714_s10), 1  ;;  %v238_v35 = vshrl.u32 %v237_v29, 7 }
  0x2d   : > { %v1572_v3 = vld [vmem:[#allocation2 + $0x80] sm:$0xff]   ;;  %1428 = vmatpush3.bf16.msra.mxu0 %v1571_v2  ;;  %v1576_v7 = vld [vmem:[#allocation2 + $0x88] sm:$0xff]   ;;  %v1579_v10 = vld [vmem:[#allocation2 + $0x10] sm:$0xff]   ;;  %s1544_s27 = smul.u32 24, %s1855_s10  ;;  %v236_v34 = vunpack.c.0.s8 %v235_v28  ;;  %s1426_s3 = sshll.u32 %s1855_s10, 4 }
  0x2e   : > { %1450 = vmatpush3.bf16.msra.mxu1 %v1572_v3  ;;  %1429 = vmatprep.subr.bf16.mxu0 %v1573_v4  ;;  %v1580_v11 = vld [vmem:[#allocation2 + $0x90] sm:$0xff]   ;;  %v1581_v12 = vld [vmem:[#allocation2 + $0x58] sm:$0xff]   ;;  %v1585_v16 = vld [vmem:[#allocation2 + $0x60] sm:$0xff]   ;;  %s158_s6 = scalar_lea.vmem %s1846_s2, %s1426_s3 }
  0x2f   : > { %1451 = vmatprep.subr.bf16.mxu1 %v1574_v5  ;;  %v1582_v13 = vld [vmem:[#allocation2 + $0xd8] sm:$0xff]   ;;  %v1586_v17 = vld [vmem:[#allocation2 + $0xe0] sm:$0xff]   ;;  %v1589_v20 = vld [vmem:[#allocation2 + $0x68] sm:$0xff]   ;;  %s1761_s30 = scalar_lea.vmem %s1844_s0, %s1544_s27  ;;  %v1770_v46 = vsub.s32 %v236_v34, %v238_v35 }
  0x30   : > { %v1583_v14 = vld [vmem:[#allocation2 + $0x18] sm:$0xff]   ;;  %v1587_v18 = vld [vmem:[#allocation2 + $0x20] sm:$0xff]   ;;  %v1590_v21 = vld [vmem:[#allocation2 + $0xe8] sm:$0xff]  }
  0x31   : > { %1430 = vmatpush3.bf16.msra.mxu0 %v1575_v6  ;;  %v1584_v15 = vld [vmem:[#allocation2 + $0x98] sm:$0xff]   ;;  %v1588_v19 = vld [vmem:[#allocation2 + $0xa0] sm:$0xff]   ;;  %v1591_v22 = vld [vmem:[#allocation2 + $0x28] sm:$0xff]  }
  0x32   : > { %1452 = vmatpush3.bf16.msra.mxu1 %v1576_v7  ;;  %1431 = vmatprep.subr.bf16.mxu0 %v1577_v8  ;;  %v1592_v23 = vld [vmem:[#allocation2 + $0xa8] sm:$0xff]   ;;  %v1593_v24 = vld [vmem:[#allocation2 + $0x70] sm:$0xff]   ;;  %v1597_v31 = vld [vmem:[#allocation2 + $0x78] sm:$0xff]  }
  0x33   : > { %1453 = vmatprep.subr.bf16.mxu1 %v1578_v9  ;;  %v1594_v25 = vld [vmem:[#allocation2 + $0xf0] sm:$0xff]   ;;  %v1598_v32 = vld [vmem:[#allocation2 + $0xf8] sm:$0xff]   ;;  %v160_v37 = vld [vmem:[%s1761_s30] sm:$0x7] }
  0x34   : > { %v1595_v26 = vld [vmem:[#allocation2 + $0x30] sm:$0xff]   ;;  %v1599_v33 = vld [vmem:[#allocation2 + $0x38] sm:$0xff]   ;;  %v161_v38 = vld [vmem:[%s1761_s30 + $0x4] sm:$0x7]  ;;  %v1338_v41 = vcombine.low %v160_v37, %v160_v37 }
  0x35   : > { %1432 = vmatpush3.bf16.msra.mxu0 %v1579_v10  ;;  %v1596_v30 = vld [vmem:[#allocation2 + $0xb0] sm:$0xff]   ;;  %v1600_v36 = vld [vmem:[#allocation2 + $0xb8] sm:$0xff]   ;;  %v162_v39 = vld [vmem:[%s1761_s30 + $0x8] sm:$0x7]  ;;  %v1339_v42 = vcombine.low %v161_v38, %v161_v38 }
  0x36   : > { %1454 = vmatpush3.bf16.msra.mxu1 %v1580_v11  ;;  %1433 = vmatprep.subr.bf16.mxu0 %v1581_v12  ;;  %v163_v40 = vld [vmem:[%s1761_s30 + $0xc] sm:$0x7]  ;;  %v1340_v43 = vcombine.low %v162_v39, %v162_v39  ;;  %v1768_v44 = vld [vmem:[%s1761_s30 + $0x10] sm:$0x7]  ;;  %v1606_v48 = vld [vmem:[#allocation2 + $0x140] sm:$0xff]   ;;  %v179_v49 = vshrl.u32 %v1338_v41, 16 }
  0x37   : > { %1455 = vmatprep.subr.bf16.mxu1 %v1582_v13  ;;  %v1341_v45 = vcombine.low %v163_v40, %v163_v40  ;;  %v1774_v47 = vcombine.low %v1768_v44, %v1768_v44  ;;  %v181_v50 = vshll.u32 %v1338_v41, 16  ;;  %v186_v51 = vshrl.u32 %v1339_v42, 16  ;;  %v1608_v57 = vld [vmem:[#allocation2 + $0x1c0] sm:$0xff]  }
  0x38   : > { %v188_v52 = vshll.u32 %v1339_v42, 16  ;;  %v193_v53 = vshrl.u32 %v1340_v43, 16  ;;  %v195_v54 = vshll.u32 %v1340_v43, 16  ;;  %v206_v60 = vrot.slane %v1338_v41, 1  ;;  %v1609_v41 = vld [vmem:[#allocation2 + $0x180] sm:$0xff]  }
  0x39   : > { %1434 = vmatpush3.bf16.msra.mxu0 %v1583_v14  ;;  %v200_v55 = vshrl.u32 %v1341_v45, 16  ;;  %v202_v56 = vshll.u32 %v1341_v45, 16  ;;  %v183_v58 = vrot.slane %v181_v50, 1  ;;  %v207_v61 = vrot.slane %v1339_v42, 1 }
  0x3a   : > { %1456 = vmatpush3.bf16.msra.mxu1 %v1584_v15  ;;  %1435 = vmatprep.subr.bf16.mxu0 %v1585_v16  ;;  %v190_v59 = vrot.slane %v188_v52, 1  ;;  %v197_v62 = vrot.slane %v195_v54, 1  ;;  %v208_v0 = vrot.slane %v1340_v43, 1  ;;  %v209_v1 = vrot.slane %v1341_v45, 1  ;;  %v1612_v43 = vld [vmem:[#allocation2 + $0x1c8] sm:$0xff]  }
  0x3b   : > { %1457 = vmatprep.subr.bf16.mxu1 %v1586_v17  ;;  %v204_v63 = vrot.slane %v202_v56, 1  ;;  %v184_v2 = vor.u32 %v183_v58, %v179_v49  ;;  %v233_v4 = vcombine.low %v206_v60, %v161_v38  ;;  %v274_v5 = vcombine.low %v207_v61, %v162_v39  ;;  %v1610_v54 = vld [vmem:[#allocation2 + $0x148] sm:$0xff]  }
  0x3c   : > { %v191_v3 = vor.u32 %v190_v59, %v186_v51  ;;  %v198_v6 = vor.u32 %v197_v62, %v193_v53  ;;  %v314_v8 = vcombine.low %v208_v0, %v163_v40  ;;  %v347_v9 = vcombine.low %v209_v1, %v1768_v44  ;;  %v1607_v51 = vld [vmem:[#allocation2 + $0x100] sm:$0xff]   ;;  %v1616_v59 = vld [vmem:[#allocation2 + $0x1d0] sm:$0xff]  }
  0x3d   : > { %1436 = vmatpush3.bf16.msra.mxu0 %v1587_v18  ;;  %v205_v7 = vor.u32 %v204_v63, %v200_v55  ;;  %v232_v10 = vcombine.low %v160_v37, %v184_v2  ;;  %v247_v12 = vrot.slane %v233_v4, %v1770_v46  ;;  %v288_v13 = vrot.slane %v274_v5, %v1770_v46  ;;  %v1615_v4 = vld [vmem:[#allocation2 + $0x110] sm:$0xff]  }
  0x3e   : > { %1458 = vmatpush3.bf16.msra.mxu1 %v1588_v19  ;;  %1437 = vmatprep.subr.bf16.mxu0 %v1589_v20  ;;  %v273_v11 = vcombine.low %v161_v38, %v191_v3  ;;  %v250_v14 = vcombine.low %v162_v39, %v198_v6  ;;  %v321_v16 = vrot.slane %v314_v8, %v1770_v46  ;;  %v220_v28 = vrot.slane %v1774_v47, 1  ;;  %v1624_v8 = vld [vmem:[#allocation2 + $0x1e0] sm:$0xff]  }
  0x3f   : > { %1459 = vmatprep.subr.bf16.mxu1 %v1590_v21  ;;  %v291_v15 = vcombine.low %v163_v40, %v205_v7  ;;  %v354_v17 = vrot.slane %v347_v9, %v1770_v46  ;;  %v240_v18 = vrot.slane %v232_v10, %v1770_v46  ;;  %v1345_v20 = vcombine.low %v247_v12, %v288_v13  ;;  %v1619_v9 = vld [vmem:[#allocation2 + $0x118] sm:$0xff]   ;;  %v1622_v10 = vld [vmem:[#allocation2 + $0x160] sm:$0xff]   ;;  %v1628_v13 = vld [vmem:[#allocation2 + $0x1e8] sm:$0xff]  }
  0x40   : > { %v281_v19 = vrot.slane %v273_v11, %v1770_v46  ;;  %v214_v21 = vshrl.u32 %v1774_v47, 16  ;;  %v249_v29 = vcombine.low %v191_v3, %v207_v61  ;;  %v272_v37 = vrot.slane %v208_v0, %v1770_v46  ;;  %v1611_v61 = vld [vmem:[#allocation2 + $0x108] sm:$0xff]   ;;  %v1620_v3 = vld [vmem:[#allocation2 + $0x1d8] sm:$0xff]   ;;  %v1623_v11 = vld [vmem:[#allocation2 + $0x120] sm:$0xff]  }
  0x41   : > { %1438 = vmatpush3.bf16.msra.mxu0 %v1591_v22  ;;  %v264_v22 = vrot.slane %v250_v14, %v1770_v46  ;;  %v541_v27 = vrot.slane %v1345_v20, %v1770_v46  ;;  %v1625_v12 = vld [vmem:[#allocation2 + $0x1a0] sm:$0xff]   ;;  %v1626_v14 = vld [vmem:[#allocation2 + $0x168] sm:$0xff]   ;;  %v1630_v20 = vld [vmem:[#allocation2 + $0x170] sm:$0xff]  }
  0x42   : > { %1460 = vmatpush3.bf16.msra.mxu1 %v1592_v23  ;;  %1439 = vmatprep.subr.bf16.mxu0 %v1593_v24  ;;  %v305_v23 = vrot.slane %v291_v15, %v1770_v46  ;;  %v1347_v24 = vcombine.low %v321_v16, %v354_v17  ;;  %v257_v35 = vrot.slane %v249_v29, %v1770_v46  ;;  %v1629_v15 = vld [vmem:[#allocation2 + $0x1a8] sm:$0xff]   ;;  %v165_v16 = vld [vmem:[%s1761_s30 + $0x14] sm:$0x7] }
  0x43   : > { %1461 = vmatprep.subr.bf16.mxu1 %v1594_v25  ;;  %v216_v25 = vshll.u32 %v1774_v47, 16  ;;  %v1632_v17 = vld [vmem:[#allocation2 + $0x1f0] sm:$0xff]  }
  0x45   : > { %1440 = vmatpush3.bf16.msra.mxu0 %v1595_v26  ;;  %v1344_v26 = vcombine.low %v240_v18, %v281_v19  ;;  %v1343_v18 = vcombine.low %v165_v16, %v165_v16  ;;  %v1627_v19 = vld [vmem:[#allocation2 + $0x128] sm:$0xff]  }
  0x46   : > { %1462 = vmatpush3.bf16.msra.mxu1 %v1596_v30  ;;  %1441 = vmatprep.subr.bf16.mxu0 %v1597_v31  ;;  %v1346_v30 = vcombine.low %v264_v22, %v305_v23  ;;  %v555_v31 = vrot.slane %v1347_v24, %v1770_v46  ;;  %v1636_v24 = vld [vmem:[#allocation2 + $0x1f8] sm:$0xff]  }
  0x47   : > { %1463 = vmatprep.subr.bf16.mxu1 %v1598_v32  ;;  %v218_v32 = vrot.slane %v216_v25, 1  ;;  %v534_v34 = vrot.slane %v1344_v26, %v1770_v46  ;;  %v225_v22 = vshrl.u32 %v1343_v18, 16  ;;  %v227_v23 = vshll.u32 %v1343_v18, 16 }
  0x48   : > { %v1794_v38 = vrot.slane %v1346_v30, %v1770_v46  ;;  %v559_v39 = vcombine.high %v541_v27, %v555_v31  ;;  %v558_v40 = vcombine.low %v541_v27, %v555_v31  ;;  %v1631_v27 = vld [vmem:[#allocation2 + $0x130] sm:$0xff]   ;;  %v231_v29 = vrot.slane %v1343_v18, 1  ;;  %v1634_v31 = vld [vmem:[#allocation2 + $0x178] sm:$0xff]  }
  0x49   : > { %1442 = vmatpush3.bf16.msra.mxu0 %v1599_v33  ;;  %v290_v33 = vcombine.low %v198_v6, %v208_v0  ;;  %v1796_v42 = vor.u32 %v218_v32, %v214_v21  ;;  %v1614_v0 = vld [vmem:[#allocation2 + $0x150] sm:$0xff]   ;;  %v1618_v6 = vld [vmem:[#allocation2 + $0x158] sm:$0xff]   ;;  %v229_v25 = vrot.slane %v227_v23, 1  ;;  %v346_v30 = vrot.slane %v220_v28, %v1770_v46 }
  0x4a   : > { %1464 = vmatpush3.bf16.msra.mxu1 %v1600_v36  ;;  %1471 = vmatprep.subr.bf16.mxu0 %v1606_v48  ;;  %v323_v36 = vcombine.low %v205_v7, %v209_v1  ;;  %v313_v48 = vrot.slane %v209_v1, %v1770_v46  ;;  %v557_v49 = vcombine.high %v534_v34, %v1794_v38  ;;  %v1617_v1 = vld [vmem:[#allocation2 + $0x190] sm:$0xff]   ;;  %v1621_v7 = vld [vmem:[#allocation2 + $0x198] sm:$0xff]  }
  0x4b   : > { %1493 = vmatprep.subr.bf16.mxu1 %v1608_v57  ;;  %v298_v45 = vrot.slane %v290_v33, %v1770_v46  ;;  %1127 = vmatprep.mubr.bf16.mxu1 %v559_v39  ;;  %v556_v50 = vcombine.low %v534_v34, %v1794_v38  ;;  %v356_v53 = vcombine.low %v1796_v42, %v220_v28  ;;  %v1613_v57 = vld [vmem:[#allocation2 + $0x188] sm:$0xff]   ;;  %v1633_v21 = vld [vmem:[#allocation2 + $0x1b0] sm:$0xff]   ;;  %v1637_v33 = vld [vmem:[#allocation2 + $0x1b8] sm:$0xff]  }
  0x4c   : > { %v331_v52 = vrot.slane %v323_v36, %v1770_v46  ;;  %v1806_v56 = vcombine.low %v272_v37, %v313_v48  ;;  %1086 = vmatprep.mubr.bf16.mxu0 %v557_v49  ;;  %v324_v26 = vcombine.low %v1768_v44, %v1796_v42  ;;  %v230_v32 = vor.u32 %v229_v25, %v225_v22  ;;  %v1635_v44 = vld [vmem:[#allocation2 + $0x138] sm:$0xff]  }
  0x4d   : > { %1128 = vmatmul.mubr.bf16.vlgmr.msra.gmra.mrb[0].mxu1 %v558_v40  ;;  %v1348_v55 = vcombine.low %v257_v35, %v298_v45  ;;  %v364_v58 = vrot.slane %v356_v53, %v1770_v46  ;;  %1087 = vmatmul.mubr.bf16.vlgmr.msra.gmra.mrb[0].mxu0 %v556_v50  ;;  %v379_v34 = vrot.slane %v231_v29, %v1770_v46  ;;  %v1640_v50 = vld [vmem:[#allocation2 + $0x208] sm:$0xff]  }
  0x4e   : > { %1494 = vmatpush3.bf16.msra.mxu1 %v1609_v41  ;;  %v604_v60 = vrot.slane %v1806_v56, %v1770_v46  ;;  %1472 = vmatpush3.bf16.msra.mxu0 %v1607_v51  ;;  %v338_v35 = vrot.slane %v324_v26, %v1770_v46  ;;  %v357_v36 = vcombine.low %v165_v16, %v230_v32  ;;  %v1639_v41 = vld [vmem:[#allocation2 + $0x200] sm:$0xff]   ;;  %v1641_v51 = vld [vmem:[#allocation2 + $0x210] sm:$0xff]   ;;  %v1644_v53 = vld [vmem:[#allocation2 + $0x228] sm:$0xff]  }
  0x4f   : > { %1495 = vmatprep.subr.bf16.mxu1 %v1612_v43  ;;  %v1350_v62 = vcombine.low %v331_v52, %v364_v58  ;;  %v1812_v63 = vrot.slane %v1348_v55, %v1770_v46  ;;  %1473 = vmatprep.subr.bf16.mxu0 %v1610_v54  ;;  %v597_v37 = vcombine.low %v346_v30, %v379_v34  ;;  %v1691_v43 = vmov 0.0   ;;  %v1642_v52 = vld [vmem:[#allocation2 + $0x218] sm:$0xff]  }
  0x50   : > { %v371_v39 = vrot.slane %v357_v36, %v1770_v46  ;;  %v1646_v54 = vld [vmem:[#allocation2 + $0x238] sm:$0xff]  }
  0x51   : > { %v1815_v2 = vrot.slane %v1350_v62, %v1770_v46  ;;  %v611_v47 = vrot.slane %v597_v37, %v1770_v46 }
  0x52   : > { %1496 = vmatpush3.bf16.msra.mxu1 %v1613_v57  ;;  %1474 = vmatpush3.bf16.msra.mxu0 %v1611_v61  ;;  %v1351_v40 = vcombine.low %v338_v35, %v371_v39 }
  0x53   : > { %1497 = vmatprep.subr.bf16.mxu1 %v1616_v59  ;;  %v593_v5 = vcombine.high %v1812_v63, %v1815_v2  ;;  %1475 = vmatprep.subr.bf16.mxu0 %v1614_v0  ;;  %v592_v28 = vcombine.low %v1812_v63, %v1815_v2  ;;  %v612_v42 = vcombine.low %v604_v60, %v611_v47 }
  0x54   : > { %v591_v45 = vrot.slane %v1351_v40, %v1770_v46  ;;  %v1643_v46 = vld [vmem:[#allocation2 + $0x220] sm:$0xff]  }
  0x55   : > { %1168 = vmatprep.mubr.bf16.mxu0 %v593_v5 }
  0x56   : > { %1498 = vmatpush3.bf16.msra.mxu1 %v1617_v1  ;;  %1476 = vmatpush3.bf16.msra.mxu0 %v1615_v4  ;;  %v595_v48 = vcombine.high %v1794_v38, %v591_v45  ;;  %v594_v49 = vcombine.low %v1794_v38, %v591_v45  ;;  %v1645_v38 = vld [vmem:[#allocation2 + $0x230] sm:$0xff]  }
  0x57   : > { %1499 = vmatprep.subr.bf16.mxu1 %v1620_v3  ;;  %1477 = vmatprep.subr.bf16.mxu0 %v1618_v6 }
  0x58   : > { %1209 = vmatprep.mubr.bf16.mxu1 %v595_v48 }
  0x5a   : > { %1500 = vmatpush3.bf16.msra.mxu1 %v1621_v7  ;;  %1478 = vmatpush3.bf16.msra.mxu0 %v1619_v9 }
  0x5b   : > { %1501 = vmatprep.subr.bf16.mxu1 %v1624_v8  ;;  %1479 = vmatprep.subr.bf16.mxu0 %v1622_v10 }
  0x5e   : > { %1502 = vmatpush3.bf16.msra.mxu1 %v1625_v12  ;;  %1480 = vmatpush3.bf16.msra.mxu0 %v1623_v11 }
  0x5f   : > { %1503 = vmatprep.subr.bf16.mxu1 %v1628_v13  ;;  %1481 = vmatprep.subr.bf16.mxu0 %v1626_v14 }
  0x62   : > { %1504 = vmatpush3.bf16.msra.mxu1 %v1629_v15  ;;  %1482 = vmatpush3.bf16.msra.mxu0 %v1627_v19 }
  0x63   : > { %1505 = vmatprep.subr.bf16.mxu1 %v1632_v17  ;;  %1483 = vmatprep.subr.bf16.mxu0 %v1630_v20 }
  0x66   : > { %1506 = vmatpush3.bf16.msra.mxu1 %v1633_v21  ;;  %1484 = vmatpush3.bf16.msra.mxu0 %v1631_v27 }
  0x67   : > { %1507 = vmatprep.subr.bf16.mxu1 %v1636_v24  ;;  %1485 = vmatprep.subr.bf16.mxu0 %v1634_v31 }
  0x6a   : > { %1508 = vmatpush3.bf16.msra.mxu1 %v1637_v33  ;;  %1486 = vmatpush3.bf16.msra.mxu0 %v1635_v44 }
  0x6b   : > { %1524 = vmatprep.subr.bf16.mxu0 %v1691_v43 }
  0x6d   : > { %1169 = vmatmul.mubr.bf16.vlgmr.msra.gmra.mrb[4].mxu0 %v592_v28  ;;  %1210 = vmatmul.mubr.bf16.vlgmr.msra.gmra.mrb[4].mxu1 %v594_v49 }
  0x6e   : > { %1525 = vmatpush3.bf16.msra.mxu0 %v1639_v41  ;;  %1540 = vmatprep.mubr.msk.bf16.mxu0 %vm1692_vm0, %v1691_v43 }
  0x6f   : > { %1526 = vmatprep.subr.bf16.mxu0 %v1691_v43 }
  0x72   : > { %1527 = vmatpush3.bf16.msra.mxu0 %v1640_v50 }
  0x73   : > { %1528 = vmatprep.subr.bf16.mxu0 %v1691_v43 }
  0x76   : > { %1529 = vmatpush3.bf16.msra.mxu0 %v1641_v51 }
  0x77   : > { %1530 = vmatprep.subr.bf16.mxu0 %v1691_v43 }
  0x7a   : > { %1531 = vmatpush3.bf16.msra.mxu0 %v1642_v52 }
  0x7b   : > { %1532 = vmatprep.subr.bf16.mxu0 %v1691_v43 }
  0x7e   : > { %1533 = vmatpush3.bf16.msra.mxu0 %v1643_v46 }
  0x7f   : > { %1534 = vmatprep.subr.bf16.mxu0 %v1691_v43 }
  0x82   : > { %1535 = vmatpush3.bf16.msra.mxu0 %v1644_v53 }
  0x83   : > { %1536 = vmatprep.subr.bf16.mxu0 %v1691_v43 }
  0x86   : > { %1537 = vmatpush3.bf16.msra.mxu0 %v1645_v38 }
  0x87   : > { %1538 = vmatprep.subr.bf16.mxu0 %v1691_v43 }
  0x8a   : > { %1539 = vmatpush3.bf16.msra.mxu0 %v1646_v54 }
  0x8d   : > { %1541 = vmatmul.mubr.bf16.vlgmr.msra.gmra.mrb[8].mxu0 %v612_v42 }
 0x120   : > { %v1465_v55 = vpop.f32.mrb[0].mxu1  ;;  %v1443_v57 = vpop.f32.mrb[0].mxu0 }
 0x121   : > { %v1466_v56 = vpop.f32.mrb[1].mxu1  ;;  %v1444_v60 = vpop.f32.mrb[1].mxu0 }
 0x122   : > { %v1467_v58 = vadd.f32 %v1466_v56, %v1465_v55  ;;  %v1468_v59 = vpop.f32.mrb[2].mxu1  ;;  %v1445_v62 = vadd.f32 %v1444_v60, %v1443_v57  ;;  %v1446_v63 = vpop.f32.mrb[2].mxu0 }
 0x123   : > { %v1469_v61 = vpop.f32.mrb[3].mxu1  ;;  %v1447_v1 = vpop.f32.mrb[3].mxu0 }
 0x124   : > { %v1470_v0 = vadd.f32 %v1469_v61, %v1468_v59  ;;  %v1130_v2 = vadd.f32 %v1467_v58, %v1445_v62  ;;  %v1448_v3 = vadd.f32 %v1447_v1, %v1446_v63 }
 0x126   : > { %v1133_v4 = vadd.f32 %v1470_v0, %v1448_v3 }
 0x140   : > { %v1487_v5 = vpop.f32.mrb[4].mxu0  ;;  %v1509_v9 = vpop.f32.mrb[4].mxu1 }
 0x141   : > { %v1488_v6 = vpop.f32.mrb[5].mxu0  ;;  %v1510_v13 = vpop.f32.mrb[5].mxu1 }
 0x142   : > { %v1489_v7 = vadd.f32 %v1488_v6, %v1487_v5  ;;  %v1490_v8 = vpop.f32.mrb[6].mxu0  ;;  %v1511_v14 = vadd.f32 %v1510_v13, %v1509_v9  ;;  %v1512_v15 = vpop.f32.mrb[6].mxu1 }
 0x143   : > { %v1491_v10 = vpop.f32.mrb[7].mxu0  ;;  %v1513_v17 = vpop.f32.mrb[7].mxu1 }
 0x144   : > { %v1171_v11 = vadd.f32 %v1489_v7, %v1130_v2  ;;  %v1492_v12 = vadd.f32 %v1491_v10, %v1490_v8  ;;  %v1514_v18 = vadd.f32 %v1513_v17, %v1512_v15 }
 0x146   : > { %v1174_v16 = vadd.f32 %v1492_v12, %v1133_v4  ;;  %v1212_v19 = vadd.f32 %v1511_v14, %v1171_v11 }
 0x148   : > { %v1215_v20 = vadd.f32 %v1514_v18, %v1174_v16 }
 0x160   : > { %v1252_v21 = vpop.f32.mrb[8].mxu0 }
 0x161   : > { %v1253_v22 = vadd.f32 %v1252_v21, %v1212_v19  ;;  %v1542_v23 = vpop.f32.mrb[9].mxu0 }
 0x162   : > { %v1255_v24 = vpop.f32.mrb[10].mxu0 }
 0x163   : > { %1259 = vst [vmem:[%s158_s6] sm:$0xff] %v1253_v22  ;;  %v1256_v25 = vadd.f32 %v1255_v24, %v1215_v20  ;;  %v1543_v26 = vpop.f32.mrb[11].mxu0 }
 0x165   : > { %1260 = vst [vmem:[%s158_s6 + $0x8] sm:$0xff] %v1256_v25 }
 0x166 PF: > { %s13_s9 = sadd.s32 1, %s1685_s9  }
 0x167   : > { %p10_p3 = scmp.ge.s32.totalorder %s13_s9, 4  }
 0x169   :  { %12 = sbr.rel (!%p10_p3) target bundleno = 1 (0x1), region = 63 }
 0x170   :  { %1282 = vsyncpa [#allocation3], 1 }
 0x171   :  { %1284 = vsyncpa [#allocation3 + $0x1], 1 }

// kernel: generator_forward.21
= control target key start
LH: loop header
LB: loop body
LE: loop exit
PB: predicated region body
PF: predicated region fallthrough
CT: control target
= control target key end

     0   :  { %s256_s1 = inlined_call_operand.vmem [shape: bf16[128,128], index: 1, kind: input, shape index: {}]   ;;  %s257_s0 = inlined_call_operand.vmem [shape: bf16[32,128], index: 0, kind: input, shape index: {}]   ;;  %s258_s2 = inlined_call_operand.vmem [shape: f32[32,128], index: 2, kind: output, shape index: {}]  }
   0x1   :  { %v189_v0 = vld [vmem:[%s256_s1] sm:$0xff]   ;;  %v190_v1 = vld [vmem:[%s256_s1 + $0x8] sm:$0xff]   ;;  %v191_v2 = vld [vmem:[%s256_s1 + $0x10] sm:$0xff]  }
   0x2   :  { %169 = vmatprep.subr.bf16.mxu0 %v189_v0  ;;  %v192_v3 = vld [vmem:[%s256_s1 + $0x18] sm:$0xff]   ;;  %v197_v4 = vld [vmem:[%s257_s0] sm:$0xff]   ;;  %v194_v6 = vld [vmem:[%s256_s1 + $0x28] sm:$0xff]  }
   0x3   :  { %170 = vmatpush3.bf16.msra.mxu0 %v189_v0  ;;  %185 = vmatprep.mubr.bf16.mxu0 %v197_v4  ;;  %v193_v5 = vld [vmem:[%s256_s1 + $0x20] sm:$0xff]   ;;  %v195_v7 = vld [vmem:[%s256_s1 + $0x30] sm:$0xff]   ;;  %v196_v8 = vld [vmem:[%s256_s1 + $0x38] sm:$0xff]  }
   0x4   :  { %171 = vmatprep.subr.bf16.mxu0 %v190_v1  ;;  %v198_v9 = vld [vmem:[%s257_s0 + $0x8] sm:$0xff]  }
   0x7   :  { %172 = vmatpush3.bf16.msra.mxu0 %v190_v1 }
   0x8   :  { %173 = vmatprep.subr.bf16.mxu0 %v191_v2 }
   0xb   :  { %174 = vmatpush3.bf16.msra.mxu0 %v191_v2 }
   0xc   :  { %175 = vmatprep.subr.bf16.mxu0 %v192_v3 }
   0xf   :  { %176 = vmatpush3.bf16.msra.mxu0 %v192_v3 }
  0x10   :  { %177 = vmatprep.subr.bf16.mxu0 %v193_v5 }
  0x13   :  { %178 = vmatpush3.bf16.msra.mxu0 %v193_v5 }
  0x14   :  { %179 = vmatprep.subr.bf16.mxu0 %v194_v6 }
  0x17   :  { %180 = vmatpush3.bf16.msra.mxu0 %v194_v6 }
  0x18   :  { %181 = vmatprep.subr.bf16.mxu0 %v195_v7 }
  0x1b   :  { %182 = vmatpush3.bf16.msra.mxu0 %v195_v7 }
  0x1c   :  { %183 = vmatprep.subr.bf16.mxu0 %v196_v8 }
  0x1f   :  { %184 = vmatpush3.bf16.msra.mxu0 %v196_v8 }
  0x22   :  { %186 = vmatmul.mubr.bf16.vlgmr.msra.gmra.mrb[0].mxu0 %v198_v9 }
  0xf5   :  { %v187_v10 = vpop.f32.mrb[0].mxu0 }
  0xf6   :  { %143 = vst [vmem:[%s258_s2 + $0x10] sm:$0xff] %v187_v10  ;;  %v126_v11 = vpop.f32.mrb[1].mxu0 }
  0xf7   :  { %141 = vst [vmem:[%s258_s2] sm:$0xff] %v126_v11  ;;  %v188_v12 = vpop.f32.mrb[2].mxu0 }
  0xf8   :  { %144 = vst [vmem:[%s258_s2 + $0x18] sm:$0xff] %v188_v12  ;;  %v129_v13 = vpop.f32.mrb[3].mxu0 }
  0xf9   :  { %142 = vst [vmem:[%s258_s2 + $0x8] sm:$0xff] %v129_v13 }

// kernel: generator_forward.25
= control target key start
LH: loop header
LB: loop body
LE: loop exit
PB: predicated region body
PF: predicated region fallthrough
CT: control target
= control target key end

     0   :  { %s621_s6 = smov 0   ;;  %s872_s0 = inlined_call_operand.vmem [shape: f32[2,6,6,512], index: 0, kind: input, shape index: {}]   ;;  %s873_s1 = inlined_call_operand.vmem [shape: f32[2,4,2,4,256], index: 1, kind: output, shape index: {}]  }
   0x1 LB: > { %s579_s7 = sadd.s32 4294967295, %s609_s6   ;;  %p583_p0 = scmp.ge.s32.totalorder %s609_s6, 1  ;;  %s609_s6 = sphi %s621_s6, %s11_s6  }
   0x2   : > { %p87_p1 = scmp.lt.s32.totalorder %s609_s6, 3 }
   0x4   : > { %p88_p2 = pnand %p583_p0, %p87_p1 }
   0x5   : > { %p107_p3 = scmp.lt.s32.totalorder (!%p88_p2), %s579_s7, 1 }
   0x6   : > { %91 = sbr.rel (%p88_p2) target bundleno = 91 (0x5b), region = 24 }
   0xd   : > { %s875_s7 = smov (!%p107_p3, %s579_s7), 1 }
   0xe   : > { %s594_s8 = smul.u32 192, %s875_s7  ;;  %s593_s12 = sshll.u32 %s875_s7, 6 }
   0xf   : > { %s780_s15 = scalar_lea.vmem %s873_s1, %s593_s12 }
  0x10   : > { %s635_s11 = scalar_lea.vmem %s872_s0, %s594_s8 }
  0x11   : > { %v117_v0 = vld [vmem:[%s635_s11 + $0x10] sm:$0x3f]  ;;  %v118_v1 = vld [vmem:[%s635_s11 + $0x18] sm:$0x3f]  ;;  %v120_v2 = vld [vmem:[%s635_s11 + $0x28] sm:$0x3f] }
  0x12   : > { %v641_v3 = vld [vmem:[%s635_s11 + $0x30] sm:$0x3f]  ;;  %v644_v4 = vld [vmem:[%s635_s11 + $0x38] sm:$0x3f]  ;;  %v647_v5 = vld [vmem:[%s635_s11 + $0x48] sm:$0x3f] }
  0x13   : > { %v137_v6 = vmul.f32 0.0625, %v118_v1  ;;  %v650_v7 = vmul.f32 0.0625, %v644_v4  ;;  %v119_v8 = vld [vmem:[%s635_s11 + $0x20] sm:$0x3f]  ;;  %v145_v9 = vmul.f32 0.125, %v117_v0  ;;  %v654_v10 = vmul.f32 0.125, %v641_v3 }
  0x14   : > { %v656_v11 = vmul.f32 0.125, %v120_v2  ;;  %v659_v12 = vmul.f32 0.125, %v647_v5  ;;  %v189_v15 = vmul.f32 0.25, %v119_v8  ;;  %v245_v16 = vmul.f32 0.0625, %v117_v0  ;;  %v663_v17 = vld [vmem:[%s635_s11 + $0x40] sm:$0x3f] }
  0x15   : > { %v169_v13 = vrot.slane %v137_v6, 1  ;;  %v170_v14 = vrot.slane %v650_v7, 1  ;;  %v153_v18 = vrot.slane %v145_v9, 1  ;;  %v666_v19 = vrot.slane %v654_v10, 1  ;;  %v686_v38 = vld [vmem:[%s635_s11 + $0x50] sm:$0x3f] }
  0x16   : > { %v213_v20 = vrot.slane %v656_v11, 1  ;;  %v670_v21 = vmul.f32 0.0625, %v641_v3  ;;  %v197_v22 = vrot.slane %v189_v15, 1  ;;  %v253_v23 = vmul.f32 0.125, %v118_v1  ;;  %v689_v39 = vld [vmem:[%s635_s11 + $0x68] sm:$0x3f] }
  0x17   : > { %v673_v24 = vmul.f32 0.125, %v644_v4  ;;  %v265_v25 = vrot.slane %v245_v16, 1  ;;  %v161_v26 = vadd.f32 %v153_v18, %v137_v6  ;;  %v162_v27 = vadd.f32 %v666_v19, %v650_v7  ;;  %v698_v44 = vld [vmem:[%s635_s11 + $0x58] sm:$0x3f]  ;;  %v707_v51 = vld [vmem:[%s635_s11 + $0x60] sm:$0x3f] }
  0x18   : > { %v266_v28 = vrot.slane %v670_v21, 1  ;;  %v277_v29 = vmul.f32 0.125, %v119_v8  ;;  %v257_v30 = vadd.f32 %v253_v23, %v245_v16  ;;  %v278_v32 = vmul.f32 0.125, %v663_v17 }
  0x19   : > { %v258_v31 = vadd.f32 %v673_v24, %v670_v21  ;;  %v285_v33 = vmul.f32 0.25, %v120_v2  ;;  %v177_v34 = vadd.f32 %v169_v13, %v161_v26  ;;  %v178_v35 = vadd.f32 %v170_v14, %v162_v27  ;;  %v729_v13 = vld [vmem:[%s635_s11 + $0x70] sm:$0x3f] }
  0x1a   : > { %v297_v36 = vrot.slane %v277_v29, 1  ;;  %v683_v37 = vmul.f32 0.0625, %v120_v2  ;;  %v273_v40 = vadd.f32 %v265_v25, %v257_v30  ;;  %v693_v42 = vrot.slane %v278_v32, 1 }
  0x1b   : > { %v274_v41 = vadd.f32 %v266_v28, %v258_v31  ;;  %v695_v43 = vmul.f32 0.0625, %v119_v8  ;;  %v185_v45 = vadd.f32 %v656_v11, %v177_v34  ;;  %v186_v46 = vadd.f32 %v659_v12, %v178_v35 }
  0x1c   : > { %v703_v47 = vadd.f32 %v683_v37, %v297_v36  ;;  %v139_v48 = vmul.f32 0.0625, %v698_v44  ;;  %v281_v49 = vadd.f32 %v277_v29, %v273_v40  ;;  %v710_v52 = vmul.f32 0.125, %v686_v38 }
  0x1d   : > { %v282_v50 = vadd.f32 %v278_v32, %v274_v41  ;;  %v713_v53 = vmul.f32 0.125, %v689_v39  ;;  %v205_v54 = vadd.f32 %v197_v22, %v185_v45  ;;  %v190_v56 = vmul.f32 0.25, %v663_v17  ;;  %v744_v32 = vld [vmem:[%s635_s11 + $0x88] sm:$0x3f] }
  0x1e   : > { %v171_v55 = vrot.slane %v139_v48, 1  ;;  %v214_v57 = vrot.slane %v659_v12, 1  ;;  %v289_v58 = vadd.f32 %v285_v33, %v281_v49  ;;  %v718_v59 = vrot.slane %v710_v52, 1  ;;  %v755_v49 = vld [vmem:[%s635_s11 + $0x80] sm:$0x3f] }
  0x1f   : > { %v247_v60 = vmul.f32 0.0625, %v686_v38  ;;  %v722_v61 = vmul.f32 0.125, %v698_v44  ;;  %v221_v62 = vadd.f32 %v213_v20, %v205_v54  ;;  %v198_v63 = vrot.slane %v190_v56, 1  ;;  %v735_v20 = vld [vmem:[%s635_s11 + $0x78] sm:$0x3f] }
  0x20   : > { %v279_v0 = vmul.f32 0.125, %v707_v51  ;;  %v286_v1 = vmul.f32 0.25, %v647_v5  ;;  %v305_v2 = vadd.f32 %v297_v36, %v289_v58  ;;  %v163_v6 = vadd.f32 %v718_v59, %v139_v48 }
  0x21   : > { %v259_v8 = vadd.f32 %v722_v61, %v247_v60  ;;  %v267_v9 = vrot.slane %v247_v60, 1  ;;  %v226_v15 = vadd.f32 %v221_v62, %v650_v7  ;;  %v206_v16 = vadd.f32 %v198_v63, %v186_v46 }
  0x22   : > { %v290_v18 = vadd.f32 %v286_v1, %v282_v50  ;;  %v732_v22 = vrot.slane %v279_v0, 1  ;;  %v310_v23 = vadd.f32 %v305_v2, %v670_v21  ;;  %v179_v25 = vadd.f32 %v171_v55, %v163_v6 }
  0x23   : > { %v275_v26 = vadd.f32 %v267_v9, %v259_v8  ;;  %v739_v27 = vmul.f32 0.0625, %v735_v20  ;;  %v234_v29 = vadd.f32 %v226_v15, %v666_v19  ;;  %v222_v30 = vadd.f32 %v214_v57, %v206_v16 }
  0x24   : > { %v306_v31 = vadd.f32 %v693_v42, %v290_v18  ;;  %v747_v33 = vmul.f32 0.125, %v729_v13  ;;  %v315_v34 = vadd.f32 %v310_v23, %v673_v24  ;;  %v187_v35 = vadd.f32 %v713_v53, %v179_v25  ;;  %v133_v23 = vld [vmem:[%s635_s11 + $0x90] sm:$0x3f] }
  0x25   : > { %v283_v36 = vadd.f32 %v279_v0, %v275_v26  ;;  %v172_v40 = vrot.slane %v739_v27, 1  ;;  %v241_v41 = vadd.f32 %v234_v29, %v170_v14  ;;  %v227_v45 = vadd.f32 %v222_v30, %v139_v48 }
  0x26   : > { %v311_v46 = vadd.f32 %v306_v31, %v247_v60  ;;  %v758_v50 = vrot.slane %v747_v33, 1  ;;  %v322_v54 = vadd.f32 %v315_v34, %v266_v28  ;;  %v764_v56 = vmul.f32 0.125, %v744_v32  ;;  %v134_v34 = vld [vmem:[%s635_s11 + $0x98] sm:$0x3f] }
  0x27   : > { %v191_v57 = vmul.f32 0.25, %v707_v51  ;;  %v215_v58 = vrot.slane %v713_v53, 1  ;;  %v235_v7 = vadd.f32 %v227_v45, %v718_v59  ;;  %v248_v60 = vmul.f32 0.0625, %v729_v13 }
  0x28   : > { %v316_v14 = vadd.f32 %v311_v46, %v722_v61  ;;  %v164_v48 = vadd.f32 %v758_v50, %v739_v27  ;;  %v330_v62 = vrot.slane %v322_v54, 1  ;;  %v774_v28 = vmul.f32 0.125, %v735_v20 }
  0x29   : > { %v199_v21 = vrot.slane %v191_v57, 1  ;;  %v280_v63 = vmul.f32 0.125, %v755_v49  ;;  %v242_v0 = vadd.f32 %v235_v7, %v171_v55  ;;  %v268_v6 = vrot.slane %v248_v60, 1 }
  0x2a   : > { %v323_v1 = vadd.f32 %v316_v14, %v267_v9  ;;  %v180_v2 = vadd.f32 %v172_v40, %v164_v48  ;;  %v338_v8 = vcombine.low %v241_v41, %v330_v62  ;;  %v260_v16 = vadd.f32 %v774_v28, %v248_v60 }
  0x2b   : > { %v207_v15 = vadd.f32 %v199_v21, %v187_v35  ;;  %v287_v18 = vmul.f32 0.25, %v689_v39  ;;  %v786_v29 = vrot.slane %v280_v63, 1  ;;  %v192_v30 = vmul.f32 0.25, %v755_v49 }
  0x2c   : > { %v331_v25 = vrot.slane %v323_v1, 1  ;;  %v188_v26 = vadd.f32 %v764_v56, %v180_v2  ;;  %346 = vst [vmem:[%s780_s15] sm:$0xff] %v338_v8  ;;  %v276_v9 = vadd.f32 %v268_v6, %v260_v16  ;;  %v216_v35 = vrot.slane %v764_v56, 1 }
  0x2d   : > { %v223_v55 = vadd.f32 %v215_v58, %v207_v15  ;;  %v291_v31 = vadd.f32 %v287_v18, %v283_v36  ;;  %v200_v45 = vrot.slane %v192_v30, 1  ;;  %v225_v46 = vmul.f32 0.0625, %v134_v34 }
  0x2e   : > { %v339_v41 = vcombine.low %v242_v0, %v331_v25  ;;  %v792_v54 = vmul.f32 0.125, %v133_v23  ;;  %v284_v7 = vadd.f32 %v280_v63, %v276_v9  ;;  %v288_v48 = vmul.f32 0.25, %v744_v32 }
  0x2f   : > { %v228_v57 = vadd.f32 %v223_v55, %v739_v27  ;;  %v307_v14 = vadd.f32 %v732_v22, %v291_v31  ;;  %v208_v62 = vadd.f32 %v200_v45, %v188_v26  ;;  %v239_v36 = vrot.slane %v225_v46, 1 }
  0x30   : > { %347 = vst [vmem:[%s780_s15 + $0x10] sm:$0xff] %v339_v41  ;;  %v232_v58 = vrot.slane %v792_v54, 1  ;;  %v309_v21 = vmul.f32 0.0625, %v133_v23  ;;  %v292_v2 = vadd.f32 %v288_v48, %v284_v7  ;;  %v800_v8 = vmul.f32 0.125, %v134_v34 }
  0x31   : > { %v236_v1 = vadd.f32 %v228_v57, %v758_v50  ;;  %v312_v0 = vadd.f32 %v307_v14, %v248_v60  ;;  %v224_v15 = vadd.f32 %v216_v35, %v208_v62  ;;  %v802_v27 = vmul.f32 0.25, %v133_v23 }
  0x32   : > { %v320_v16 = vrot.slane %v309_v21, 1  ;;  %v804_v63 = vmul.f32 0.25, %v134_v34  ;;  %v308_v26 = vadd.f32 %v786_v29, %v292_v2  ;;  %v351_v30 = vmul.f32 0.0625, %v647_v5 }
  0x33   : > { %v243_v18 = vadd.f32 %v236_v1, %v172_v40  ;;  %v317_v25 = vadd.f32 %v312_v0, %v774_v28  ;;  %v229_v55 = vadd.f32 %v225_v46, %v224_v15  ;;  %v393_v9 = vrot.slane %v802_v27, 1 }
  0x34   : > { %v366_v60 = vrot.slane %v683_v37, 1  ;;  %v382_v31 = vmul.f32 0.25, %v641_v3  ;;  %v313_v41 = vadd.f32 %v309_v21, %v308_v26  ;;  %v359_v23 = vadd.f32 %v351_v30, %v693_v42 }
  0x35   : > { %v324_v35 = vadd.f32 %v317_v25, %v268_v6  ;;  %v367_v34 = vrot.slane %v351_v30, 1  ;;  %v237_v40 = vadd.f32 %v232_v58, %v229_v55  ;;  %v406_v5 = vrot.slane %v673_v24, 1 }
  0x36   : > { %v374_v45 = vadd.f32 %v366_v60, %v703_v47  ;;  %v390_v57 = vrot.slane %v382_v31, 1  ;;  %v318_v7 = vadd.f32 %v800_v8, %v313_v41  ;;  %v439_v3 = vmul.f32 0.0625, %v663_v17 }
  0x37   : > { %v332_v46 = vrot.slane %v324_v35, 1  ;;  %v375_v37 = vadd.f32 %v367_v34, %v359_v23  ;;  %v244_v6 = vadd.f32 %v239_v36, %v237_v40  ;;  %v446_v48 = vadd.f32 %v695_v43, %v656_v11 }
  0x38   : > { %v378_v14 = vadd.f32 %v374_v45, %v673_v24  ;;  %v454_v62 = vrot.slane %v695_v43, 1  ;;  %v325_v47 = vadd.f32 %v320_v16, %v318_v7  ;;  %v447_v0 = vadd.f32 %v439_v3, %v659_v12 }
  0x39   : > { %v340_v21 = vcombine.low %v243_v18, %v332_v46  ;;  %v379_v1 = vadd.f32 %v375_v37, %v722_v61  ;;  %v455_v15 = vrot.slane %v439_v3, 1  ;;  %v470_v26 = vmul.f32 0.25, %v644_v4 }
  0x3a   : > { %v398_v2 = vadd.f32 %v390_v57, %v378_v14  ;;  %v462_v25 = vadd.f32 %v454_v62, %v446_v48  ;;  %v333_v17 = vrot.slane %v325_v47, 1  ;;  %v352_v24 = vmul.f32 0.0625, %v689_v39 }
  0x3b   : > { %348 = vst [vmem:[%s780_s15 + $0x20] sm:$0xff] %v340_v21  ;;  %v383_v11 = vmul.f32 0.25, %v686_v38  ;;  %v407_v43 = vrot.slane %v722_v61, 1  ;;  %v463_v16 = vadd.f32 %v455_v15, %v447_v0  ;;  %v440_v55 = vmul.f32 0.0625, %v707_v51 }
  0x3c   : > { %v414_v36 = vadd.f32 %v406_v5, %v398_v2  ;;  %v466_v18 = vadd.f32 %v462_v25, %v654_v10  ;;  %v341_v60 = vcombine.low %v244_v6, %v333_v17  ;;  %v360_v31 = vadd.f32 %v352_v24, %v732_v22  ;;  %v136_v17 = vld [vmem:[%s635_s11 + $0xa8] sm:$0x3f] }
  0x3d   : > { %v368_v35 = vrot.slane %v352_v24, 1  ;;  %v391_v4 = vrot.slane %v383_v11, 1  ;;  %v467_v23 = vadd.f32 %v463_v16, %v710_v52  ;;  %v448_v39 = vadd.f32 %v440_v55, %v713_v53 }
  0x3e   : > { %v419_v41 = vadd.f32 %v414_v36, %v351_v30  ;;  %v474_v40 = vadd.f32 %v470_v26, %v466_v18  ;;  %349 = vst [vmem:[%s780_s15 + $0x30] sm:$0xff] %v341_v60  ;;  %v456_v45 = vrot.slane %v440_v55, 1  ;;  %v471_v57 = vmul.f32 0.25, %v698_v44  ;;  %v135_v18 = vld [vmem:[%s635_s11 + $0xa0] sm:$0x3f] }
  0x3f   : > { %v376_v38 = vadd.f32 %v368_v35, %v360_v31  ;;  %v399_v61 = vadd.f32 %v391_v4, %v379_v1  ;;  %v353_v5 = vmul.f32 0.0625, %v744_v32  ;;  %v384_v46 = vmul.f32 0.25, %v729_v13 }
  0x40   : > { %v427_v10 = vadd.f32 %v419_v41, %v693_v42  ;;  %v478_v51 = vadd.f32 %v474_v40, %v666_v19  ;;  %v464_v7 = vadd.f32 %v456_v45, %v448_v39  ;;  %v475_v37 = vadd.f32 %v471_v57, %v467_v23 }
  0x41   : > { %v380_v30 = vadd.f32 %v376_v38, %v774_v28  ;;  %v415_v52 = vadd.f32 %v407_v43, %v399_v61  ;;  %v361_v48 = vadd.f32 %v353_v5, %v786_v29  ;;  %v369_v62 = vrot.slane %v353_v5, 1 }
  0x42   : > { %v434_v6 = vadd.f32 %v427_v10, %v367_v34  ;;  %v483_v14 = vadd.f32 %v478_v51, %v439_v3  ;;  %v468_v42 = vadd.f32 %v464_v7, %v747_v33  ;;  %v479_v19 = vadd.f32 %v475_v37, %v718_v59 }
  0x43   : > { %v420_v21 = vadd.f32 %v415_v52, %v352_v24  ;;  %v392_v44 = vrot.slane %v384_v46, 1  ;;  %v377_v13 = vadd.f32 %v369_v62, %v361_v48  ;;  %v408_v47 = vrot.slane %v774_v28, 1 }
  0x44   : > { %v488_v32 = vadd.f32 %v483_v14, %v659_v12  ;;  %v441_v1 = vmul.f32 0.0625, %v755_v49  ;;  %v484_v3 = vadd.f32 %v479_v19, %v440_v55  ;;  %v472_v2 = vmul.f32 0.25, %v735_v20 }
  0x45   : > { %v428_v34 = vadd.f32 %v420_v21, %v732_v22  ;;  %v400_v0 = vadd.f32 %v392_v44, %v380_v30  ;;  %v381_v33 = vadd.f32 %v377_v13, %v800_v8  ;;  %v409_v20 = vrot.slane %v800_v8, 1 }
  0x46   : > { %v495_v25 = vadd.f32 %v488_v32, %v455_v15  ;;  %v449_v59 = vadd.f32 %v441_v1, %v764_v56  ;;  %v457_v26 = vrot.slane %v441_v1, 1  ;;  %v489_v24 = vadd.f32 %v484_v3, %v713_v53 }
  0x47   : > { %v435_v12 = vadd.f32 %v428_v34, %v368_v35  ;;  %v416_v28 = vadd.f32 %v408_v47, %v400_v0  ;;  %v476_v11 = vadd.f32 %v472_v2, %v468_v42  ;;  %v401_v43 = vadd.f32 %v393_v9, %v381_v33 }
  0x48   : > { %v503_v49 = vrot.slane %v495_v25, 1  ;;  %v465_v22 = vadd.f32 %v457_v26, %v449_v59  ;;  %v496_v15 = vadd.f32 %v489_v24, %v456_v45  ;;  %v418_v55 = vmul.f32 0.0625, %v136_v17 }
  0x49   : > { %v421_v36 = vadd.f32 %v416_v28, %v353_v5  ;;  %v480_v16 = vadd.f32 %v476_v11, %v758_v50  ;;  %v417_v31 = vadd.f32 %v409_v20, %v401_v43  ;;  %v423_v35 = vmul.f32 0.125, %v135_v18 }
  0x4a   : > { %v511_v60 = vcombine.low %v434_v6, %v503_v49  ;;  %v469_v53 = vadd.f32 %v465_v22, %v792_v54  ;;  %v504_v4 = vrot.slane %v496_v15, 1  ;;  %v482_v40 = vmul.f32 0.0625, %v135_v18 }
  0x4b   : > { %v429_v41 = vadd.f32 %v421_v36, %v786_v29  ;;  %v485_v23 = vadd.f32 %v480_v16, %v441_v1  ;;  %v422_v27 = vadd.f32 %v418_v55, %v417_v31  ;;  %v425_v9 = vrot.slane %v423_v35, 1 }
  0x4c   : > { %587 = vst [vmem:[%s780_s15 + $0x8] sm:$0xff] %v511_v60  ;;  %v477_v8 = vadd.f32 %v804_v63, %v469_v53  ;;  %v512_v39 = vcombine.low %v435_v12, %v504_v4  ;;  %v487_v61 = vmul.f32 0.125, %v136_v17  ;;  %v432_v10 = vrot.slane %v418_v55, 1 }
  0x4d   : > { %v490_v50 = vadd.f32 %v485_v23, %v764_v56  ;;  %v436_v45 = vadd.f32 %v429_v41, %v369_v62  ;;  %v430_v29 = vadd.f32 %v425_v9, %v422_v27  ;;  %v493_v5 = vrot.slane %v482_v40, 1 }
  0x4e   : > { %v481_v38 = vadd.f32 %v477_v8, %v232_v58  ;;  %588 = vst [vmem:[%s780_s15 + $0x18] sm:$0xff] %v512_v39 }
  0x4f   : > { %v497_v57 = vadd.f32 %v490_v50, %v457_v26  ;;  %v437_v52 = vadd.f32 %v432_v10, %v430_v29 }
  0x50   : > { %v486_v51 = vadd.f32 %v482_v40, %v481_v38 }
  0x51   : > { %v505_v46 = vrot.slane %v497_v57, 1 }
  0x52   : > { %v491_v30 = vadd.f32 %v487_v61, %v486_v51 }
  0x53   : > { %v513_v63 = vcombine.low %v436_v45, %v505_v46 }
  0x54   : > { %v498_v7 = vadd.f32 %v493_v5, %v491_v30 }
  0x55   : > { %589 = vst [vmem:[%s780_s15 + $0x28] sm:$0xff] %v513_v63 }
  0x56   : > { %v506_v37 = vrot.slane %v498_v7, 1 }
  0x58   : > { %v514_v56 = vcombine.low %v437_v52, %v506_v37 }
  0x5a   : > { %590 = vst [vmem:[%s780_s15 + $0x38] sm:$0xff] %v514_v56 }
  0x5b PF: > { %s11_s6 = sadd.s32 1, %s609_s6  }
  0x5c   : > { %p8_p4 = scmp.ge.s32.totalorder %s11_s6, 4  }
  0x5e   :  { %10 = sbr.rel (!%p8_p4) target bundleno = 1 (0x1), region = 55 }

// kernel: generator_forward.22
= control target key start
LH: loop header
LB: loop body
LE: loop exit
PB: predicated region body
PF: predicated region fallthrough
CT: control target
= control target key end

     0   :  { %s338_s6 = smov 0   ;;  %s359_s0 = inlined_call_operand.vmem [shape: f32[2,5,5,128], index: 0, kind: input, shape index: {}]   ;;  %s360_s1 = inlined_call_operand.vmem [shape: f32[2,4,2,4,256], index: 1, kind: output, shape index: {}]  }
   0x1 LB: > { %s296_s7 = sadd.s32 4294967295, %s326_s6   ;;  %p300_p0 = scmp.ge.s32.totalorder %s326_s6, 1  ;;  %s326_s6 = sphi %s338_s6, %s11_s6  }
   0x2   : > { %p87_p1 = scmp.lt.s32.totalorder %s326_s6, 3 }
   0x4   : > { %p88_p2 = pnand %p300_p0, %p87_p1 }
   0x5   : > { %p107_p3 = scmp.lt.s32.totalorder (!%p88_p2), %s296_s7, 1 }
   0x6   : > { %91 = sbr.rel (%p88_p2) target bundleno = 37 (0x25), region = 24 }
   0xd   : > { %s362_s7 = smov (!%p107_p3, %s296_s7), 1 }
   0xe   : > { %s311_s8 = smul.u32 40, %s362_s7  ;;  %s310_s12 = sshll.u32 %s362_s7, 6 }
   0xf   : > { %s116_s15 = scalar_lea.vmem %s360_s1, %s310_s12 }
  0x10   : > { %s111_s11 = scalar_lea.vmem %s359_s0, %s311_s8 }
  0x11   : > { %v117_v0 = vld [vmem:[%s111_s11] sm:$0x1f]  ;;  %v118_v1 = vld [vmem:[%s111_s11 + $0x8] sm:$0x1f]  ;;  %v119_v2 = vld [vmem:[%s111_s11 + $0x10] sm:$0x1f] }
  0x12   : > { %v122_v3 = vmul.f32 0.25, %v117_v0  ;;  %v123_v4 = vmul.f32 0.25, %v118_v1  ;;  %v158_v5 = vmul.f32 0.5, %v117_v0  ;;  %v159_v6 = vmul.f32 0.5, %v118_v1  ;;  %v120_v7 = vld [vmem:[%s111_s11 + $0x18] sm:$0x1f] }
  0x13   : > { %v124_v8 = vmul.f32 0.25, %v119_v2  ;;  %v160_v9 = vmul.f32 0.5, %v119_v2  ;;  %v125_v10 = vmul.f32 0.25, %v120_v7  ;;  %v161_v11 = vmul.f32 0.5, %v120_v7  ;;  %v121_v12 = vld [vmem:[%s111_s11 + $0x20] sm:$0x1f] }
  0x14   : > { %v134_v13 = vrot.slane %v122_v3, 1  ;;  %v135_v14 = vrot.slane %v123_v4, 1  ;;  %v167_v15 = vadd.f32 %v159_v6, %v158_v5  ;;  %v146_v16 = vmul.f32 0.25, %v121_v12 }
  0x15   : > { %v136_v17 = vrot.slane %v124_v8, 1  ;;  %v168_v18 = vadd.f32 %v160_v9, %v159_v6  ;;  %v137_v19 = vrot.slane %v125_v10, 1  ;;  %v169_v20 = vadd.f32 %v161_v11, %v160_v9 }
  0x16   : > { %v142_v21 = vadd.f32 %v134_v13, %v122_v3  ;;  %v175_v22 = vrot.slane %v167_v15, 1  ;;  %v143_v23 = vadd.f32 %v135_v14, %v123_v4  ;;  %v152_v24 = vrot.slane %v146_v16, 1 }
  0x17   : > { %v176_v25 = vrot.slane %v168_v18, 1  ;;  %v144_v26 = vadd.f32 %v136_v17, %v124_v8  ;;  %v177_v27 = vrot.slane %v169_v20, 1  ;;  %v145_v28 = vadd.f32 %v137_v19, %v125_v10 }
  0x18   : > { %v147_v29 = vadd.f32 %v142_v21, %v123_v4  ;;  %v148_v30 = vadd.f32 %v143_v23, %v124_v8  ;;  %v166_v31 = vmul.f32 0.5, %v121_v12  ;;  %v200_v32 = vrot.slane %v159_v6, 1 }
  0x19   : > { %v149_v33 = vadd.f32 %v144_v26, %v125_v10  ;;  %v150_v34 = vadd.f32 %v146_v16, %v145_v28  ;;  %v220_v35 = vrot.slane %v118_v1, 1  ;;  %v201_v36 = vrot.slane %v160_v9, 1 }
  0x1a   : > { %v154_v37 = vadd.f32 %v147_v29, %v135_v14  ;;  %v155_v38 = vadd.f32 %v148_v30, %v136_v17  ;;  %v170_v39 = vadd.f32 %v166_v31, %v161_v11  ;;  %v208_v40 = vadd.f32 %v200_v32, %v159_v6 }
  0x1b   : > { %v156_v41 = vadd.f32 %v149_v33, %v137_v19  ;;  %v157_v42 = vadd.f32 %v152_v24, %v150_v34  ;;  %v209_v43 = vadd.f32 %v201_v36, %v160_v9  ;;  %v221_v44 = vrot.slane %v119_v2, 1 }
  0x1c   : > { %v183_v45 = vcombine.low %v154_v37, %v175_v22  ;;  %v184_v46 = vcombine.low %v155_v38, %v176_v25  ;;  %v178_v47 = vrot.slane %v170_v39, 1  ;;  %v228_v48 = vcombine.low %v208_v40, %v220_v35 }
  0x1d   : > { %v185_v49 = vcombine.low %v156_v41, %v177_v27  ;;  %v229_v50 = vcombine.low %v209_v43, %v221_v44  ;;  %v202_v51 = vrot.slane %v161_v11, 1  ;;  %v222_v52 = vrot.slane %v120_v7, 1 }
  0x1e   : > { %191 = vst [vmem:[%s116_s15] sm:$0xff] %v183_v45  ;;  %192 = vst [vmem:[%s116_s15 + $0x10] sm:$0xff] %v184_v46  ;;  %v186_v53 = vcombine.low %v157_v42, %v178_v47  ;;  %v203_v54 = vrot.slane %v166_v31, 1  ;;  %v223_v55 = vrot.slane %v121_v12, 1 }
  0x1f   : > { %304 = vst [vmem:[%s116_s15 + $0x8] sm:$0xff] %v228_v48  ;;  %193 = vst [vmem:[%s116_s15 + $0x20] sm:$0xff] %v185_v49  ;;  %v210_v56 = vadd.f32 %v202_v51, %v161_v11 }
  0x20   : > { %305 = vst [vmem:[%s116_s15 + $0x18] sm:$0xff] %v229_v50  ;;  %194 = vst [vmem:[%s116_s15 + $0x30] sm:$0xff] %v186_v53  ;;  %v211_v57 = vadd.f32 %v203_v54, %v166_v31 }
  0x21   : > { %v230_v58 = vcombine.low %v210_v56, %v222_v52 }
  0x22   : > { %v231_v59 = vcombine.low %v211_v57, %v223_v55 }
  0x23   : > { %306 = vst [vmem:[%s116_s15 + $0x28] sm:$0xff] %v230_v58 }
  0x24   : > { %307 = vst [vmem:[%s116_s15 + $0x38] sm:$0xff] %v231_v59 }
  0x25 PF: > { %s11_s6 = sadd.s32 1, %s326_s6  }
  0x26   : > { %p8_p4 = scmp.ge.s32.totalorder %s11_s6, 4  }
  0x28   :  { %10 = sbr.rel (!%p8_p4) target bundleno = 1 (0x1), region = 55 }

// kernel: generator_forward.24
= control target key start
LH: loop header
LB: loop body
LE: loop exit
PB: predicated region body
PF: predicated region fallthrough
CT: control target
= control target key end

     0   :  { %7 = vsyncpa [#allocation3], 0  ;;  %s3580_s9 = smov 0   ;;  %s3784_s0 = inlined_call_operand.vmem [shape: bf16[2,6,6,128], index: 0, kind: input, shape index: {}]   ;;  %s3785_s1 = inlined_call_operand.hbm [shape: bf16[1152,512], index: 1, kind: input, shape index: {}]   ;;  %s3786_s2 = inlined_call_operand.vmem [shape: f32[2,16,512], index: 2, kind: output, shape index: {}]  }
   0x1 LB: > { %s3586_s10 = sadd.s32 4294967295, %s3558_s9   ;;  %p2713_p0 = scmp.ge.s32.totalorder %s3558_s9, 1  ;;  %s3558_s9 = sphi %s3580_s9, %s13_s9  }
   0x2   : > { %p91_p1 = scmp.lt.s32.totalorder %s3558_s9, 3  ;;  %s3560_s11 = smov [#allocation2]  }
   0x3   : > { %s103_s12 = sshll.u32 %s3560_s11, 4  ;;  %p3787_p3 = scmp.eq.s32.totalorder %s3586_s10, 0  ;;  %s104_s12 = int_to_ptr.vmem [resolvable:$true] %s103_s12 }
   0x4   : > { %p3590_p2 = pnand %p2713_p0, %p91_p1  ;;  %s3520_s17 = scalar_lea.hbm %s3785_s1, 36864 }
   0x5   : > { %p3521_p6 = scmp.ne.s32.totalorder %s3785_s1, %s3520_s17  ;;  %p3527_p10 = scmp.lt.u32.totalorder %s3520_s17, %s3785_s1 }
   0x6   : > { %s3789_s13 = scalar_select %p3590_p2, 1, 0 }
   0x7   : > { %p3063_p4 = pneg %p3590_p2 }
   0x9   : > { %p3599_p5 = pnand %p3787_p3, %p3063_p4 }
   0xb   : > { %p3522_p7 = pneg %p3599_p5 }
   0xd   : > { %p3523_p8 = pnand %p3522_p7, %p3521_p6 }
   0xf   : > { %p3524_p9 = pneg %p3523_p8 }
  0x11   : > { %p3529_p11 = pnand %p3527_p10, %p3524_p9 }
  0x13   : > { %3532 = shalt.err (!%p3529_p11)
}
  0x14   : > { %s3533_s22 = scalar_lea.vmem %s104_s12, 36864  ;;  %p3541_p1 = scmp.lt.s32.totalorder %s104_s12, %s104_s12 }
  0x15   : > { %p3534_p12 = scmp.ne.s32.totalorder %s104_s12, %s3533_s22  ;;  %p3542_p4 = scmp.lt.s32.totalorder %s3533_s22, %s3533_s22 }
  0x17   : > { %p3536_p13 = pnand %p3534_p12, %p3522_p7  ;;  %p3543_p3 = por %p3542_p4, %p3541_p1 }
  0x19   : > { %p3537_p0 = pneg %p3536_p13 }
  0x1b   : > { %p3544_p2 = pnand %p3543_p3, %p3537_p0 }
  0x1d   : > { %3547 = shalt.err (!%p3544_p2)
}
  0x1e   : > { %s3561_s23 = smov 256   ;;  %s3562_s24 = smov 16  }
  0x1f   : > { %3066 = dma.hbm_to_vmem [thread:$0]  (!%p3599_p5), %s3785_s1, 36864, %s104_s12, [#allocation3], %s3561_s23, %s3561_s23, %s3562_s24  }
  0x20   : > { %p3791_p6 = scmp.ne.s32.totalorder %s3789_s13, 0 }
  0x21   : > { %p3792_p8 = scmp.eq.s32.totalorder (!%p3791_p6), %s3586_s10, 0 }
  0x22   : > { %127 = sbr.rel (%p3791_p6) target bundleno = 547 (0x223), region = 28 }
  0x29   : > { %3553 = dma.done.wait (%p3792_p8), [#allocation3], 36864   ;;  %p3793_p7 = pmov %p3792_p8 }
  0x2a   : > { %v3082_v0 = vld [vmem:[#allocation2 + $0x4] ss:$16 sps:$4 sm:$0xff]   ;;  %v3084_v1 = vld [vmem:[#allocation2 + $0xc] ss:$16 sps:$4 sm:$0xff]   ;;  %v3086_v2 = vld [vmem:[#allocation2] ss:$16 sps:$4 sm:$0xff]   ;;  %v237_v45 = vlaneseq }
  0x2b   : > { %3555 = vsyncadd (%p3793_p7), [#allocation3], 4294930432  ;;  %2206 = vmatprep.subr.bf16.mxu0 %v3082_v0  ;;  %v3087_v3 = vld [vmem:[#allocation2 + $0x8] ss:$16 sps:$4 sm:$0xff]   ;;  %2421 = vmatprep.subr.bf16.mxu1 %v3084_v1  ;;  %v3088_v4 = vld [vmem:[#allocation2 + $0x24] ss:$16 sps:$4 sm:$0xff]  }
  0x2c   : > { %2207 = vmatpush1.bf16.msra.mxu0 %v3086_v2  ;;  %2422 = vmatpush1.bf16.msra.mxu1 %v3087_v3  ;;  %v3090_v5 = vld [vmem:[#allocation2 + $0x2c] ss:$16 sps:$4 sm:$0xff]   ;;  %v3092_v6 = vld [vmem:[#allocation2 + $0x20] ss:$16 sps:$4 sm:$0xff]   ;;  %v3093_v7 = vld [vmem:[#allocation2 + $0x28] ss:$16 sps:$4 sm:$0xff]  }
  0x2d   : > { %2208 = vmatprep.subr.bf16.mxu0 %v3088_v4  ;;  %2423 = vmatprep.subr.bf16.mxu1 %v3090_v5  ;;  %v3094_v8 = vld [vmem:[#allocation2 + $0x44] ss:$16 sps:$4 sm:$0xff]   ;;  %v3096_v9 = vld [vmem:[#allocation2 + $0x4c] ss:$16 sps:$4 sm:$0xff]   ;;  %v3098_v10 = vld [vmem:[#allocation2 + $0x40] ss:$16 sps:$4 sm:$0xff]  }
  0x2e   : > { %v3099_v11 = vld [vmem:[#allocation2 + $0x48] ss:$16 sps:$4 sm:$0xff]   ;;  %v3100_v12 = vld [vmem:[#allocation2 + $0x64] ss:$16 sps:$4 sm:$0xff]   ;;  %v3102_v13 = vld [vmem:[#allocation2 + $0x6c] ss:$16 sps:$4 sm:$0xff]  }
  0x2f   : > { %v3104_v14 = vld [vmem:[#allocation2 + $0x60] ss:$16 sps:$4 sm:$0xff]   ;;  %v3105_v15 = vld [vmem:[#allocation2 + $0x68] ss:$16 sps:$4 sm:$0xff]   ;;  %v3106_v16 = vld [vmem:[#allocation2 + $0x84] ss:$16 sps:$4 sm:$0xff]  }
  0x30   : > { %2209 = vmatpush1.bf16.msra.mxu0 %v3092_v6  ;;  %2424 = vmatpush1.bf16.msra.mxu1 %v3093_v7  ;;  %v3108_v17 = vld [vmem:[#allocation2 + $0x8c] ss:$16 sps:$4 sm:$0xff]   ;;  %v3110_v18 = vld [vmem:[#allocation2 + $0x80] ss:$16 sps:$4 sm:$0xff]   ;;  %v3111_v19 = vld [vmem:[#allocation2 + $0x88] ss:$16 sps:$4 sm:$0xff]  }
  0x31   : > { %2210 = vmatprep.subr.bf16.mxu0 %v3094_v8  ;;  %2425 = vmatprep.subr.bf16.mxu1 %v3096_v9  ;;  %v3112_v20 = vld [vmem:[#allocation2 + $0xa4] ss:$16 sps:$4 sm:$0xff]   ;;  %v3114_v21 = vld [vmem:[#allocation2 + $0xac] ss:$16 sps:$4 sm:$0xff]   ;;  %v3116_v22 = vld [vmem:[#allocation2 + $0xa0] ss:$16 sps:$4 sm:$0xff]  }
  0x32   : > { %v3117_v23 = vld [vmem:[#allocation2 + $0xa8] ss:$16 sps:$4 sm:$0xff]   ;;  %v3118_v24 = vld [vmem:[#allocation2 + $0xc4] ss:$16 sps:$4 sm:$0xff]   ;;  %v3120_v25 = vld [vmem:[#allocation2 + $0xcc] ss:$16 sps:$4 sm:$0xff]  }
  0x33   : > { %v3122_v26 = vld [vmem:[#allocation2 + $0xc0] ss:$16 sps:$4 sm:$0xff]   ;;  %v3123_v27 = vld [vmem:[#allocation2 + $0xc8] ss:$16 sps:$4 sm:$0xff]   ;;  %v3124_v28 = vld [vmem:[#allocation2 + $0xe4] ss:$16 sps:$4 sm:$0xff]  }
  0x34   : > { %2211 = vmatpush1.bf16.msra.mxu0 %v3098_v10  ;;  %2426 = vmatpush1.bf16.msra.mxu1 %v3099_v11  ;;  %v3126_v29 = vld [vmem:[#allocation2 + $0xec] ss:$16 sps:$4 sm:$0xff]   ;;  %v3128_v30 = vld [vmem:[#allocation2 + $0xe0] ss:$16 sps:$4 sm:$0xff]   ;;  %p149_p2 = scmp.lt.s32.totalorder %s3586_s10, 1  ;;  %v238_v60 = vshrl.u32 %v237_v45, 7 }
  0x35   : > { %2212 = vmatprep.subr.bf16.mxu0 %v3100_v12  ;;  %2427 = vmatprep.subr.bf16.mxu1 %v3102_v13  ;;  %v3129_v31 = vld [vmem:[#allocation2 + $0xe8] ss:$16 sps:$4 sm:$0xff]   ;;  %v3130_v32 = vld [vmem:[#allocation2 + $0x104] ss:$16 sps:$4 sm:$0xff]   ;;  %v3132_v33 = vld [vmem:[#allocation2 + $0x10c] ss:$16 sps:$4 sm:$0xff]  }
  0x36   : > { %v3134_v34 = vld [vmem:[#allocation2 + $0x100] ss:$16 sps:$4 sm:$0xff]   ;;  %v3135_v35 = vld [vmem:[#allocation2 + $0x108] ss:$16 sps:$4 sm:$0xff]   ;;  %s3795_s10 = smov (!%p149_p2, %s3586_s10), 1 }
  0x37   : > { %v3136_v36 = vld [vmem:[#allocation2 + $0x124] ss:$16 sps:$4 sm:$0xff]   ;;  %v3138_v37 = vld [vmem:[#allocation2 + $0x12c] ss:$16 sps:$4 sm:$0xff]   ;;  %v3140_v38 = vld [vmem:[#allocation2 + $0x120] ss:$16 sps:$4 sm:$0xff]  }
  0x38   : > { %2213 = vmatpush1.bf16.msra.mxu0 %v3104_v14  ;;  %2428 = vmatpush1.bf16.msra.mxu1 %v3105_v15  ;;  %s3058_s27 = smul.u32 24, %s3795_s10  ;;  %v3141_v39 = vld [vmem:[#allocation2 + $0x128] ss:$16 sps:$4 sm:$0xff]   ;;  %v3142_v40 = vld [vmem:[#allocation2 + $0x144] ss:$16 sps:$4 sm:$0xff]   ;;  %s3025_s3 = sshll.u32 %s3795_s10, 6 }
  0x39   : > { %2214 = vmatprep.subr.bf16.mxu0 %v3106_v16  ;;  %2429 = vmatprep.subr.bf16.mxu1 %v3108_v17  ;;  %v3144_v41 = vld [vmem:[#allocation2 + $0x14c] ss:$16 sps:$4 sm:$0xff]   ;;  %v3146_v42 = vld [vmem:[#allocation2 + $0x140] ss:$16 sps:$4 sm:$0xff]   ;;  %v3147_v43 = vld [vmem:[#allocation2 + $0x148] ss:$16 sps:$4 sm:$0xff]   ;;  %s158_s6 = scalar_lea.vmem %s3786_s2, %s3025_s3 }
  0x3a   : > { %s3633_s30 = scalar_lea.vmem %s3784_s0, %s3058_s27  ;;  %v3148_v44 = vld [vmem:[#allocation2 + $0x164] ss:$16 sps:$4 sm:$0xff]   ;;  %v3150_v46 = vld [vmem:[#allocation2 + $0x16c] ss:$16 sps:$4 sm:$0xff]   ;;  %v3563_v47 = vmov 1983009808  }
  0x3b   : > { %v235_v48 = vunpack.c.l.s4 %v3563_v47  ;;  %v3152_v49 = vld [vmem:[#allocation2 + $0x160] ss:$16 sps:$4 sm:$0xff]   ;;  %v3153_v50 = vld [vmem:[#allocation2 + $0x168] ss:$16 sps:$4 sm:$0xff]   ;;  %v3637_v52 = vld [vmem:[%s3633_s30 + $0x4] sm:$0x7] }
  0x3c   : > { %2215 = vmatpush1.bf16.msra.mxu0 %v3110_v18  ;;  %2430 = vmatpush1.bf16.msra.mxu1 %v3111_v19  ;;  %v160_v51 = vld [vmem:[%s3633_s30] sm:$0x7]  ;;  %v3640_v53 = vld [vmem:[%s3633_s30 + $0x8] sm:$0x7]  ;;  %v3643_v54 = vld [vmem:[%s3633_s30 + $0xc] sm:$0x7]  ;;  %v3649_v57 = vcombine.low %v3637_v52, %v3637_v52 }
  0x3d   : > { %2216 = vmatprep.subr.bf16.mxu0 %v3112_v20  ;;  %2431 = vmatprep.subr.bf16.mxu1 %v3114_v21  ;;  %v3645_v55 = vcombine.low %v160_v51, %v160_v51  ;;  %v3154_v56 = vld [vmem:[#allocation2 + $0x184] ss:$16 sps:$4 sm:$0xff]   ;;  %v2723_v58 = vcombine.low %v3640_v53, %v3640_v53  ;;  %v3655_v59 = vcombine.low %v3643_v54, %v3643_v54  ;;  %v3156_v61 = vld [vmem:[#allocation2 + $0x18c] ss:$16 sps:$4 sm:$0xff]   ;;  %v236_v0 = vunpack.c.0.s8 %v235_v48  ;;  %v3158_v5 = vld [vmem:[#allocation2 + $0x180] ss:$16 sps:$4 sm:$0xff]  }
  0x3e   : > { %v186_v1 = vshrl.u32 %v3649_v57, 16  ;;  %v188_v2 = vshll.u32 %v3649_v57, 16  ;;  %v3159_v9 = vld [vmem:[#allocation2 + $0x188] ss:$16 sps:$4 sm:$0xff]   ;;  %v3160_v12 = vld [vmem:[#allocation2 + $0x1a4] ss:$16 sps:$4 sm:$0xff]  }
  0x3f   : > { %v179_v62 = vshrl.u32 %v3645_v55, 16  ;;  %v181_v63 = vshll.u32 %v3645_v55, 16  ;;  %v193_v3 = vshrl.u32 %v2723_v58, 16  ;;  %v195_v4 = vshll.u32 %v2723_v58, 16  ;;  %v3162_v13 = vld [vmem:[#allocation2 + $0x1ac] ss:$16 sps:$4 sm:$0xff]  }
  0x40   : > { %2217 = vmatpush1.bf16.msra.mxu0 %v3116_v22  ;;  %2432 = vmatpush1.bf16.msra.mxu1 %v3117_v23  ;;  %v200_v7 = vshrl.u32 %v3655_v59, 16  ;;  %v202_v8 = vshll.u32 %v3655_v59, 16  ;;  %v190_v10 = vrot.slane %v188_v2, 1  ;;  %v3663_v16 = vsub.s32 %v236_v0, %v238_v60  ;;  %v3164_v19 = vld [vmem:[#allocation2 + $0x1a0] ss:$16 sps:$4 sm:$0xff]  }
  0x41   : > { %2218 = vmatprep.subr.bf16.mxu0 %v3118_v24  ;;  %2433 = vmatprep.subr.bf16.mxu1 %v3120_v25  ;;  %v183_v6 = vrot.slane %v181_v63, 1  ;;  %v197_v11 = vrot.slane %v195_v4, 1  ;;  %v3165_v22 = vld [vmem:[#allocation2 + $0x1a8] ss:$16 sps:$4 sm:$0xff]   ;;  %v3166_v23 = vld [vmem:[#allocation2 + $0x1c4] ss:$16 sps:$4 sm:$0xff]  }
  0x42   : > { %v204_v15 = vrot.slane %v202_v8, 1  ;;  %v191_v17 = vor.u32 %v190_v10, %v186_v1  ;;  %v3184_v47 = vld [vmem:[#allocation2 + $0x204] ss:$16 sps:$4 sm:$0xff]   ;;  %v3185_v60 = vld [vmem:[#allocation2 + $0x208] ss:$16 sps:$4 sm:$0xff]   ;;  %v206_v10 = vrot.slane %v3645_v55, 1 }
  0x43   : > { %v184_v14 = vor.u32 %v183_v6, %v179_v62  ;;  %v198_v18 = vor.u32 %v197_v11, %v193_v3  ;;  %v3193_v62 = vld [vmem:[#allocation2 + $0x22c] ss:$16 sps:$4 sm:$0xff]   ;;  %v3188_v63 = vld [vmem:[#allocation2 + $0x220] ss:$16 sps:$4 sm:$0xff]   ;;  %v3191_v0 = vld [vmem:[#allocation2 + $0x228] ss:$16 sps:$4 sm:$0xff]  }
  0x44   : > { %2219 = vmatpush1.bf16.msra.mxu0 %v3122_v26  ;;  %2434 = vmatpush1.bf16.msra.mxu1 %v3123_v27  ;;  %v3665_v20 = vor.u32 %v204_v15, %v200_v7  ;;  %v273_v25 = vcombine.low %v3637_v52, %v191_v17  ;;  %v3168_v26 = vld [vmem:[#allocation2 + $0x1cc] ss:$16 sps:$4 sm:$0xff]   ;;  %v3196_v1 = vld [vmem:[#allocation2 + $0x244] ss:$16 sps:$4 sm:$0xff]   ;;  %v3194_v3 = vld [vmem:[#allocation2 + $0x240] ss:$16 sps:$4 sm:$0xff]   ;;  %v233_v15 = vcombine.low %v206_v10, %v3637_v52 }
  0x45   : > { %2220 = vmatprep.subr.bf16.mxu0 %v3124_v28  ;;  %2435 = vmatprep.subr.bf16.mxu1 %v3126_v29  ;;  %v232_v21 = vcombine.low %v160_v51, %v184_v14  ;;  %v250_v24 = vcombine.low %v3640_v53, %v198_v18  ;;  %v3199_v2 = vld [vmem:[#allocation2 + $0x24c] ss:$16 sps:$4 sm:$0xff]   ;;  %v3197_v4 = vld [vmem:[#allocation2 + $0x248] ss:$16 sps:$4 sm:$0xff]   ;;  %v3200_v7 = vld [vmem:[#allocation2 + $0x260] ss:$16 sps:$4 sm:$0xff]  }
  0x46   : > { %v291_v28 = vcombine.low %v3643_v54, %v3665_v20  ;;  %v3205_v6 = vld [vmem:[#allocation2 + $0x26c] ss:$16 sps:$4 sm:$0xff]   ;;  %v3203_v8 = vld [vmem:[#allocation2 + $0x268] ss:$16 sps:$4 sm:$0xff]   ;;  %v3214_v14 = vld [vmem:[#allocation2 + $0x2a4] ss:$16 sps:$4 sm:$0xff]   ;;  %v247_v52 = vrot.slane %v233_v15, %v3663_v16 }
  0x47   : > { %v240_v27 = vrot.slane %v232_v21, %v3663_v16  ;;  %v264_v29 = vrot.slane %v250_v24, %v3663_v16  ;;  %v3211_v11 = vld [vmem:[#allocation2 + $0x28c] ss:$16 sps:$4 sm:$0xff]   ;;  %v3215_v21 = vld [vmem:[#allocation2 + $0x2a8] ss:$16 sps:$4 sm:$0xff]   ;;  %v3218_v24 = vld [vmem:[#allocation2 + $0x2c0] ss:$16 sps:$4 sm:$0xff]  }
  0x48   : > { %2221 = vmatpush1.bf16.msra.mxu0 %v3128_v30  ;;  %2436 = vmatpush1.bf16.msra.mxu1 %v3129_v31  ;;  %v281_v30 = vrot.slane %v273_v25, %v3663_v16  ;;  %v3170_v31 = vld [vmem:[#allocation2 + $0x1c0] ss:$16 sps:$4 sm:$0xff]   ;;  %v3221_v25 = vld [vmem:[#allocation2 + $0x2c8] ss:$16 sps:$4 sm:$0xff]   ;;  %v3262_v15 = vld [vmem:[#allocation2 + $0x3a4] ss:$16 sps:$4 sm:$0xff]  }
  0x49   : > { %2222 = vmatprep.subr.bf16.mxu0 %v3130_v32  ;;  %2437 = vmatprep.subr.bf16.mxu1 %v3132_v33  ;;  %v305_v32 = vrot.slane %v291_v28, %v3663_v16  ;;  %v207_v33 = vrot.slane %v3649_v57, 1  ;;  %v3248_v10 = vld [vmem:[#allocation2 + $0x360] ss:$16 sps:$4 sm:$0xff]  }
  0x4c   : > { %2223 = vmatpush1.bf16.msra.mxu0 %v3134_v34  ;;  %2438 = vmatpush1.bf16.msra.mxu1 %v3135_v35  ;;  %v3171_v34 = vld [vmem:[#allocation2 + $0x1c8] ss:$16 sps:$4 sm:$0xff]   ;;  %v3172_v35 = vld [vmem:[#allocation2 + $0x1e4] ss:$16 sps:$4 sm:$0xff]  }
  0x4d   : > { %2224 = vmatprep.subr.bf16.mxu0 %v3136_v36  ;;  %2439 = vmatprep.subr.bf16.mxu1 %v3138_v37  ;;  %v2727_v36 = vcombine.low %v240_v27, %v281_v30  ;;  %v3676_v37 = vrot.slane %v2723_v58, 1  ;;  %v3226_v27 = vld [vmem:[#allocation2 + $0x2e4] ss:$16 sps:$4 sm:$0xff]   ;;  %v3229_v30 = vld [vmem:[#allocation2 + $0x2ec] ss:$16 sps:$4 sm:$0xff]  }
  0x4f   : > { %v314_v55 = vcombine.low %v3676_v37, %v3643_v54 }
  0x50   : > { %2225 = vmatpush1.bf16.msra.mxu0 %v3140_v38  ;;  %2440 = vmatpush1.bf16.msra.mxu1 %v3141_v39  ;;  %v3174_v38 = vld [vmem:[#allocation2 + $0x1ec] ss:$16 sps:$4 sm:$0xff]   ;;  %v2729_v39 = vcombine.low %v264_v29, %v305_v32 }
  0x51   : > { %2226 = vmatprep.subr.bf16.mxu0 %v3142_v40  ;;  %2441 = vmatprep.subr.bf16.mxu1 %v3144_v41  ;;  %v249_v40 = vcombine.low %v191_v17, %v207_v33  ;;  %v678_v41 = vrot.slane %v2727_v36, %v3663_v16  ;;  %v274_v17 = vcombine.low %v207_v33, %v3640_v53  ;;  %v3223_v53 = vld [vmem:[#allocation2 + $0x2cc] ss:$16 sps:$4 sm:$0xff]   ;;  %v3227_v33 = vld [vmem:[#allocation2 + $0x2e8] ss:$16 sps:$4 sm:$0xff]   ;;  %v3232_v36 = vld [vmem:[#allocation2 + $0x304] ss:$16 sps:$4 sm:$0xff]  }
  0x52   : > { %v321_v54 = vrot.slane %v314_v55, %v3663_v16  ;;  %v3268_v55 = vld [vmem:[#allocation2 + $0x3c4] ss:$16 sps:$4 sm:$0xff]  }
  0x53   : > { %v257_v45 = vrot.slane %v249_v40, %v3663_v16  ;;  %v288_v57 = vrot.slane %v274_v17, %v3663_v16  ;;  %v3235_v40 = vld [vmem:[#allocation2 + $0x30c] ss:$16 sps:$4 sm:$0xff]  }
  0x54   : > { %2227 = vmatpush1.bf16.msra.mxu0 %v3146_v42  ;;  %2442 = vmatpush1.bf16.msra.mxu1 %v3147_v43  ;;  %v290_v42 = vcombine.low %v198_v18, %v3676_v37  ;;  %v3176_v43 = vld [vmem:[#allocation2 + $0x1e0] ss:$16 sps:$4 sm:$0xff]   ;;  %v3217_v18 = vld [vmem:[#allocation2 + $0x2ac] ss:$16 sps:$4 sm:$0xff]  }
  0x55   : > { %2228 = vmatprep.subr.bf16.mxu0 %v3148_v44  ;;  %2443 = vmatprep.subr.bf16.mxu1 %v3150_v46  ;;  %v3683_v44 = vrot.slane %v2729_v39, %v3663_v16  ;;  %v3177_v46 = vld [vmem:[#allocation2 + $0x1e8] ss:$16 sps:$4 sm:$0xff]   ;;  %v2728_v29 = vcombine.low %v247_v52, %v288_v57  ;;  %v3265_v17 = vld [vmem:[#allocation2 + $0x3ac] ss:$16 sps:$4 sm:$0xff]   ;;  %v3274_v57 = vld [vmem:[#allocation2 + $0x3e4] ss:$16 sps:$4 sm:$0xff]  }
  0x56   : > { %v298_v48 = vrot.slane %v290_v42, %v3663_v16  ;;  %v3269_v52 = vld [vmem:[#allocation2 + $0x3c8] ss:$16 sps:$4 sm:$0xff]  }
  0x57   : > { %v700_v58 = vcombine.low %v678_v41, %v3683_v44  ;;  %v3717_v39 = vrot.slane %v2728_v29, %v3663_v16  ;;  %v3279_v29 = vld [vmem:[#allocation2 + $0x400] ss:$16 sps:$4 sm:$0xff]  }
  0x58   : > { %2229 = vmatpush1.bf16.msra.mxu0 %v3152_v49  ;;  %2444 = vmatpush1.bf16.msra.mxu1 %v3153_v50  ;;  %v701_v49 = vcombine.high %v678_v41, %v3683_v44  ;;  %v3187_v50 = vld [vmem:[#allocation2 + $0x20c] ss:$16 sps:$4 sm:$0xff]   ;;  %v3688_v51 = vcombine.low %v257_v45, %v298_v48 }
  0x59   : > { %2230 = vmatprep.subr.bf16.mxu0 %v3154_v56  ;;  %2445 = vmatprep.subr.bf16.mxu1 %v3156_v61  ;;  %v3182_v56 = vld [vmem:[#allocation2 + $0x200] ss:$16 sps:$4 sm:$0xff]   ;;  %v3190_v61 = vld [vmem:[#allocation2 + $0x224] ss:$16 sps:$4 sm:$0xff]  }
  0x5a   : > { %2238 = vmatprep.mubr.bf16.mxu0 %v701_v49  ;;  %2453 = vmatprep.mubr.bf16.mxu1 %v701_v49  ;;  %v3238_v49 = vld [vmem:[#allocation2 + $0x324] ss:$16 sps:$4 sm:$0xff]  }
  0x5c   : > { %2231 = vmatpush1.bf16.msra.mxu0 %v3158_v5  ;;  %2446 = vmatpush1.bf16.msra.mxu1 %v3159_v9  ;;  %v3202_v5 = vld [vmem:[#allocation2 + $0x264] ss:$16 sps:$4 sm:$0xff]  }
  0x5d   : > { %2232 = vmatprep.subr.bf16.mxu0 %v3160_v12  ;;  %2447 = vmatprep.subr.bf16.mxu1 %v3162_v13  ;;  %v3208_v9 = vld [vmem:[#allocation2 + $0x284] ss:$16 sps:$4 sm:$0xff]   ;;  %v3206_v12 = vld [vmem:[#allocation2 + $0x280] ss:$16 sps:$4 sm:$0xff]   ;;  %v3209_v13 = vld [vmem:[#allocation2 + $0x288] ss:$16 sps:$4 sm:$0xff]  }
  0x60   : > { %2233 = vmatpush1.bf16.msra.mxu0 %v3164_v19  ;;  %2448 = vmatpush1.bf16.msra.mxu1 %v3165_v22  ;;  %v3212_v19 = vld [vmem:[#allocation2 + $0x2a0] ss:$16 sps:$4 sm:$0xff]   ;;  %v3220_v22 = vld [vmem:[#allocation2 + $0x2c4] ss:$16 sps:$4 sm:$0xff]  }
  0x61   : > { %2234 = vmatprep.subr.bf16.mxu0 %v3166_v23  ;;  %2449 = vmatprep.subr.bf16.mxu1 %v3168_v26  ;;  %v3699_v23 = vrot.slane %v3655_v59, 1  ;;  %v3704_v26 = vld [vmem:[%s3633_s30 + $0x10] sm:$0x7] }
  0x62   : > { %v3709_v59 = vcombine.low %v3704_v26, %v3704_v26 }
  0x63   : > { %v347_v28 = vcombine.low %v3699_v23, %v3704_v26 }
  0x64   : > { %2235 = vmatpush1.bf16.msra.mxu0 %v3170_v31  ;;  %2450 = vmatpush1.bf16.msra.mxu1 %v3171_v34  ;;  %v3224_v31 = vld [vmem:[#allocation2 + $0x2e0] ss:$16 sps:$4 sm:$0xff]   ;;  %v214_v34 = vshrl.u32 %v3709_v59, 16  ;;  %v220_v42 = vrot.slane %v3709_v59, 1 }
  0x65   : > { %2236 = vmatprep.subr.bf16.mxu0 %v3172_v35  ;;  %2451 = vmatprep.subr.bf16.mxu1 %v3174_v38  ;;  %v354_v32 = vrot.slane %v347_v28, %v3663_v16  ;;  %v216_v35 = vshll.u32 %v3709_v59, 16  ;;  %v3284_v28 = vld [vmem:[#allocation2 + $0x40c] ss:$16 sps:$4 sm:$0xff]  }
  0x67   : > { %v2730_v38 = vcombine.low %v321_v54, %v354_v32  ;;  %v218_v41 = vrot.slane %v216_v35, 1  ;;  %v3275_v54 = vld [vmem:[#allocation2 + $0x3e8] ss:$16 sps:$4 sm:$0xff]   ;;  %v3287_v32 = vld [vmem:[#allocation2 + $0x424] ss:$16 sps:$4 sm:$0xff]  }
  0x68   : > { %2237 = vmatpush1.bf16.msra.mxu0 %v3176_v43  ;;  %2452 = vmatpush1.bf16.msra.mxu1 %v3177_v46  ;;  %v323_v43 = vcombine.low %v3665_v20, %v3699_v23  ;;  %v3230_v46 = vld [vmem:[#allocation2 + $0x300] ss:$16 sps:$4 sm:$0xff]   ;;  %v3288_v35 = vld [vmem:[#allocation2 + $0x428] ss:$16 sps:$4 sm:$0xff]  }
  0x69   : > { %2249 = vmatprep.subr.bf16.mxu0 %v3184_v47  ;;  %2464 = vmatprep.subr.bf16.mxu1 %v3187_v50  ;;  %v3723_v45 = vrot.slane %v2730_v38, %v3663_v16  ;;  %v3233_v47 = vld [vmem:[#allocation2 + $0x308] ss:$16 sps:$4 sm:$0xff]   ;;  %v3725_v48 = vor.u32 %v218_v41, %v214_v34  ;;  %v3285_v34 = vld [vmem:[#allocation2 + $0x420] ss:$16 sps:$4 sm:$0xff]   ;;  %v3296_v38 = vld [vmem:[#allocation2 + $0x44c] ss:$16 sps:$4 sm:$0xff]  }
  0x6a   : > { %v3299_v41 = vld [vmem:[#allocation2 + $0x464] ss:$16 sps:$4 sm:$0xff]  }
  0x6b   : > { %2239 = vmatmul.mubr.bf16.vlgmr.msra.gmra.mrb[0].mxu0 %v700_v58  ;;  %2454 = vmatmul.mubr.bf16.vlgmr.msra.gmra.mrb[0].mxu1 %v700_v58  ;;  %v703_v50 = vcombine.high %v3717_v39, %v3723_v45  ;;  %v331_v58 = vrot.slane %v323_v43, %v3663_v16  ;;  %v356_v20 = vcombine.low %v3725_v48, %v220_v42  ;;  %v3302_v43 = vld [vmem:[#allocation2 + $0x46c] ss:$16 sps:$4 sm:$0xff]  }
  0x6c   : > { %2250 = vmatpush1.bf16.msra.mxu0 %v3182_v56  ;;  %2465 = vmatpush1.bf16.msra.mxu1 %v3185_v60  ;;  %v3241_v56 = vld [vmem:[#allocation2 + $0x32c] ss:$16 sps:$4 sm:$0xff]   ;;  %v3236_v60 = vld [vmem:[#allocation2 + $0x320] ss:$16 sps:$4 sm:$0xff]  }
  0x6d   : > { %2251 = vmatprep.subr.bf16.mxu0 %v3190_v61  ;;  %2466 = vmatprep.subr.bf16.mxu1 %v3193_v62  ;;  %v3239_v61 = vld [vmem:[#allocation2 + $0x328] ss:$16 sps:$4 sm:$0xff]   ;;  %v364_v62 = vrot.slane %v356_v20, %v3663_v16  ;;  %v3314_v20 = vld [vmem:[#allocation2 + $0x4ac] ss:$16 sps:$4 sm:$0xff]  }
  0x6e   : > { %2281 = vmatprep.mubr.bf16.mxu0 %v703_v50  ;;  %2496 = vmatprep.mubr.bf16.mxu1 %v703_v50  ;;  %v3303_v50 = vld [vmem:[#allocation2 + $0x480] ss:$16 sps:$4 sm:$0xff]  }
  0x70   : > { %2252 = vmatpush1.bf16.msra.mxu0 %v3188_v63  ;;  %2467 = vmatpush1.bf16.msra.mxu1 %v3191_v0  ;;  %v3244_v63 = vld [vmem:[#allocation2 + $0x344] ss:$16 sps:$4 sm:$0xff]   ;;  %v3247_v0 = vld [vmem:[#allocation2 + $0x34c] ss:$16 sps:$4 sm:$0xff]  }
  0x71   : > { %2253 = vmatprep.subr.bf16.mxu0 %v3196_v1  ;;  %2468 = vmatprep.subr.bf16.mxu1 %v3199_v2  ;;  %v2733_v1 = vcombine.low %v331_v58, %v364_v62  ;;  %v714_v2 = vrot.slane %v3688_v51, %v3663_v16  ;;  %v3259_v51 = vld [vmem:[#allocation2 + $0x38c] ss:$16 sps:$4 sm:$0xff]   ;;  %v3311_v58 = vld [vmem:[#allocation2 + $0x4a4] ss:$16 sps:$4 sm:$0xff]  }
  0x72   : > { %v3317_v62 = vld [vmem:[#allocation2 + $0x4c4] ss:$16 sps:$4 sm:$0xff]  }
  0x74   : > { %2254 = vmatpush1.bf16.msra.mxu0 %v3194_v3  ;;  %2469 = vmatpush1.bf16.msra.mxu1 %v3197_v4  ;;  %v3242_v3 = vld [vmem:[#allocation2 + $0x340] ss:$16 sps:$4 sm:$0xff]   ;;  %v3245_v4 = vld [vmem:[#allocation2 + $0x348] ss:$16 sps:$4 sm:$0xff]  }
  0x75   : > { %2255 = vmatprep.subr.bf16.mxu0 %v3202_v5  ;;  %2470 = vmatprep.subr.bf16.mxu1 %v3205_v6  ;;  %v728_v5 = vrot.slane %v2733_v1, %v3663_v16  ;;  %v3250_v6 = vld [vmem:[#allocation2 + $0x364] ss:$16 sps:$4 sm:$0xff]   ;;  %v3318_v1 = vld [vmem:[#allocation2 + $0x4c8] ss:$16 sps:$4 sm:$0xff]  }
  0x78   : > { %2256 = vmatpush1.bf16.msra.mxu0 %v3200_v7  ;;  %2471 = vmatpush1.bf16.msra.mxu1 %v3203_v8  ;;  %v3253_v7 = vld [vmem:[#allocation2 + $0x36c] ss:$16 sps:$4 sm:$0xff]   ;;  %v737_v8 = vcombine.high %v714_v2, %v728_v5 }
  0x79   : > { %2257 = vmatprep.subr.bf16.mxu0 %v3208_v9  ;;  %2472 = vmatprep.subr.bf16.mxu1 %v3211_v11  ;;  %v3737_v9 = vcombine.low %v714_v2, %v728_v5  ;;  %v3251_v11 = vld [vmem:[#allocation2 + $0x368] ss:$16 sps:$4 sm:$0xff]   ;;  %v3323_v2 = vld [vmem:[#allocation2 + $0x4e4] ss:$16 sps:$4 sm:$0xff]  }
  0x7a   : > { %v3324_v5 = vld [vmem:[#allocation2 + $0x4e8] ss:$16 sps:$4 sm:$0xff]  }
  0x7c   : > { %2258 = vmatpush1.bf16.msra.mxu0 %v3206_v12  ;;  %2473 = vmatpush1.bf16.msra.mxu1 %v3209_v13  ;;  %v3256_v12 = vld [vmem:[#allocation2 + $0x384] ss:$16 sps:$4 sm:$0xff]   ;;  %v3254_v13 = vld [vmem:[#allocation2 + $0x380] ss:$16 sps:$4 sm:$0xff]  }
  0x7d   : > { %2259 = vmatprep.subr.bf16.mxu0 %v3214_v14  ;;  %2474 = vmatprep.subr.bf16.mxu1 %v3217_v18  ;;  %v3257_v14 = vld [vmem:[#allocation2 + $0x388] ss:$16 sps:$4 sm:$0xff]   ;;  %v3260_v18 = vld [vmem:[#allocation2 + $0x3a0] ss:$16 sps:$4 sm:$0xff]  }
  0x80   : > { %2260 = vmatpush1.bf16.msra.mxu0 %v3212_v19  ;;  %2475 = vmatpush1.bf16.msra.mxu1 %v3215_v21  ;;  %v3263_v19 = vld [vmem:[#allocation2 + $0x3a8] ss:$16 sps:$4 sm:$0xff]   ;;  %v3271_v21 = vld [vmem:[#allocation2 + $0x3cc] ss:$16 sps:$4 sm:$0xff]  }
  0x81   : > { %2261 = vmatprep.subr.bf16.mxu0 %v3220_v22  ;;  %2476 = vmatprep.subr.bf16.mxu1 %v3223_v53  ;;  %v3266_v22 = vld [vmem:[#allocation2 + $0x3c0] ss:$16 sps:$4 sm:$0xff]   ;;  %v3277_v53 = vld [vmem:[#allocation2 + $0x3ec] ss:$16 sps:$4 sm:$0xff]  }
  0x84   : > { %2262 = vmatpush1.bf16.msra.mxu0 %v3218_v24  ;;  %2477 = vmatpush1.bf16.msra.mxu1 %v3221_v25  ;;  %v324_v24 = vcombine.low %v3704_v26, %v3725_v48  ;;  %v3272_v25 = vld [vmem:[#allocation2 + $0x3e0] ss:$16 sps:$4 sm:$0xff]   ;;  %v3377_v26 = vld [vmem:[#allocation2 + $0x604] ss:$16 sps:$4 sm:$0xff]   ;;  %v3380_v48 = vld [vmem:[#allocation2 + $0x60c] ss:$16 sps:$4 sm:$0xff]  }
  0x85   : > { %2263 = vmatprep.subr.bf16.mxu0 %v3226_v27  ;;  %2478 = vmatprep.subr.bf16.mxu1 %v3229_v30  ;;  %v3281_v27 = vld [vmem:[#allocation2 + $0x404] ss:$16 sps:$4 sm:$0xff]   ;;  %v3282_v30 = vld [vmem:[#allocation2 + $0x408] ss:$16 sps:$4 sm:$0xff]  }
  0x86   : > { %v338_v59 = vrot.slane %v324_v24, %v3663_v16 }
  0x88   : > { %2264 = vmatpush1.bf16.msra.mxu0 %v3224_v31  ;;  %2479 = vmatpush1.bf16.msra.mxu1 %v3227_v33  ;;  %v702_v31 = vcombine.low %v3717_v39, %v3723_v45  ;;  %v3290_v33 = vld [vmem:[#allocation2 + $0x42c] ss:$16 sps:$4 sm:$0xff]   ;;  %v3294_v39 = vld [vmem:[#allocation2 + $0x448] ss:$16 sps:$4 sm:$0xff]   ;;  %v3297_v45 = vld [vmem:[#allocation2 + $0x460] ss:$16 sps:$4 sm:$0xff]  }
  0x89   : > { %2265 = vmatprep.subr.bf16.mxu0 %v3232_v36  ;;  %2480 = vmatprep.subr.bf16.mxu1 %v3235_v40  ;;  %v3293_v36 = vld [vmem:[#allocation2 + $0x444] ss:$16 sps:$4 sm:$0xff]   ;;  %v3291_v40 = vld [vmem:[#allocation2 + $0x440] ss:$16 sps:$4 sm:$0xff]  }
  0x8c   : > { %2266 = vmatpush1.bf16.msra.mxu0 %v3230_v46  ;;  %2481 = vmatpush1.bf16.msra.mxu1 %v3233_v47  ;;  %v3300_v46 = vld [vmem:[#allocation2 + $0x468] ss:$16 sps:$4 sm:$0xff]   ;;  %v3305_v47 = vld [vmem:[#allocation2 + $0x484] ss:$16 sps:$4 sm:$0xff]  }
  0x8d   : > { %2267 = vmatprep.subr.bf16.mxu0 %v3238_v49  ;;  %2482 = vmatprep.subr.bf16.mxu1 %v3241_v56  ;;  %v3308_v49 = vld [vmem:[#allocation2 + $0x48c] ss:$16 sps:$4 sm:$0xff]   ;;  %v3306_v56 = vld [vmem:[#allocation2 + $0x488] ss:$16 sps:$4 sm:$0xff]  }
  0x90   : > { %2268 = vmatpush1.bf16.msra.mxu0 %v3236_v60  ;;  %2483 = vmatpush1.bf16.msra.mxu1 %v3239_v61  ;;  %v3309_v60 = vld [vmem:[#allocation2 + $0x4a0] ss:$16 sps:$4 sm:$0xff]   ;;  %v3312_v61 = vld [vmem:[#allocation2 + $0x4a8] ss:$16 sps:$4 sm:$0xff]  }
  0x91   : > { %2269 = vmatprep.subr.bf16.mxu0 %v3244_v63  ;;  %2484 = vmatprep.subr.bf16.mxu1 %v3247_v0  ;;  %v3320_v63 = vld [vmem:[#allocation2 + $0x4cc] ss:$16 sps:$4 sm:$0xff]   ;;  %v3315_v0 = vld [vmem:[#allocation2 + $0x4c0] ss:$16 sps:$4 sm:$0xff]  }
  0x94   : > { %2270 = vmatpush1.bf16.msra.mxu0 %v3242_v3  ;;  %2485 = vmatpush1.bf16.msra.mxu1 %v3245_v4  ;;  %v3326_v3 = vld [vmem:[#allocation2 + $0x4ec] ss:$16 sps:$4 sm:$0xff]   ;;  %v3321_v4 = vld [vmem:[#allocation2 + $0x4e0] ss:$16 sps:$4 sm:$0xff]  }
  0x95   : > { %2271 = vmatprep.subr.bf16.mxu0 %v3250_v6  ;;  %2486 = vmatprep.subr.bf16.mxu1 %v3253_v7  ;;  %v3329_v6 = vld [vmem:[#allocation2 + $0x504] ss:$16 sps:$4 sm:$0xff]   ;;  %v3332_v7 = vld [vmem:[#allocation2 + $0x50c] ss:$16 sps:$4 sm:$0xff]  }
  0x98   : > { %2272 = vmatpush1.bf16.msra.mxu0 %v3248_v10  ;;  %2487 = vmatpush1.bf16.msra.mxu1 %v3251_v11  ;;  %v3330_v10 = vld [vmem:[#allocation2 + $0x508] ss:$16 sps:$4 sm:$0xff]   ;;  %v3335_v11 = vld [vmem:[#allocation2 + $0x524] ss:$16 sps:$4 sm:$0xff]  }
  0x99   : > { %2273 = vmatprep.subr.bf16.mxu0 %v3256_v12  ;;  %2488 = vmatprep.subr.bf16.mxu1 %v3259_v51  ;;  %v3338_v12 = vld [vmem:[#allocation2 + $0x52c] ss:$16 sps:$4 sm:$0xff]   ;;  %v3333_v51 = vld [vmem:[#allocation2 + $0x520] ss:$16 sps:$4 sm:$0xff]  }
  0x9c   : > { %2274 = vmatpush1.bf16.msra.mxu0 %v3254_v13  ;;  %2489 = vmatpush1.bf16.msra.mxu1 %v3257_v14  ;;  %v3336_v13 = vld [vmem:[#allocation2 + $0x528] ss:$16 sps:$4 sm:$0xff]   ;;  %v3341_v14 = vld [vmem:[#allocation2 + $0x544] ss:$16 sps:$4 sm:$0xff]  }
  0x9d   : > { %2275 = vmatprep.subr.bf16.mxu0 %v3262_v15  ;;  %2490 = vmatprep.subr.bf16.mxu1 %v3265_v17  ;;  %v3344_v15 = vld [vmem:[#allocation2 + $0x54c] ss:$16 sps:$4 sm:$0xff]   ;;  %v3339_v17 = vld [vmem:[#allocation2 + $0x540] ss:$16 sps:$4 sm:$0xff]  }
  0xa0   : > { %2276 = vmatpush1.bf16.msra.mxu0 %v3260_v18  ;;  %2491 = vmatpush1.bf16.msra.mxu1 %v3263_v19  ;;  %v3342_v18 = vld [vmem:[#allocation2 + $0x548] ss:$16 sps:$4 sm:$0xff]   ;;  %v3347_v19 = vld [vmem:[#allocation2 + $0x564] ss:$16 sps:$4 sm:$0xff]  }
  0xa1   : > { %2277 = vmatprep.subr.bf16.mxu0 %v3268_v55  ;;  %2492 = vmatprep.subr.bf16.mxu1 %v3271_v21  ;;  %v3350_v55 = vld [vmem:[#allocation2 + $0x56c] ss:$16 sps:$4 sm:$0xff]   ;;  %v3345_v21 = vld [vmem:[#allocation2 + $0x560] ss:$16 sps:$4 sm:$0xff]  }
  0xa4   : > { %2278 = vmatpush1.bf16.msra.mxu0 %v3266_v22  ;;  %2493 = vmatpush1.bf16.msra.mxu1 %v3269_v52  ;;  %v3348_v22 = vld [vmem:[#allocation2 + $0x568] ss:$16 sps:$4 sm:$0xff]   ;;  %v3353_v52 = vld [vmem:[#allocation2 + $0x584] ss:$16 sps:$4 sm:$0xff]  }
  0xa5   : > { %2279 = vmatprep.subr.bf16.mxu0 %v3274_v57  ;;  %2494 = vmatprep.subr.bf16.mxu1 %v3277_v53  ;;  %v3356_v57 = vld [vmem:[#allocation2 + $0x58c] ss:$16 sps:$4 sm:$0xff]   ;;  %v165_v53 = vld [vmem:[%s3633_s30 + $0x14] sm:$0x7] }
  0xa8   : > { %2280 = vmatpush1.bf16.msra.mxu0 %v3272_v25  ;;  %2495 = vmatpush1.bf16.msra.mxu1 %v3275_v54  ;;  %v2726_v25 = vcombine.low %v165_v53, %v165_v53  ;;  %v3351_v54 = vld [vmem:[#allocation2 + $0x580] ss:$16 sps:$4 sm:$0xff]  }
  0xa9   : > { %2292 = vmatprep.subr.bf16.mxu0 %v3281_v27  ;;  %2507 = vmatprep.subr.bf16.mxu1 %v3284_v28  ;;  %v3354_v27 = vld [vmem:[#allocation2 + $0x588] ss:$16 sps:$4 sm:$0xff]  }
  0xaa   : > { %v225_v28 = vshrl.u32 %v2726_v25, 16 }
  0xab   : > { %2282 = vmatmul.mubr.bf16.vlgmr.msra.gmra.mrb[0].mxu0 %v702_v31  ;;  %2497 = vmatmul.mubr.bf16.vlgmr.msra.gmra.mrb[0].mxu1 %v702_v31  ;;  %v3362_v31 = vld [vmem:[#allocation2 + $0x5ac] ss:$16 sps:$4 sm:$0xff]  }
  0xac   : > { %2293 = vmatpush1.bf16.msra.mxu0 %v3279_v29  ;;  %2508 = vmatpush1.bf16.msra.mxu1 %v3282_v30  ;;  %v227_v29 = vshll.u32 %v2726_v25, 16  ;;  %v3359_v30 = vld [vmem:[#allocation2 + $0x5a4] ss:$16 sps:$4 sm:$0xff]  }
  0xad   : > { %2294 = vmatprep.subr.bf16.mxu0 %v3287_v32  ;;  %2509 = vmatprep.subr.bf16.mxu1 %v3290_v33  ;;  %v231_v32 = vrot.slane %v2726_v25, 1  ;;  %v3747_v33 = vrot.slane %v220_v42, %v3663_v16  ;;  %v3420_v25 = vld [vmem:[#allocation2 + $0x6e8] ss:$16 sps:$4 sm:$0xff]  }
  0xae   : > { %2324 = vmatprep.mubr.bf16.mxu0 %v737_v8  ;;  %2539 = vmatprep.mubr.bf16.mxu1 %v737_v8  ;;  %v3327_v8 = vld [vmem:[#allocation2 + $0x500] ss:$16 sps:$4 sm:$0xff]  }
  0xb0   : > { %2295 = vmatpush1.bf16.msra.mxu0 %v3285_v34  ;;  %2510 = vmatpush1.bf16.msra.mxu1 %v3288_v35  ;;  %v229_v34 = vrot.slane %v227_v29, 1  ;;  %v3357_v35 = vld [vmem:[#allocation2 + $0x5a0] ss:$16 sps:$4 sm:$0xff]   ;;  %v3426_v29 = vld [vmem:[#allocation2 + $0x708] ss:$16 sps:$4 sm:$0xff]  }
  0xb1   : > { %2296 = vmatprep.subr.bf16.mxu0 %v3293_v36  ;;  %2511 = vmatprep.subr.bf16.mxu1 %v3296_v38  ;;  %v3750_v36 = vrot.slane %v231_v32, %v3663_v16  ;;  %v3360_v38 = vld [vmem:[#allocation2 + $0x5a8] ss:$16 sps:$4 sm:$0xff]   ;;  %v3429_v32 = vld [vmem:[#allocation2 + $0x720] ss:$16 sps:$4 sm:$0xff]  }
  0xb4   : > { %2297 = vmatpush1.bf16.msra.mxu0 %v3291_v40  ;;  %2512 = vmatpush1.bf16.msra.mxu1 %v3294_v39  ;;  %v230_v40 = vor.u32 %v229_v34, %v225_v28  ;;  %v3365_v39 = vld [vmem:[#allocation2 + $0x5c4] ss:$16 sps:$4 sm:$0xff]   ;;  %v3423_v28 = vld [vmem:[#allocation2 + $0x700] ss:$16 sps:$4 sm:$0xff]   ;;  %v3432_v34 = vld [vmem:[#allocation2 + $0x728] ss:$16 sps:$4 sm:$0xff]  }
  0xb5   : > { %2298 = vmatprep.subr.bf16.mxu0 %v3299_v41  ;;  %2513 = vmatprep.subr.bf16.mxu1 %v3302_v43  ;;  %v3368_v41 = vld [vmem:[#allocation2 + $0x5cc] ss:$16 sps:$4 sm:$0xff]   ;;  %v741_v43 = vcombine.low %v3747_v33, %v3750_v36 }
  0xb6   : > { %v357_v42 = vcombine.low %v165_v53, %v230_v40  ;;  %v3417_v53 = vld [vmem:[#allocation2 + $0x6e0] ss:$16 sps:$4 sm:$0xff]  }
  0xb7   : > { %v3435_v40 = vld [vmem:[#allocation2 + $0x740] ss:$16 sps:$4 sm:$0xff]  }
  0xb8   : > { %2299 = vmatpush1.bf16.msra.mxu0 %v3297_v45  ;;  %2514 = vmatpush1.bf16.msra.mxu1 %v3300_v46  ;;  %v3363_v45 = vld [vmem:[#allocation2 + $0x5c0] ss:$16 sps:$4 sm:$0xff]   ;;  %v3366_v46 = vld [vmem:[#allocation2 + $0x5c8] ss:$16 sps:$4 sm:$0xff]  }
  0xb9   : > { %2300 = vmatprep.subr.bf16.mxu0 %v3305_v47  ;;  %2515 = vmatprep.subr.bf16.mxu1 %v3308_v49  ;;  %v371_v47 = vrot.slane %v357_v42, %v3663_v16  ;;  %v3371_v49 = vld [vmem:[#allocation2 + $0x5e4] ss:$16 sps:$4 sm:$0xff]   ;;  %v3441_v42 = vld [vmem:[#allocation2 + $0x760] ss:$16 sps:$4 sm:$0xff]  }
  0xbc   : > { %2301 = vmatpush1.bf16.msra.mxu0 %v3303_v50  ;;  %2516 = vmatpush1.bf16.msra.mxu1 %v3306_v56  ;;  %v3374_v50 = vld [vmem:[#allocation2 + $0x5ec] ss:$16 sps:$4 sm:$0xff]   ;;  %v2734_v56 = vcombine.low %v338_v59, %v371_v47 }
  0xbd   : > { %2302 = vmatprep.subr.bf16.mxu0 %v3311_v58  ;;  %2517 = vmatprep.subr.bf16.mxu1 %v3314_v20  ;;  %v3369_v58 = vld [vmem:[#allocation2 + $0x5e0] ss:$16 sps:$4 sm:$0xff]   ;;  %v3372_v20 = vld [vmem:[#allocation2 + $0x5e8] ss:$16 sps:$4 sm:$0xff]   ;;  %v3446_v59 = vld [vmem:[#allocation2 + $0x76c] ss:$16 sps:$4 sm:$0xff]  }
  0xbe   : > { %v3760_v24 = vrot.slane %v2734_v56, %v3663_v16  ;;  %v3452_v47 = vld [vmem:[#allocation2 + $0x78c] ss:$16 sps:$4 sm:$0xff]   ;;  %v3455_v56 = vld [vmem:[#allocation2 + $0x7a4] ss:$16 sps:$4 sm:$0xff]  }
  0xc0   : > { %2303 = vmatpush1.bf16.msra.mxu0 %v3309_v60  ;;  %2518 = vmatpush1.bf16.msra.mxu1 %v3312_v61  ;;  %v3375_v60 = vld [vmem:[#allocation2 + $0x600] ss:$16 sps:$4 sm:$0xff]   ;;  %v3378_v61 = vld [vmem:[#allocation2 + $0x608] ss:$16 sps:$4 sm:$0xff]  }
  0xc1   : > { %2304 = vmatprep.subr.bf16.mxu0 %v3317_v62  ;;  %2519 = vmatprep.subr.bf16.mxu1 %v3320_v63  ;;  %v3383_v62 = vld [vmem:[#allocation2 + $0x624] ss:$16 sps:$4 sm:$0xff]   ;;  %v3386_v63 = vld [vmem:[#allocation2 + $0x62c] ss:$16 sps:$4 sm:$0xff]  }
  0xc4   : > { %2305 = vmatpush1.bf16.msra.mxu0 %v3315_v0  ;;  %2520 = vmatpush1.bf16.msra.mxu1 %v3318_v1  ;;  %v739_v0 = vcombine.high %v3683_v44, %v3760_v24  ;;  %v3381_v1 = vld [vmem:[#allocation2 + $0x620] ss:$16 sps:$4 sm:$0xff]  }
  0xc5   : > { %2306 = vmatprep.subr.bf16.mxu0 %v3323_v2  ;;  %2521 = vmatprep.subr.bf16.mxu1 %v3326_v3  ;;  %v3384_v2 = vld [vmem:[#allocation2 + $0x628] ss:$16 sps:$4 sm:$0xff]   ;;  %v3389_v3 = vld [vmem:[#allocation2 + $0x644] ss:$16 sps:$4 sm:$0xff]  }
  0xc8   : > { %2307 = vmatpush1.bf16.msra.mxu0 %v3321_v4  ;;  %2522 = vmatpush1.bf16.msra.mxu1 %v3324_v5  ;;  %v3392_v4 = vld [vmem:[#allocation2 + $0x64c] ss:$16 sps:$4 sm:$0xff]   ;;  %v3387_v5 = vld [vmem:[#allocation2 + $0x640] ss:$16 sps:$4 sm:$0xff]  }
  0xc9   : > { %2308 = vmatprep.subr.bf16.mxu0 %v3329_v6  ;;  %2523 = vmatprep.subr.bf16.mxu1 %v3332_v7  ;;  %v3390_v6 = vld [vmem:[#allocation2 + $0x648] ss:$16 sps:$4 sm:$0xff]   ;;  %v3395_v7 = vld [vmem:[#allocation2 + $0x664] ss:$16 sps:$4 sm:$0xff]  }
  0xcc   : > { %2309 = vmatpush1.bf16.msra.mxu0 %v3327_v8  ;;  %2524 = vmatpush1.bf16.msra.mxu1 %v3330_v10  ;;  %v3398_v8 = vld [vmem:[#allocation2 + $0x66c] ss:$16 sps:$4 sm:$0xff]   ;;  %v3396_v10 = vld [vmem:[#allocation2 + $0x668] ss:$16 sps:$4 sm:$0xff]  }
  0xcd   : > { %2310 = vmatprep.subr.bf16.mxu0 %v3335_v11  ;;  %2525 = vmatprep.subr.bf16.mxu1 %v3338_v12  ;;  %v3401_v11 = vld [vmem:[#allocation2 + $0x684] ss:$16 sps:$4 sm:$0xff]   ;;  %v3404_v12 = vld [vmem:[#allocation2 + $0x68c] ss:$16 sps:$4 sm:$0xff]  }
  0xd0   : > { %2311 = vmatpush1.bf16.msra.mxu0 %v3333_v51  ;;  %2526 = vmatpush1.bf16.msra.mxu1 %v3336_v13  ;;  %v3399_v51 = vld [vmem:[#allocation2 + $0x680] ss:$16 sps:$4 sm:$0xff]   ;;  %v3402_v13 = vld [vmem:[#allocation2 + $0x688] ss:$16 sps:$4 sm:$0xff]  }
  0xd1   : > { %2312 = vmatprep.subr.bf16.mxu0 %v3341_v14  ;;  %2527 = vmatprep.subr.bf16.mxu1 %v3344_v15  ;;  %v3407_v14 = vld [vmem:[#allocation2 + $0x6a4] ss:$16 sps:$4 sm:$0xff]   ;;  %v3410_v15 = vld [vmem:[#allocation2 + $0x6ac] ss:$16 sps:$4 sm:$0xff]  }
  0xd4   : > { %2313 = vmatpush1.bf16.msra.mxu0 %v3339_v17  ;;  %2528 = vmatpush1.bf16.msra.mxu1 %v3342_v18  ;;  %v3405_v17 = vld [vmem:[#allocation2 + $0x6a0] ss:$16 sps:$4 sm:$0xff]   ;;  %v3408_v18 = vld [vmem:[#allocation2 + $0x6a8] ss:$16 sps:$4 sm:$0xff]  }
  0xd5   : > { %2314 = vmatprep.subr.bf16.mxu0 %v3347_v19  ;;  %2529 = vmatprep.subr.bf16.mxu1 %v3350_v55  ;;  %v3413_v19 = vld [vmem:[#allocation2 + $0x6c4] ss:$16 sps:$4 sm:$0xff]   ;;  %v3416_v55 = vld [vmem:[#allocation2 + $0x6cc] ss:$16 sps:$4 sm:$0xff]  }
  0xd8   : > { %2315 = vmatpush1.bf16.msra.mxu0 %v3345_v21  ;;  %2530 = vmatpush1.bf16.msra.mxu1 %v3348_v22  ;;  %v3411_v21 = vld [vmem:[#allocation2 + $0x6c0] ss:$16 sps:$4 sm:$0xff]   ;;  %v3414_v22 = vld [vmem:[#allocation2 + $0x6c8] ss:$16 sps:$4 sm:$0xff]  }
  0xd9   : > { %2316 = vmatprep.subr.bf16.mxu0 %v3353_v52  ;;  %2531 = vmatprep.subr.bf16.mxu1 %v3356_v57  ;;  %v3419_v52 = vld [vmem:[#allocation2 + $0x6e4] ss:$16 sps:$4 sm:$0xff]   ;;  %v3422_v57 = vld [vmem:[#allocation2 + $0x6ec] ss:$16 sps:$4 sm:$0xff]  }
  0xdc   : > { %2317 = vmatpush1.bf16.msra.mxu0 %v3351_v54  ;;  %2532 = vmatpush1.bf16.msra.mxu1 %v3354_v27  ;;  %v3425_v54 = vld [vmem:[#allocation2 + $0x704] ss:$16 sps:$4 sm:$0xff]   ;;  %v3428_v27 = vld [vmem:[#allocation2 + $0x70c] ss:$16 sps:$4 sm:$0xff]  }
  0xdd   : > { %2318 = vmatprep.subr.bf16.mxu0 %v3359_v30  ;;  %2533 = vmatprep.subr.bf16.mxu1 %v3362_v31  ;;  %v3431_v30 = vld [vmem:[#allocation2 + $0x724] ss:$16 sps:$4 sm:$0xff]   ;;  %v3434_v31 = vld [vmem:[#allocation2 + $0x72c] ss:$16 sps:$4 sm:$0xff]  }
  0xe0   : > { %2319 = vmatpush1.bf16.msra.mxu0 %v3357_v35  ;;  %2534 = vmatpush1.bf16.msra.mxu1 %v3360_v38  ;;  %v3437_v35 = vld [vmem:[#allocation2 + $0x744] ss:$16 sps:$4 sm:$0xff]   ;;  %v3440_v38 = vld [vmem:[#allocation2 + $0x74c] ss:$16 sps:$4 sm:$0xff]  }
  0xe1   : > { %2320 = vmatprep.subr.bf16.mxu0 %v3365_v39  ;;  %2535 = vmatprep.subr.bf16.mxu1 %v3368_v41  ;;  %v3438_v39 = vld [vmem:[#allocation2 + $0x748] ss:$16 sps:$4 sm:$0xff]   ;;  %v3443_v41 = vld [vmem:[#allocation2 + $0x764] ss:$16 sps:$4 sm:$0xff]  }
  0xe4   : > { %2321 = vmatpush1.bf16.msra.mxu0 %v3363_v45  ;;  %2536 = vmatpush1.bf16.msra.mxu1 %v3366_v46  ;;  %v3444_v45 = vld [vmem:[#allocation2 + $0x768] ss:$16 sps:$4 sm:$0xff]   ;;  %v3449_v46 = vld [vmem:[#allocation2 + $0x784] ss:$16 sps:$4 sm:$0xff]  }
  0xe5   : > { %2322 = vmatprep.subr.bf16.mxu0 %v3371_v49  ;;  %2537 = vmatprep.subr.bf16.mxu1 %v3374_v50  ;;  %v3447_v49 = vld [vmem:[#allocation2 + $0x780] ss:$16 sps:$4 sm:$0xff]   ;;  %v3450_v50 = vld [vmem:[#allocation2 + $0x788] ss:$16 sps:$4 sm:$0xff]  }
  0xe8   : > { %2323 = vmatpush1.bf16.msra.mxu0 %v3369_v58  ;;  %2538 = vmatpush1.bf16.msra.mxu1 %v3372_v20  ;;  %v3458_v58 = vld [vmem:[#allocation2 + $0x7ac] ss:$16 sps:$4 sm:$0xff]   ;;  %v3453_v20 = vld [vmem:[#allocation2 + $0x7a0] ss:$16 sps:$4 sm:$0xff]  }
  0xe9   : > { %2335 = vmatprep.subr.bf16.mxu0 %v3377_v26  ;;  %2550 = vmatprep.subr.bf16.mxu1 %v3380_v48  ;;  %v3456_v26 = vld [vmem:[#allocation2 + $0x7a8] ss:$16 sps:$4 sm:$0xff]   ;;  %v3461_v48 = vld [vmem:[#allocation2 + $0x7c4] ss:$16 sps:$4 sm:$0xff]  }
  0xeb   : > { %2325 = vmatmul.mubr.bf16.vlgmr.msra.gmra.mrb[0].mxu0 %v3737_v9  ;;  %2540 = vmatmul.mubr.bf16.vlgmr.msra.gmra.mrb[0].mxu1 %v3737_v9  ;;  %v3393_v9 = vld [vmem:[#allocation2 + $0x660] ss:$16 sps:$4 sm:$0xff]  }
  0xec   : > { %2336 = vmatpush1.bf16.msra.mxu0 %v3375_v60  ;;  %2551 = vmatpush1.bf16.msra.mxu1 %v3378_v61  ;;  %v3464_v60 = vld [vmem:[#allocation2 + $0x7cc] ss:$16 sps:$4 sm:$0xff]   ;;  %v3459_v61 = vld [vmem:[#allocation2 + $0x7c0] ss:$16 sps:$4 sm:$0xff]  }
  0xed   : > { %2337 = vmatprep.subr.bf16.mxu0 %v3383_v62  ;;  %2552 = vmatprep.subr.bf16.mxu1 %v3386_v63  ;;  %v3462_v62 = vld [vmem:[#allocation2 + $0x7c8] ss:$16 sps:$4 sm:$0xff]   ;;  %v3467_v63 = vld [vmem:[#allocation2 + $0x7e4] ss:$16 sps:$4 sm:$0xff]  }
  0xee   : > { %2367 = vmatprep.mubr.bf16.mxu0 %v739_v0  ;;  %2582 = vmatprep.mubr.bf16.mxu1 %v739_v0  ;;  %v3470_v0 = vld [vmem:[#allocation2 + $0x7ec] ss:$16 sps:$4 sm:$0xff]  }
  0xf0   : > { %2338 = vmatpush1.bf16.msra.mxu0 %v3381_v1  ;;  %2553 = vmatpush1.bf16.msra.mxu1 %v3384_v2  ;;  %v3465_v1 = vld [vmem:[#allocation2 + $0x7e0] ss:$16 sps:$4 sm:$0xff]   ;;  %v3468_v2 = vld [vmem:[#allocation2 + $0x7e8] ss:$16 sps:$4 sm:$0xff]  }
  0xf1   : > { %2339 = vmatprep.subr.bf16.mxu0 %v3389_v3  ;;  %2554 = vmatprep.subr.bf16.mxu1 %v3392_v4  ;;  %v3474_v3 = vld [vmem:[#allocation2 + $0x804] ss:$16 sps:$4 sm:$0xff]   ;;  %v3477_v4 = vld [vmem:[#allocation2 + $0x80c] ss:$16 sps:$4 sm:$0xff]  }
  0xf4   : > { %2340 = vmatpush1.bf16.msra.mxu0 %v3387_v5  ;;  %2555 = vmatpush1.bf16.msra.mxu1 %v3390_v6  ;;  %v738_v5 = vcombine.low %v3683_v44, %v3760_v24  ;;  %v3472_v6 = vld [vmem:[#allocation2 + $0x800] ss:$16 sps:$4 sm:$0xff]   ;;  %v3487_v24 = vld [vmem:[#allocation2 + $0x848] ss:$16 sps:$4 sm:$0xff]  }
  0xf5   : > { %2341 = vmatprep.subr.bf16.mxu0 %v3395_v7  ;;  %2556 = vmatprep.subr.bf16.mxu1 %v3398_v8  ;;  %v3475_v7 = vld [vmem:[#allocation2 + $0x808] ss:$16 sps:$4 sm:$0xff]   ;;  %v3480_v8 = vld [vmem:[#allocation2 + $0x824] ss:$16 sps:$4 sm:$0xff]   ;;  %v3484_v44 = vld [vmem:[#allocation2 + $0x840] ss:$16 sps:$4 sm:$0xff]  }
  0xf8   : > { %2342 = vmatpush1.bf16.msra.mxu0 %v3393_v9  ;;  %2557 = vmatpush1.bf16.msra.mxu1 %v3396_v10  ;;  %v3483_v9 = vld [vmem:[#allocation2 + $0x82c] ss:$16 sps:$4 sm:$0xff]   ;;  %v3478_v10 = vld [vmem:[#allocation2 + $0x820] ss:$16 sps:$4 sm:$0xff]  }
  0xf9   : > { %2343 = vmatprep.subr.bf16.mxu0 %v3401_v11  ;;  %2558 = vmatprep.subr.bf16.mxu1 %v3404_v12  ;;  %v3481_v11 = vld [vmem:[#allocation2 + $0x828] ss:$16 sps:$4 sm:$0xff]   ;;  %v3486_v12 = vld [vmem:[#allocation2 + $0x844] ss:$16 sps:$4 sm:$0xff]  }
  0xfc   : > { %2344 = vmatpush1.bf16.msra.mxu0 %v3399_v51  ;;  %2559 = vmatpush1.bf16.msra.mxu1 %v3402_v13  ;;  %v3489_v51 = vld [vmem:[#allocation2 + $0x84c] ss:$16 sps:$4 sm:$0xff]   ;;  %v3564_v13 = vmov 0  }
  0xfd   : > { %2345 = vmatprep.subr.bf16.mxu0 %v3407_v14  ;;  %2560 = vmatprep.subr.bf16.mxu1 %v3410_v15  ;;  %v3492_v14 = vld [vmem:[#allocation2 + $0x864] ss:$16 sps:$4 sm:$0xff]   ;;  %v3495_v15 = vld [vmem:[#allocation2 + $0x86c] ss:$16 sps:$4 sm:$0xff]  }
 0x100   : > { %2346 = vmatpush1.bf16.msra.mxu0 %v3405_v17  ;;  %2561 = vmatpush1.bf16.msra.mxu1 %v3408_v18  ;;  %v3490_v17 = vld [vmem:[#allocation2 + $0x860] ss:$16 sps:$4 sm:$0xff]   ;;  %v3493_v18 = vld [vmem:[#allocation2 + $0x868] ss:$16 sps:$4 sm:$0xff]  }
 0x101   : > { %2347 = vmatprep.subr.bf16.mxu0 %v3413_v19  ;;  %2562 = vmatprep.subr.bf16.mxu1 %v3416_v55  ;;  %v3498_v19 = vld [vmem:[#allocation2 + $0x884] ss:$16 sps:$4 sm:$0xff]   ;;  %v3501_v55 = vld [vmem:[#allocation2 + $0x88c] ss:$16 sps:$4 sm:$0xff]  }
 0x104   : > { %2348 = vmatpush1.bf16.msra.mxu0 %v3411_v21  ;;  %2563 = vmatpush1.bf16.msra.mxu1 %v3414_v22  ;;  %v3496_v21 = vld [vmem:[#allocation2 + $0x880] ss:$16 sps:$4 sm:$0xff]   ;;  %v3499_v22 = vld [vmem:[#allocation2 + $0x888] ss:$16 sps:$4 sm:$0xff]  }
 0x105   : > { %2349 = vmatprep.subr.bf16.mxu0 %v3419_v52  ;;  %2564 = vmatprep.subr.bf16.mxu1 %v3422_v57  ;;  %v3504_v52 = vld [vmem:[#allocation2 + $0x8a4] ss:$16 sps:$4 sm:$0xff]   ;;  %v3507_v57 = vld [vmem:[#allocation2 + $0x8ac] ss:$16 sps:$4 sm:$0xff]  }
 0x108   : > { %2350 = vmatpush1.bf16.msra.mxu0 %v3417_v53  ;;  %2565 = vmatpush1.bf16.msra.mxu1 %v3420_v25  ;;  %v272_v53 = vrot.slane %v3676_v37, %v3663_v16  ;;  %v313_v25 = vrot.slane %v3699_v23, %v3663_v16  ;;  %v3516_v37 = vld [vmem:[#allocation2 + $0x8e4] ss:$16 sps:$4 sm:$0xff]  }
 0x109   : > { %2351 = vmatprep.subr.bf16.mxu0 %v3425_v54  ;;  %2566 = vmatprep.subr.bf16.mxu1 %v3428_v27  ;;  %v3502_v54 = vld [vmem:[#allocation2 + $0x8a0] ss:$16 sps:$4 sm:$0xff]   ;;  %v3505_v27 = vld [vmem:[#allocation2 + $0x8a8] ss:$16 sps:$4 sm:$0xff]  }
 0x10c   : > { %2352 = vmatpush1.bf16.msra.mxu0 %v3423_v28  ;;  %2567 = vmatpush1.bf16.msra.mxu1 %v3426_v29  ;;  %v3510_v28 = vld [vmem:[#allocation2 + $0x8c4] ss:$16 sps:$4 sm:$0xff]   ;;  %v3513_v29 = vld [vmem:[#allocation2 + $0x8cc] ss:$16 sps:$4 sm:$0xff]  }
 0x10d   : > { %2353 = vmatprep.subr.bf16.mxu0 %v3431_v30  ;;  %2568 = vmatprep.subr.bf16.mxu1 %v3434_v31  ;;  %v740_v30 = vcombine.low %v272_v53, %v313_v25  ;;  %v3508_v31 = vld [vmem:[#allocation2 + $0x8c0] ss:$16 sps:$4 sm:$0xff]  }
 0x10f   : > { %v748_v23 = vrot.slane %v740_v30, %v3663_v16 }
 0x110   : > { %2354 = vmatpush1.bf16.msra.mxu0 %v3429_v32  ;;  %2569 = vmatpush1.bf16.msra.mxu1 %v3432_v34  ;;  %v3511_v32 = vld [vmem:[#allocation2 + $0x8c8] ss:$16 sps:$4 sm:$0xff]   ;;  %v3519_v34 = vld [vmem:[#allocation2 + $0x8ec] ss:$16 sps:$4 sm:$0xff]  }
 0x111   : > { %2355 = vmatprep.subr.bf16.mxu0 %v3437_v35  ;;  %2570 = vmatprep.subr.bf16.mxu1 %v3440_v38  ;;  %v755_v35 = vrot.slane %v741_v43, %v3663_v16  ;;  %v3514_v38 = vld [vmem:[#allocation2 + $0x8e0] ss:$16 sps:$4 sm:$0xff]  }
 0x114   : > { %2356 = vmatpush1.bf16.msra.mxu0 %v3435_v40  ;;  %2571 = vmatpush1.bf16.msra.mxu1 %v3438_v39  ;;  %v3517_v40 = vld [vmem:[#allocation2 + $0x8e8] ss:$16 sps:$4 sm:$0xff]   ;;  %v756_v39 = vcombine.low %v748_v23, %v755_v35 }
 0x115   : > { %2357 = vmatprep.subr.bf16.mxu0 %v3443_v41  ;;  %2572 = vmatprep.subr.bf16.mxu1 %v3446_v59 }
 0x118   : > { %2358 = vmatpush1.bf16.msra.mxu0 %v3441_v42  ;;  %2573 = vmatpush1.bf16.msra.mxu1 %v3444_v45 }
 0x119   : > { %2359 = vmatprep.subr.bf16.mxu0 %v3449_v46  ;;  %2574 = vmatprep.subr.bf16.mxu1 %v3452_v47 }
 0x11c   : > { %2360 = vmatpush1.bf16.msra.mxu0 %v3447_v49  ;;  %2575 = vmatpush1.bf16.msra.mxu1 %v3450_v50 }
 0x11d   : > { %2361 = vmatprep.subr.bf16.mxu0 %v3455_v56  ;;  %2576 = vmatprep.subr.bf16.mxu1 %v3458_v58 }
 0x120   : > { %2362 = vmatpush1.bf16.msra.mxu0 %v3453_v20  ;;  %2577 = vmatpush1.bf16.msra.mxu1 %v3456_v26 }
 0x121   : > { %2363 = vmatprep.subr.bf16.mxu0 %v3461_v48  ;;  %2578 = vmatprep.subr.bf16.mxu1 %v3464_v60 }
 0x124   : > { %2364 = vmatpush1.bf16.msra.mxu0 %v3459_v61  ;;  %2579 = vmatpush1.bf16.msra.mxu1 %v3462_v62 }
 0x125   : > { %2365 = vmatprep.subr.bf16.mxu0 %v3467_v63  ;;  %2580 = vmatprep.subr.bf16.mxu1 %v3470_v0 }
 0x128   : > { %2366 = vmatpush1.bf16.msra.mxu0 %v3465_v1  ;;  %2581 = vmatpush1.bf16.msra.mxu1 %v3468_v2 }
 0x129   : > { %2378 = vmatprep.subr.bf16.mxu0 %v3474_v3  ;;  %2593 = vmatprep.subr.bf16.mxu1 %v3477_v4 }
 0x12b   : > { %2368 = vmatmul.mubr.bf16.vlgmr.msra.gmra.mrb[0].mxu0 %v738_v5  ;;  %2583 = vmatmul.mubr.bf16.vlgmr.msra.gmra.mrb[0].mxu1 %v738_v5 }
 0x12c   : > { %2379 = vmatpush1.bf16.msra.mxu0 %v3472_v6  ;;  %2594 = vmatpush1.bf16.msra.mxu1 %v3475_v7 }
 0x12d   : > { %2380 = vmatprep.subr.bf16.mxu0 %v3480_v8  ;;  %2595 = vmatprep.subr.bf16.mxu1 %v3483_v9 }
 0x12e   : > { %2410 = vmatprep.mubr.bf16.mxu0 %v3564_v13  ;;  %2625 = vmatprep.mubr.bf16.mxu1 %v3564_v13 }
 0x130   : > { %2381 = vmatpush1.bf16.msra.mxu0 %v3478_v10  ;;  %2596 = vmatpush1.bf16.msra.mxu1 %v3481_v11 }
 0x131   : > { %2382 = vmatprep.subr.bf16.mxu0 %v3486_v12  ;;  %2597 = vmatprep.subr.bf16.mxu1 %v3489_v51 }
 0x134   : > { %2383 = vmatpush1.bf16.msra.mxu0 %v3484_v44  ;;  %2598 = vmatpush1.bf16.msra.mxu1 %v3487_v24 }
 0x135   : > { %2384 = vmatprep.subr.bf16.mxu0 %v3492_v14  ;;  %2599 = vmatprep.subr.bf16.mxu1 %v3495_v15 }
 0x138   : > { %2385 = vmatpush1.bf16.msra.mxu0 %v3490_v17  ;;  %2600 = vmatpush1.bf16.msra.mxu1 %v3493_v18 }
 0x139   : > { %2386 = vmatprep.subr.bf16.mxu0 %v3498_v19  ;;  %2601 = vmatprep.subr.bf16.mxu1 %v3501_v55 }
 0x13c   : > { %2387 = vmatpush1.bf16.msra.mxu0 %v3496_v21  ;;  %2602 = vmatpush1.bf16.msra.mxu1 %v3499_v22 }
 0x13d   : > { %2388 = vmatprep.subr.bf16.mxu0 %v3504_v52  ;;  %2603 = vmatprep.subr.bf16.mxu1 %v3507_v57 }
 0x140   : > { %2389 = vmatpush1.bf16.msra.mxu0 %v3502_v54  ;;  %2604 = vmatpush1.bf16.msra.mxu1 %v3505_v27 }
 0x141   : > { %2390 = vmatprep.subr.bf16.mxu0 %v3510_v28  ;;  %2605 = vmatprep.subr.bf16.mxu1 %v3513_v29 }
 0x144   : > { %2391 = vmatpush1.bf16.msra.mxu0 %v3508_v31  ;;  %2606 = vmatpush1.bf16.msra.mxu1 %v3511_v32 }
 0x145   : > { %2392 = vmatprep.subr.bf16.mxu0 %v3516_v37  ;;  %2607 = vmatprep.subr.bf16.mxu1 %v3519_v34 }
 0x148   : > { %2393 = vmatpush1.bf16.msra.mxu0 %v3514_v38  ;;  %2608 = vmatpush1.bf16.msra.mxu1 %v3517_v40 }
 0x14b   : > { %2411 = vmatmul.mubr.bf16.vlgmr.msra.gmra.mrb[0].mxu0 %v756_v39  ;;  %2626 = vmatmul.mubr.bf16.vlgmr.msra.gmra.mrb[0].mxu1 %v756_v39 }
 0x21e   : > { %v2412_v41 = vpop.f32.mrb[0].mxu0  ;;  %v2627_v59 = vpop.f32.mrb[0].mxu1 }
 0x21f   : > { %2636 = vst [vmem:[%s158_s6] sm:$0xff] %v2412_v41  ;;  %2638 = vst [vmem:[%s158_s6 + $0x10] sm:$0xff] %v2627_v59  ;;  %v2414_v16 = vpop.f32.mrb[1].mxu0  ;;  %v2629_v33 = vpop.f32.mrb[1].mxu1 }
 0x220   : > { %2637 = vst [vmem:[%s158_s6 + $0x8] sm:$0xff] %v2414_v16  ;;  %2639 = vst [vmem:[%s158_s6 + $0x18] sm:$0xff] %v2629_v33  ;;  %v2416_v36 = vpop.f32.mrb[2].mxu0  ;;  %v2631_v43 = vpop.f32.mrb[2].mxu1 }
 0x221   : > { %2640 = vst [vmem:[%s158_s6 + $0x20] sm:$0xff] %v2416_v36  ;;  %2642 = vst [vmem:[%s158_s6 + $0x30] sm:$0xff] %v2631_v43  ;;  %v2418_v42 = vpop.f32.mrb[3].mxu0  ;;  %v2633_v45 = vpop.f32.mrb[3].mxu1 }
 0x222   : > { %2641 = vst [vmem:[%s158_s6 + $0x28] sm:$0xff] %v2418_v42  ;;  %2643 = vst [vmem:[%s158_s6 + $0x38] sm:$0xff] %v2633_v45 }
 0x223 PF: > { %s13_s9 = sadd.s32 1, %s3558_s9  }
 0x224   : > { %p10_p3 = scmp.ge.s32.totalorder %s13_s9, 4  }
 0x226   :  { %12 = sbr.rel (!%p10_p3) target bundleno = 1 (0x1), region = 63 }
 0x22d   :  { %2665 = vsyncpa [#allocation3], 1 }
 0x22e   :  { %2667 = vsyncpa [#allocation3 + $0x1], 1 }

// kernel: generator_forward.26
= control target key start
LH: loop header
LB: loop body
LE: loop exit
PB: predicated region body
PF: predicated region fallthrough
CT: control target
= control target key end

     0   :  { %s642_s2 = inlined_call_operand.vmem [shape: bf16[128,128], index: 2, kind: input, shape index: {}]   ;;  %s643_s0 = inlined_call_operand.vmem [shape: f32[128,128], index: 0, kind: input, shape index: {}]   ;;  %s644_s1 = inlined_call_operand.vmem [shape: f32[1,128], index: 1, kind: input, shape index: {}]   ;;  %s645_s3 = inlined_call_operand.vmem [shape: f32[128,128], index: 3, kind: input, shape index: {}]   ;;  %s646_s4 = inlined_call_operand.vmem [shape: f32[128,128], index: 4, kind: output, shape index: {}]  }
   0x1   :  { %v415_v0 = vld [vmem:[%s642_s2] sm:$0xff]   ;;  %v416_v1 = vld [vmem:[%s642_s2 + $0x8] sm:$0xff]   ;;  %v417_v2 = vld [vmem:[%s642_s2 + $0x10] sm:$0xff]  }
   0x2   :  { %367 = vmatprep.subr.bf16.mxu0 %v415_v0  ;;  %399 = vmatprep.subr.bf16.mxu1 %v415_v0  ;;  %v418_v3 = vld [vmem:[%s642_s2 + $0x18] sm:$0xff]   ;;  %v18_v4 = vld [vmem:[%s643_s0] sm:$0xff]  ;;  %v19_v5 = vld [vmem:[%s643_s0 + $0x8] sm:$0xff] }
   0x3   :  { %368 = vmatpush3.bf16.msra.mxu0 %v415_v0  ;;  %407 = vmatpush3.bf16.msra.mxu1 %v415_v0  ;;  %v469_v6 = vld [vmem:[%s644_s1] ss:$0 sm:$0xff]  ;;  %v27_v10 = vld [vmem:[%s643_s0 + $0x48] sm:$0xff]  ;;  %v20_v11 = vld [vmem:[%s643_s0 + $0x10] sm:$0xff] }
   0x4   :  { %369 = vmatprep.subr.bf16.mxu0 %v416_v1  ;;  %400 = vmatprep.subr.bf16.mxu1 %v416_v1  ;;  %v41_v7 = vadd.f32 %v469_v6, %v18_v4  ;;  %v42_v8 = vadd.f32 %v469_v6, %v19_v5  ;;  %v26_v9 = vld [vmem:[%s643_s0 + $0x40] sm:$0xff]  ;;  %v50_v14 = vadd.f32 %v469_v6, %v27_v10  ;;  %v21_v15 = vld [vmem:[%s643_s0 + $0x18] sm:$0xff]  ;;  %v28_v17 = vld [vmem:[%s643_s0 + $0x50] sm:$0xff] }
   0x5   :  { %v419_v12 = vld [vmem:[%s642_s2 + $0x20] sm:$0xff]   ;;  %v49_v13 = vadd.f32 %v469_v6, %v26_v9  ;;  %v43_v16 = vadd.f32 %v469_v6, %v20_v11  ;;  %v44_v24 = vadd.f32 %v469_v6, %v21_v15  ;;  %v29_v25 = vld [vmem:[%s643_s0 + $0x58] sm:$0xff]  ;;  %v51_v33 = vadd.f32 %v469_v6, %v28_v17  ;;  %v420_v34 = vld [vmem:[%s642_s2 + $0x28] sm:$0xff]  }
   0x6   :  { %vm57_vm0 = vcmp.ge.f32.partialorder %v41_v7, 0.0  ;;  %vm58_vm1 = vcmp.ge.f32.partialorder %v42_v8, 0.0  ;;  %v73_v18 = vmul.f32 0.2, %v41_v7  ;;  %v74_v19 = vmul.f32 0.2, %v42_v8 }
   0x7   :  { %370 = vmatpush3.bf16.msra.mxu0 %v416_v1  ;;  %408 = vmatpush3.bf16.msra.mxu1 %v416_v1  ;;  %vm65_vm2 = vcmp.ge.f32.partialorder %v49_v13, 0.0  ;;  %vm66_vm3 = vcmp.ge.f32.partialorder %v50_v14, 0.0  ;;  %v81_v20 = vmul.f32 0.2, %v49_v13  ;;  %v82_v21 = vmul.f32 0.2, %v50_v14 }
   0x8   :  { %371 = vmatprep.subr.bf16.mxu0 %v417_v2  ;;  %401 = vmatprep.subr.bf16.mxu1 %v417_v2  ;;  %v89_v22 = vsel %vm57_vm0, %v41_v7, %v73_v18  ;;  %v90_v23 = vsel %vm58_vm1, %v42_v8, %v74_v19  ;;  %vm59_vm4 = vcmp.ge.f32.partialorder %v43_v16, 0.0  ;;  %v22_v30 = vld [vmem:[%s643_s0 + $0x20] sm:$0xff]  ;;  %vm60_vm5 = vcmp.ge.f32.partialorder %v44_v24, 0.0  ;;  %v23_v39 = vld [vmem:[%s643_s0 + $0x28] sm:$0xff]  ;;  %v24_v48 = vld [vmem:[%s643_s0 + $0x30] sm:$0xff] }
   0x9   :  { %v105_v26 = vmul.f32 1.4142135, %v89_v22  ;;  %v106_v27 = vmul.f32 1.4142135, %v90_v23  ;;  %v97_v28 = vsel %vm65_vm2, %v49_v13, %v81_v20  ;;  %v98_v29 = vsel %vm66_vm3, %v50_v14, %v82_v21  ;;  %v30_v46 = vld [vmem:[%s643_s0 + $0x60] sm:$0xff]  ;;  %v31_v47 = vld [vmem:[%s643_s0 + $0x68] sm:$0xff] }
   0xa   :  { %v113_v31 = vmul.f32 1.4142135, %v97_v28  ;;  %v114_v32 = vmul.f32 1.4142135, %v98_v29  ;;  %v75_v36 = vmul.f32 0.2, %v43_v16  ;;  %v52_v38 = vadd.f32 %v469_v6, %v29_v25 }
   0xb   :  { %372 = vmatpush3.bf16.msra.mxu0 %v417_v2  ;;  %409 = vmatpush3.bf16.msra.mxu1 %v417_v2  ;;  %v137_v35 = vpack.c.bf16 %v106_v27, %v105_v26  ;;  %v76_v37 = vmul.f32 0.2, %v44_v24  ;;  %vm67_vm6 = vcmp.ge.f32.partialorder %v51_v33, 0.0  ;;  %v83_v41 = vmul.f32 0.2, %v51_v33  ;;  %v421_v49 = vld [vmem:[%s642_s2 + $0x30] sm:$0xff]  }
   0xc   :  { %373 = vmatprep.subr.bf16.mxu0 %v418_v3  ;;  %402 = vmatprep.subr.bf16.mxu1 %v418_v3  ;;  %v141_v40 = vpack.c.bf16 %v114_v32, %v113_v31  ;;  %v45_v42 = vadd.f32 %v469_v6, %v22_v30  ;;  %v91_v43 = vsel %vm59_vm4, %v43_v16, %v75_v36  ;;  %vm68_vm7 = vcmp.ge.f32.partialorder %v52_v38, 0.0  ;;  %v25_v53 = vld [vmem:[%s643_s0 + $0x38] sm:$0xff]  ;;  %v32_v2 = vld [vmem:[%s643_s0 + $0x70] sm:$0xff]  ;;  %v129_v36 = vld [vmem:[%s645_s3 + $0x40] sm:$0xff] }
   0xd   :  { %383 = vmatprep.mubr.bf16.mxu0 %v137_v35  ;;  %v84_v44 = vmul.f32 0.2, %v52_v38  ;;  %v46_v45 = vadd.f32 %v469_v6, %v23_v39  ;;  %v92_v50 = vsel %vm60_vm5, %v44_v24, %v76_v37  ;;  %v99_v51 = vsel %vm67_vm6, %v51_v33, %v83_v41  ;;  %v422_v57 = vld [vmem:[%s642_s2 + $0x38] sm:$0xff]   ;;  %v123_v33 = vld [vmem:[%s645_s3 + $0x10] sm:$0xff]  ;;  %v121_v35 = vld [vmem:[%s645_s3] sm:$0xff] }
   0xe   :  { %vm61_vm8 = vcmp.ge.f32.partialorder %v45_v42, 0.0  ;;  %v77_v52 = vmul.f32 0.2, %v45_v42  ;;  %391 = vmatprep.mubr.bf16.mxu1 %v141_v40  ;;  %v107_v54 = vmul.f32 1.4142135, %v91_v43  ;;  %v53_v59 = vadd.f32 %v469_v6, %v30_v46  ;;  %v124_v39 = vld [vmem:[%s645_s3 + $0x18] sm:$0xff] }
   0xf   :  { %374 = vmatpush3.bf16.msra.mxu0 %v418_v3  ;;  %410 = vmatpush3.bf16.msra.mxu1 %v418_v3  ;;  %v100_v55 = vsel %vm68_vm7, %v52_v38, %v84_v44  ;;  %vm62_vm9 = vcmp.ge.f32.partialorder %v46_v45, 0.0  ;;  %v78_v56 = vmul.f32 0.2, %v46_v45  ;;  %v54_v60 = vadd.f32 %v469_v6, %v31_v47  ;;  %v33_v3 = vld [vmem:[%s643_s0 + $0x78] sm:$0xff]  ;;  %v130_v46 = vld [vmem:[%s645_s3 + $0x48] sm:$0xff] }
  0x10   :  { %375 = vmatprep.subr.bf16.mxu0 %v419_v12  ;;  %403 = vmatprep.subr.bf16.mxu1 %v419_v12  ;;  %v93_v58 = vsel %vm61_vm8, %v45_v42, %v77_v52  ;;  %v47_v61 = vadd.f32 %v469_v6, %v24_v48  ;;  %v108_v62 = vmul.f32 1.4142135, %v92_v50  ;;  %v115_v63 = vmul.f32 1.4142135, %v99_v51  ;;  %v132_v40 = vld [vmem:[%s645_s3 + $0x58] sm:$0xff] }
  0x11   :  { %v94_v0 = vsel %vm62_vm9, %v46_v45, %v78_v56  ;;  %v48_v1 = vadd.f32 %v469_v6, %v25_v53  ;;  %v116_v4 = vmul.f32 1.4142135, %v100_v55  ;;  %vm69_vm10 = vcmp.ge.f32.partialorder %v53_v59, 0.0  ;;  %v122_v45 = vld [vmem:[%s645_s3 + $0x8] sm:$0xff] }
  0x12   :  { %vm70_vm11 = vcmp.ge.f32.partialorder %v54_v60, 0.0  ;;  %v85_v5 = vmul.f32 0.2, %v53_v59  ;;  %v109_v7 = vmul.f32 1.4142135, %v93_v58  ;;  %vm63_vm12 = vcmp.ge.f32.partialorder %v47_v61, 0.0 }
  0x13   :  { %376 = vmatpush3.bf16.msra.mxu0 %v419_v12  ;;  %411 = vmatpush3.bf16.msra.mxu1 %v419_v12  ;;  %v110_v8 = vmul.f32 1.4142135, %v94_v0  ;;  %v86_v9 = vmul.f32 0.2, %v54_v60  ;;  %v79_v11 = vmul.f32 0.2, %v47_v61  ;;  %v55_v12 = vadd.f32 %v469_v6, %v32_v2 }
  0x14   :  { %377 = vmatprep.subr.bf16.mxu0 %v420_v34  ;;  %404 = vmatprep.subr.bf16.mxu1 %v420_v34  ;;  %v101_v10 = vsel %vm69_vm10, %v53_v59, %v85_v5  ;;  %v80_v15 = vmul.f32 0.2, %v48_v1  ;;  %v56_v16 = vadd.f32 %v469_v6, %v33_v3  ;;  %vm64_vm13 = vcmp.ge.f32.partialorder %v48_v1, 0.0  ;;  %v135_v58 = vld [vmem:[%s645_s3 + $0x70] sm:$0xff]  ;;  %v125_v59 = vld [vmem:[%s645_s3 + $0x20] sm:$0xff]  ;;  %v136_v0 = vld [vmem:[%s645_s3 + $0x78] sm:$0xff] }
  0x15   :  { %v102_v13 = vsel %vm70_vm11, %v54_v60, %v86_v9  ;;  %v117_v14 = vmul.f32 1.4142135, %v101_v10  ;;  %vm71_vm14 = vcmp.ge.f32.partialorder %v55_v12, 0.0  ;;  %v138_v18 = vpack.c.bf16 %v108_v62, %v107_v54  ;;  %v133_v60 = vld [vmem:[%s645_s3 + $0x60] sm:$0xff]  ;;  %v126_v5 = vld [vmem:[%s645_s3 + $0x28] sm:$0xff] }
  0x16   :  { %v118_v17 = vmul.f32 1.4142135, %v102_v13  ;;  %vm72_vm15 = vcmp.ge.f32.partialorder %v56_v16, 0.0  ;;  %v87_v19 = vmul.f32 0.2, %v55_v12  ;;  %v142_v20 = vpack.c.bf16 %v116_v4, %v115_v63  ;;  %v128_v63 = vld [vmem:[%s645_s3 + $0x38] sm:$0xff] }
  0x17   :  { %378 = vmatpush3.bf16.msra.mxu0 %v420_v34  ;;  %412 = vmatpush3.bf16.msra.mxu1 %v420_v34  ;;  %v139_v21 = vpack.c.bf16 %v110_v8, %v109_v7  ;;  %v95_v22 = vsel %vm63_vm12, %v47_v61, %v79_v11  ;;  %v88_v23 = vmul.f32 0.2, %v56_v16  ;;  %v96_v25 = vsel %vm64_vm13, %v48_v1, %v80_v15  ;;  %v131_v34 = vld [vmem:[%s645_s3 + $0x50] sm:$0xff]  ;;  %v134_v7 = vld [vmem:[%s645_s3 + $0x68] sm:$0xff] }
  0x18   :  { %379 = vmatprep.subr.bf16.mxu0 %v421_v49  ;;  %405 = vmatprep.subr.bf16.mxu1 %v421_v49  ;;  %v143_v24 = vpack.c.bf16 %v118_v17, %v117_v14  ;;  %v103_v26 = vsel %vm71_vm14, %v55_v12, %v87_v19  ;;  %v111_v6 = vmul.f32 1.4142135, %v95_v22  ;;  %v112_v28 = vmul.f32 1.4142135, %v96_v25 }
  0x19   :  { %v104_v27 = vsel %vm72_vm15, %v56_v16, %v88_v23  ;;  %v119_v29 = vmul.f32 1.4142135, %v103_v26 }
  0x1a   :  { %v120_v30 = vmul.f32 1.4142135, %v104_v27  ;;  %v140_v31 = vpack.c.bf16 %v112_v28, %v111_v6 }
  0x1b   :  { %380 = vmatpush3.bf16.msra.mxu0 %v421_v49  ;;  %413 = vmatpush3.bf16.msra.mxu1 %v421_v49 }
  0x1c   :  { %381 = vmatprep.subr.bf16.mxu0 %v422_v57  ;;  %406 = vmatprep.subr.bf16.mxu1 %v422_v57  ;;  %v144_v32 = vpack.c.bf16 %v120_v30, %v119_v29 }
  0x1f   :  { %382 = vmatpush3.bf16.msra.mxu0 %v422_v57  ;;  %414 = vmatpush3.bf16.msra.mxu1 %v422_v57  ;;  %v127_v57 = vld [vmem:[%s645_s3 + $0x30] sm:$0xff] }
  0x22   :  { %384 = vmatmul.mubr.bf16.vlgmr.msra.gmra.mrb[0].mxu0 %v138_v18  ;;  %392 = vmatmul.mubr.bf16.vlgmr.msra.gmra.mrb[0].mxu1 %v142_v20 }
  0x23   :  { %387 = vmatprep.mubr.bf16.mxu0 %v139_v21  ;;  %395 = vmatprep.mubr.bf16.mxu1 %v143_v24 }
  0x2a   :  { %388 = vmatmul.mubr.bf16.gmra.mrb[4].mxu0 %v140_v31  ;;  %396 = vmatmul.mubr.bf16.gmra.mrb[4].mxu1 %v144_v32 }
  0xf5   :  { %v385_v37 = vpop.f32.mrb[0].mxu0  ;;  %v393_v38 = vpop.f32.mrb[0].mxu1 }
  0xf6   :  { %v308_v41 = vadd.f32 %v385_v37, %v123_v33  ;;  %v316_v42 = vadd.f32 %v393_v38, %v131_v34  ;;  %v243_v43 = vpop.f32.mrb[1].mxu0  ;;  %v275_v44 = vpop.f32.mrb[1].mxu1 }
  0xf7   :  { %v306_v47 = vadd.f32 %v243_v43, %v121_v35  ;;  %v314_v48 = vadd.f32 %v275_v44, %v129_v36  ;;  %v386_v49 = vpop.f32.mrb[2].mxu0  ;;  %v394_v50 = vpop.f32.mrb[2].mxu1 }
  0xf8   :  { %324 = vst [vmem:[%s646_s4 + $0x10] sm:$0xff] %v308_v41  ;;  %332 = vst [vmem:[%s646_s4 + $0x50] sm:$0xff] %v316_v42  ;;  %v309_v51 = vadd.f32 %v386_v49, %v124_v39  ;;  %v317_v52 = vadd.f32 %v394_v50, %v132_v40  ;;  %v246_v53 = vpop.f32.mrb[3].mxu0  ;;  %v278_v54 = vpop.f32.mrb[3].mxu1 }
  0xf9   :  { %322 = vst [vmem:[%s646_s4] sm:$0xff] %v306_v47  ;;  %330 = vst [vmem:[%s646_s4 + $0x40] sm:$0xff] %v314_v48  ;;  %v307_v55 = vadd.f32 %v246_v53, %v122_v45  ;;  %v315_v56 = vadd.f32 %v278_v54, %v130_v46 }
  0xfa   :  { %325 = vst [vmem:[%s646_s4 + $0x18] sm:$0xff] %v309_v51  ;;  %333 = vst [vmem:[%s646_s4 + $0x58] sm:$0xff] %v317_v52 }
  0xfb   :  { %323 = vst [vmem:[%s646_s4 + $0x8] sm:$0xff] %v307_v55  ;;  %331 = vst [vmem:[%s646_s4 + $0x48] sm:$0xff] %v315_v56 }
  0xfd   :  { %v389_v61 = vpop.f32.mrb[4].mxu0  ;;  %v397_v62 = vpop.f32.mrb[4].mxu1 }
  0xfe   :  { %v312_v1 = vadd.f32 %v389_v61, %v127_v57  ;;  %v320_v2 = vadd.f32 %v397_v62, %v135_v58  ;;  %v259_v3 = vpop.f32.mrb[5].mxu0  ;;  %v291_v4 = vpop.f32.mrb[5].mxu1 }
  0xff   :  { %v310_v8 = vadd.f32 %v259_v3, %v125_v59  ;;  %v318_v9 = vadd.f32 %v291_v4, %v133_v60  ;;  %v390_v10 = vpop.f32.mrb[6].mxu0  ;;  %v398_v11 = vpop.f32.mrb[6].mxu1 }
 0x100   :  { %328 = vst [vmem:[%s646_s4 + $0x30] sm:$0xff] %v312_v1  ;;  %336 = vst [vmem:[%s646_s4 + $0x70] sm:$0xff] %v320_v2  ;;  %v313_v12 = vadd.f32 %v390_v10, %v128_v63  ;;  %v321_v13 = vadd.f32 %v398_v11, %v136_v0  ;;  %v262_v14 = vpop.f32.mrb[7].mxu0  ;;  %v294_v15 = vpop.f32.mrb[7].mxu1 }
 0x101   :  { %326 = vst [vmem:[%s646_s4 + $0x20] sm:$0xff] %v310_v8  ;;  %334 = vst [vmem:[%s646_s4 + $0x60] sm:$0xff] %v318_v9  ;;  %v311_v16 = vadd.f32 %v262_v14, %v126_v5  ;;  %v319_v17 = vadd.f32 %v294_v15, %v134_v7 }
 0x102   :  { %329 = vst [vmem:[%s646_s4 + $0x38] sm:$0xff] %v313_v12  ;;  %337 = vst [vmem:[%s646_s4 + $0x78] sm:$0xff] %v321_v13 }
 0x103   :  { %327 = vst [vmem:[%s646_s4 + $0x28] sm:$0xff] %v311_v16  ;;  %335 = vst [vmem:[%s646_s4 + $0x68] sm:$0xff] %v319_v17 }

// kernel: generator_forward.27
= control target key start
LH: loop header
LB: loop body
LE: loop exit
PB: predicated region body
PF: predicated region fallthrough
CT: control target
= control target key end

     0   :  { %s568_s1 = inlined_call_operand.vmem [shape: bf16[128,128], index: 1, kind: input, shape index: {}]   ;;  %s569_s0 = inlined_call_operand.vmem [shape: bf16[128,128], index: 0, kind: input, shape index: {}]   ;;  %s570_s2 = inlined_call_operand.vmem [shape: f32[1,128], index: 2, kind: input, shape index: {}]   ;;  %s571_s3 = inlined_call_operand.vmem [shape: f32[128,128], index: 3, kind: output, shape index: {}]  }
   0x1   :  { %v412_v0 = vld [vmem:[%s568_s1] sm:$0xff]   ;;  %v413_v1 = vld [vmem:[%s568_s1 + $0x8] sm:$0xff]   ;;  %v414_v2 = vld [vmem:[%s568_s1 + $0x10] sm:$0xff]  }
   0x2   :  { %364 = vmatprep.subr.bf16.mxu0 %v412_v0  ;;  %396 = vmatprep.subr.bf16.mxu1 %v412_v0  ;;  %v415_v3 = vld [vmem:[%s568_s1 + $0x18] sm:$0xff]   ;;  %v420_v4 = vld [vmem:[%s569_s0] sm:$0xff]   ;;  %v417_v7 = vld [vmem:[%s568_s1 + $0x28] sm:$0xff]  }
   0x3   :  { %365 = vmatpush3.bf16.msra.mxu0 %v412_v0  ;;  %404 = vmatpush3.bf16.msra.mxu1 %v412_v0  ;;  %v421_v5 = vld [vmem:[%s569_s0 + $0x20] sm:$0xff]   ;;  %v418_v8 = vld [vmem:[%s568_s1 + $0x30] sm:$0xff]   ;;  %v419_v9 = vld [vmem:[%s568_s1 + $0x38] sm:$0xff]  }
   0x4   :  { %366 = vmatprep.subr.bf16.mxu0 %v413_v1  ;;  %397 = vmatprep.subr.bf16.mxu1 %v413_v1  ;;  %v416_v6 = vld [vmem:[%s568_s1 + $0x20] sm:$0xff]   ;;  %v422_v10 = vld [vmem:[%s569_s0 + $0x8] sm:$0xff]   ;;  %v424_v12 = vld [vmem:[%s569_s0 + $0x10] sm:$0xff]  }
   0x5   :  { %380 = vmatprep.mubr.bf16.mxu0 %v420_v4  ;;  %388 = vmatprep.mubr.bf16.mxu1 %v421_v5  ;;  %v423_v11 = vld [vmem:[%s569_s0 + $0x28] sm:$0xff]   ;;  %v425_v13 = vld [vmem:[%s569_s0 + $0x30] sm:$0xff]   ;;  %v426_v14 = vld [vmem:[%s569_s0 + $0x18] sm:$0xff]  }
   0x6   :  { %v427_v15 = vld [vmem:[%s569_s0 + $0x38] sm:$0xff]   ;;  %v499_v16 = vld [vmem:[%s570_s2] ss:$0 sm:$0xff] }
   0x7   :  { %367 = vmatpush3.bf16.msra.mxu0 %v413_v1  ;;  %405 = vmatpush3.bf16.msra.mxu1 %v413_v1 }
   0x8   :  { %368 = vmatprep.subr.bf16.mxu0 %v414_v2  ;;  %398 = vmatprep.subr.bf16.mxu1 %v414_v2 }
   0xb   :  { %369 = vmatpush3.bf16.msra.mxu0 %v414_v2  ;;  %406 = vmatpush3.bf16.msra.mxu1 %v414_v2 }
   0xc   :  { %370 = vmatprep.subr.bf16.mxu0 %v415_v3  ;;  %399 = vmatprep.subr.bf16.mxu1 %v415_v3 }
   0xf   :  { %371 = vmatpush3.bf16.msra.mxu0 %v415_v3  ;;  %407 = vmatpush3.bf16.msra.mxu1 %v415_v3 }
  0x10   :  { %372 = vmatprep.subr.bf16.mxu0 %v416_v6  ;;  %400 = vmatprep.subr.bf16.mxu1 %v416_v6 }
  0x13   :  { %373 = vmatpush3.bf16.msra.mxu0 %v416_v6  ;;  %408 = vmatpush3.bf16.msra.mxu1 %v416_v6 }
  0x14   :  { %374 = vmatprep.subr.bf16.mxu0 %v417_v7  ;;  %401 = vmatprep.subr.bf16.mxu1 %v417_v7 }
  0x17   :  { %375 = vmatpush3.bf16.msra.mxu0 %v417_v7  ;;  %409 = vmatpush3.bf16.msra.mxu1 %v417_v7 }
  0x18   :  { %376 = vmatprep.subr.bf16.mxu0 %v418_v8  ;;  %402 = vmatprep.subr.bf16.mxu1 %v418_v8 }
  0x1b   :  { %377 = vmatpush3.bf16.msra.mxu0 %v418_v8  ;;  %410 = vmatpush3.bf16.msra.mxu1 %v418_v8 }
  0x1c   :  { %378 = vmatprep.subr.bf16.mxu0 %v419_v9  ;;  %403 = vmatprep.subr.bf16.mxu1 %v419_v9 }
  0x1f   :  { %379 = vmatpush3.bf16.msra.mxu0 %v419_v9  ;;  %411 = vmatpush3.bf16.msra.mxu1 %v419_v9 }
  0x22   :  { %381 = vmatmul.mubr.bf16.vlgmr.msra.gmra.mrb[0].mxu0 %v422_v10  ;;  %389 = vmatmul.mubr.bf16.vlgmr.msra.gmra.mrb[0].mxu1 %v423_v11 }
  0x23   :  { %384 = vmatprep.mubr.bf16.mxu0 %v424_v12  ;;  %392 = vmatprep.mubr.bf16.mxu1 %v425_v13 }
  0x2a   :  { %385 = vmatmul.mubr.bf16.gmra.mrb[4].mxu0 %v426_v14  ;;  %393 = vmatmul.mubr.bf16.gmra.mrb[4].mxu1 %v427_v15 }
  0xf5   :  { %v382_v17 = vpop.f32.mrb[0].mxu0  ;;  %v390_v18 = vpop.f32.mrb[0].mxu1 }
  0xf6   :  { %v193_v19 = vadd.f32 %v382_v17, %v499_v16  ;;  %v225_v20 = vadd.f32 %v390_v18, %v499_v16  ;;  %v184_v21 = vpop.f32.mrb[1].mxu0  ;;  %v216_v22 = vpop.f32.mrb[1].mxu1 }
  0xf7   :  { %v185_v23 = vadd.f32 %v499_v16, %v184_v21  ;;  %v217_v24 = vadd.f32 %v499_v16, %v216_v22  ;;  %v383_v25 = vpop.f32.mrb[2].mxu0  ;;  %v391_v26 = vpop.f32.mrb[2].mxu1 }
  0xf8   :  { %vm249_vm0 = vcmp.ge.f32.partialorder %v193_v19, 0.0  ;;  %v265_v27 = vmul.f32 0.2, %v193_v19  ;;  %vm257_vm1 = vcmp.ge.f32.partialorder %v225_v20, 0.0  ;;  %v273_v28 = vmul.f32 0.2, %v225_v20 }
  0xf9   :  { %vm247_vm2 = vcmp.ge.f32.partialorder %v185_v23, 0.0  ;;  %v263_v29 = vmul.f32 0.2, %v185_v23  ;;  %vm255_vm3 = vcmp.ge.f32.partialorder %v217_v24, 0.0  ;;  %v271_v30 = vmul.f32 0.2, %v217_v24 }
  0xfa   :  { %v281_v31 = vsel %vm249_vm0, %v193_v19, %v265_v27  ;;  %v289_v32 = vsel %vm257_vm1, %v225_v20, %v273_v28  ;;  %v196_v33 = vadd.f32 %v383_v25, %v499_v16  ;;  %v228_v34 = vadd.f32 %v391_v26, %v499_v16  ;;  %v187_v35 = vpop.f32.mrb[3].mxu0  ;;  %v219_v36 = vpop.f32.mrb[3].mxu1 }
  0xfb   :  { %v297_v37 = vmul.f32 1.4142135, %v281_v31  ;;  %v305_v38 = vmul.f32 1.4142135, %v289_v32  ;;  %v279_v39 = vsel %vm247_vm2, %v185_v23, %v263_v29  ;;  %v287_v40 = vsel %vm255_vm3, %v217_v24, %v271_v30 }
  0xfc   :  { %v295_v41 = vmul.f32 1.4142135, %v279_v39  ;;  %v303_v42 = vmul.f32 1.4142135, %v287_v40  ;;  %vm250_vm4 = vcmp.ge.f32.partialorder %v196_v33, 0.0  ;;  %vm258_vm5 = vcmp.ge.f32.partialorder %v228_v34, 0.0 }
  0xfd   :  { %313 = vst [vmem:[%s571_s3 + $0x10] sm:$0xff] %v297_v37  ;;  %321 = vst [vmem:[%s571_s3 + $0x50] sm:$0xff] %v305_v38  ;;  %v266_v43 = vmul.f32 0.2, %v196_v33  ;;  %v274_v44 = vmul.f32 0.2, %v228_v34  ;;  %v188_v45 = vadd.f32 %v499_v16, %v187_v35  ;;  %v220_v46 = vadd.f32 %v499_v16, %v219_v36 }
  0xfe   :  { %v386_v47 = vpop.f32.mrb[4].mxu0  ;;  %v394_v48 = vpop.f32.mrb[4].mxu1  ;;  %311 = vst [vmem:[%s571_s3] sm:$0xff] %v295_v41  ;;  %319 = vst [vmem:[%s571_s3 + $0x40] sm:$0xff] %v303_v42 }
  0xff   :  { %v209_v49 = vadd.f32 %v386_v47, %v499_v16  ;;  %v241_v50 = vadd.f32 %v394_v48, %v499_v16  ;;  %v200_v51 = vpop.f32.mrb[5].mxu0  ;;  %v232_v52 = vpop.f32.mrb[5].mxu1  ;;  %v282_v53 = vsel %vm250_vm4, %v196_v33, %v266_v43  ;;  %v290_v54 = vsel %vm258_vm5, %v228_v34, %v274_v44 }
 0x100   :  { %vm248_vm6 = vcmp.ge.f32.partialorder %v188_v45, 0.0  ;;  %v264_v55 = vmul.f32 0.2, %v188_v45  ;;  %v387_v56 = vpop.f32.mrb[6].mxu0  ;;  %v395_v57 = vpop.f32.mrb[6].mxu1  ;;  %vm256_vm7 = vcmp.ge.f32.partialorder %v220_v46, 0.0  ;;  %v201_v2 = vadd.f32 %v499_v16, %v200_v51 }
 0x101   :  { %v298_v58 = vmul.f32 1.4142135, %v282_v53  ;;  %v306_v59 = vmul.f32 1.4142135, %v290_v54  ;;  %vm253_vm8 = vcmp.ge.f32.partialorder %v209_v49, 0.0  ;;  %vm261_vm9 = vcmp.ge.f32.partialorder %v241_v50, 0.0 }
 0x102   :  { %v280_v60 = vsel %vm248_vm6, %v188_v45, %v264_v55  ;;  %v272_v61 = vmul.f32 0.2, %v220_v46  ;;  %v269_v62 = vmul.f32 0.2, %v209_v49  ;;  %v203_v63 = vpop.f32.mrb[7].mxu0  ;;  %v233_v3 = vadd.f32 %v499_v16, %v232_v52  ;;  %v235_v4 = vpop.f32.mrb[7].mxu1 }
 0x103   :  { %314 = vst [vmem:[%s571_s3 + $0x18] sm:$0xff] %v298_v58  ;;  %322 = vst [vmem:[%s571_s3 + $0x58] sm:$0xff] %v306_v59  ;;  %v296_v0 = vmul.f32 1.4142135, %v280_v60  ;;  %v277_v1 = vmul.f32 0.2, %v241_v50  ;;  %v212_v7 = vadd.f32 %v387_v56, %v499_v16  ;;  %v244_v8 = vadd.f32 %v395_v57, %v499_v16 }
 0x104   :  { %v288_v5 = vsel %vm256_vm7, %v220_v46, %v272_v61  ;;  %v285_v6 = vsel %vm253_vm8, %v209_v49, %v269_v62  ;;  %vm251_vm10 = vcmp.ge.f32.partialorder %v201_v2, 0.0  ;;  %v267_v13 = vmul.f32 0.2, %v201_v2 }
 0x105   :  { %312 = vst [vmem:[%s571_s3 + $0x8] sm:$0xff] %v296_v0  ;;  %v304_v9 = vmul.f32 1.4142135, %v288_v5  ;;  %v301_v10 = vmul.f32 1.4142135, %v285_v6  ;;  %v293_v11 = vsel %vm261_vm9, %v241_v50, %v277_v1  ;;  %vm259_vm11 = vcmp.ge.f32.partialorder %v233_v3, 0.0 }
 0x106   :  { %v309_v12 = vmul.f32 1.4142135, %v293_v11  ;;  %vm254_vm12 = vcmp.ge.f32.partialorder %v212_v7, 0.0  ;;  %v275_v14 = vmul.f32 0.2, %v233_v3  ;;  %vm262_vm13 = vcmp.ge.f32.partialorder %v244_v8, 0.0 }
 0x107   :  { %320 = vst [vmem:[%s571_s3 + $0x48] sm:$0xff] %v304_v9  ;;  %317 = vst [vmem:[%s571_s3 + $0x30] sm:$0xff] %v301_v10  ;;  %v270_v15 = vmul.f32 0.2, %v212_v7  ;;  %v204_v17 = vadd.f32 %v499_v16, %v203_v63  ;;  %v283_v18 = vsel %vm251_vm10, %v201_v2, %v267_v13  ;;  %v278_v19 = vmul.f32 0.2, %v244_v8 }
 0x108   :  { %325 = vst [vmem:[%s571_s3 + $0x70] sm:$0xff] %v309_v12  ;;  %v236_v20 = vadd.f32 %v499_v16, %v235_v4  ;;  %v299_v21 = vmul.f32 1.4142135, %v283_v18  ;;  %v291_v22 = vsel %vm259_vm11, %v233_v3, %v275_v14 }
 0x109   :  { %v286_v23 = vsel %vm254_vm12, %v212_v7, %v270_v15  ;;  %vm252_vm14 = vcmp.ge.f32.partialorder %v204_v17, 0.0  ;;  %v307_v24 = vmul.f32 1.4142135, %v291_v22  ;;  %v294_v26 = vsel %vm262_vm13, %v244_v8, %v278_v19 }
 0x10a   :  { %v302_v25 = vmul.f32 1.4142135, %v286_v23  ;;  %v268_v27 = vmul.f32 0.2, %v204_v17  ;;  %315 = vst [vmem:[%s571_s3 + $0x20] sm:$0xff] %v299_v21  ;;  %vm260_vm15 = vcmp.ge.f32.partialorder %v236_v20, 0.0 }
 0x10b   :  { %v310_v28 = vmul.f32 1.4142135, %v294_v26  ;;  %v276_v29 = vmul.f32 0.2, %v236_v20  ;;  %323 = vst [vmem:[%s571_s3 + $0x60] sm:$0xff] %v307_v24 }
 0x10c   :  { %318 = vst [vmem:[%s571_s3 + $0x38] sm:$0xff] %v302_v25  ;;  %v284_v16 = vsel %vm252_vm14, %v204_v17, %v268_v27 }
 0x10d   :  { %326 = vst [vmem:[%s571_s3 + $0x78] sm:$0xff] %v310_v28  ;;  %v300_v30 = vmul.f32 1.4142135, %v284_v16  ;;  %v292_v31 = vsel %vm260_vm15, %v236_v20, %v276_v29 }
 0x10e   :  { %v308_v32 = vmul.f32 1.4142135, %v292_v31 }
 0x10f   :  { %316 = vst [vmem:[%s571_s3 + $0x28] sm:$0xff] %v300_v30 }
 0x110   :  { %324 = vst [vmem:[%s571_s3 + $0x68] sm:$0xff] %v308_v32 }

// kernel: generator_forward.30
= control target key start
LH: loop header
LB: loop body
LE: loop exit
PB: predicated region body
PF: predicated region fallthrough
CT: control target
= control target key end

     0   :  { %s464_s1 = inlined_call_operand.vmem [shape: bf16[128,128], index: 1, kind: input, shape index: {}]   ;;  %s465_s0 = inlined_call_operand.vmem [shape: bf16[128,128], index: 0, kind: input, shape index: {}]   ;;  %s466_s2 = inlined_call_operand.vmem [shape: f32[128,128], index: 2, kind: output, shape index: {}]  }
   0x1   :  { %v337_v0 = vld [vmem:[%s464_s1] sm:$0xff]   ;;  %v338_v1 = vld [vmem:[%s464_s1 + $0x8] sm:$0xff]   ;;  %v339_v2 = vld [vmem:[%s464_s1 + $0x10] sm:$0xff]  }
   0x2   :  { %289 = vmatprep.subr.bf16.mxu0 %v337_v0  ;;  %321 = vmatprep.subr.bf16.mxu1 %v337_v0  ;;  %v340_v3 = vld [vmem:[%s464_s1 + $0x18] sm:$0xff]   ;;  %v345_v4 = vld [vmem:[%s465_s0] sm:$0xff]   ;;  %v342_v7 = vld [vmem:[%s464_s1 + $0x28] sm:$0xff]  }
   0x3   :  { %290 = vmatpush3.bf16.msra.mxu0 %v337_v0  ;;  %329 = vmatpush3.bf16.msra.mxu1 %v337_v0  ;;  %v346_v5 = vld [vmem:[%s465_s0 + $0x20] sm:$0xff]   ;;  %v343_v8 = vld [vmem:[%s464_s1 + $0x30] sm:$0xff]   ;;  %v344_v9 = vld [vmem:[%s464_s1 + $0x38] sm:$0xff]  }
   0x4   :  { %291 = vmatprep.subr.bf16.mxu0 %v338_v1  ;;  %322 = vmatprep.subr.bf16.mxu1 %v338_v1  ;;  %v341_v6 = vld [vmem:[%s464_s1 + $0x20] sm:$0xff]   ;;  %v347_v10 = vld [vmem:[%s465_s0 + $0x8] sm:$0xff]   ;;  %v349_v12 = vld [vmem:[%s465_s0 + $0x10] sm:$0xff]  }
   0x5   :  { %305 = vmatprep.mubr.bf16.mxu0 %v345_v4  ;;  %313 = vmatprep.mubr.bf16.mxu1 %v346_v5  ;;  %v348_v11 = vld [vmem:[%s465_s0 + $0x28] sm:$0xff]   ;;  %v350_v13 = vld [vmem:[%s465_s0 + $0x30] sm:$0xff]   ;;  %v351_v14 = vld [vmem:[%s465_s0 + $0x18] sm:$0xff]  }
   0x6   :  { %v352_v15 = vld [vmem:[%s465_s0 + $0x38] sm:$0xff]  }
   0x7   :  { %292 = vmatpush3.bf16.msra.mxu0 %v338_v1  ;;  %330 = vmatpush3.bf16.msra.mxu1 %v338_v1 }
   0x8   :  { %293 = vmatprep.subr.bf16.mxu0 %v339_v2  ;;  %323 = vmatprep.subr.bf16.mxu1 %v339_v2 }
   0xb   :  { %294 = vmatpush3.bf16.msra.mxu0 %v339_v2  ;;  %331 = vmatpush3.bf16.msra.mxu1 %v339_v2 }
   0xc   :  { %295 = vmatprep.subr.bf16.mxu0 %v340_v3  ;;  %324 = vmatprep.subr.bf16.mxu1 %v340_v3 }
   0xf   :  { %296 = vmatpush3.bf16.msra.mxu0 %v340_v3  ;;  %332 = vmatpush3.bf16.msra.mxu1 %v340_v3 }
  0x10   :  { %297 = vmatprep.subr.bf16.mxu0 %v341_v6  ;;  %325 = vmatprep.subr.bf16.mxu1 %v341_v6 }
  0x13   :  { %298 = vmatpush3.bf16.msra.mxu0 %v341_v6  ;;  %333 = vmatpush3.bf16.msra.mxu1 %v341_v6 }
  0x14   :  { %299 = vmatprep.subr.bf16.mxu0 %v342_v7  ;;  %326 = vmatprep.subr.bf16.mxu1 %v342_v7 }
  0x17   :  { %300 = vmatpush3.bf16.msra.mxu0 %v342_v7  ;;  %334 = vmatpush3.bf16.msra.mxu1 %v342_v7 }
  0x18   :  { %301 = vmatprep.subr.bf16.mxu0 %v343_v8  ;;  %327 = vmatprep.subr.bf16.mxu1 %v343_v8 }
  0x1b   :  { %302 = vmatpush3.bf16.msra.mxu0 %v343_v8  ;;  %335 = vmatpush3.bf16.msra.mxu1 %v343_v8 }
  0x1c   :  { %303 = vmatprep.subr.bf16.mxu0 %v344_v9  ;;  %328 = vmatprep.subr.bf16.mxu1 %v344_v9 }
  0x1f   :  { %304 = vmatpush3.bf16.msra.mxu0 %v344_v9  ;;  %336 = vmatpush3.bf16.msra.mxu1 %v344_v9 }
  0x22   :  { %306 = vmatmul.mubr.bf16.vlgmr.msra.gmra.mrb[0].mxu0 %v347_v10  ;;  %314 = vmatmul.mubr.bf16.vlgmr.msra.gmra.mrb[0].mxu1 %v348_v11 }
  0x23   :  { %309 = vmatprep.mubr.bf16.mxu0 %v349_v12  ;;  %317 = vmatprep.mubr.bf16.mxu1 %v350_v13 }
  0x2a   :  { %310 = vmatmul.mubr.bf16.gmra.mrb[4].mxu0 %v351_v14  ;;  %318 = vmatmul.mubr.bf16.gmra.mrb[4].mxu1 %v352_v15 }
  0xf5   :  { %v307_v16 = vpop.f32.mrb[0].mxu0  ;;  %v315_v17 = vpop.f32.mrb[0].mxu1 }
  0xf6   :  { %239 = vst [vmem:[%s466_s2 + $0x10] sm:$0xff] %v307_v16  ;;  %247 = vst [vmem:[%s466_s2 + $0x50] sm:$0xff] %v315_v17  ;;  %v174_v18 = vpop.f32.mrb[1].mxu0  ;;  %v206_v19 = vpop.f32.mrb[1].mxu1 }
  0xf7   :  { %237 = vst [vmem:[%s466_s2] sm:$0xff] %v174_v18  ;;  %245 = vst [vmem:[%s466_s2 + $0x40] sm:$0xff] %v206_v19  ;;  %v308_v20 = vpop.f32.mrb[2].mxu0  ;;  %v316_v21 = vpop.f32.mrb[2].mxu1 }
  0xf8   :  { %240 = vst [vmem:[%s466_s2 + $0x18] sm:$0xff] %v308_v20  ;;  %248 = vst [vmem:[%s466_s2 + $0x58] sm:$0xff] %v316_v21  ;;  %v177_v22 = vpop.f32.mrb[3].mxu0  ;;  %v209_v23 = vpop.f32.mrb[3].mxu1 }
  0xf9   :  { %238 = vst [vmem:[%s466_s2 + $0x8] sm:$0xff] %v177_v22  ;;  %246 = vst [vmem:[%s466_s2 + $0x48] sm:$0xff] %v209_v23 }
  0xfd   :  { %v311_v24 = vpop.f32.mrb[4].mxu0  ;;  %v319_v25 = vpop.f32.mrb[4].mxu1 }
  0xfe   :  { %243 = vst [vmem:[%s466_s2 + $0x30] sm:$0xff] %v311_v24  ;;  %251 = vst [vmem:[%s466_s2 + $0x70] sm:$0xff] %v319_v25  ;;  %v190_v26 = vpop.f32.mrb[5].mxu0  ;;  %v222_v27 = vpop.f32.mrb[5].mxu1 }
  0xff   :  { %241 = vst [vmem:[%s466_s2 + $0x20] sm:$0xff] %v190_v26  ;;  %249 = vst [vmem:[%s466_s2 + $0x60] sm:$0xff] %v222_v27  ;;  %v312_v28 = vpop.f32.mrb[6].mxu0  ;;  %v320_v29 = vpop.f32.mrb[6].mxu1 }
 0x100   :  { %244 = vst [vmem:[%s466_s2 + $0x38] sm:$0xff] %v312_v28  ;;  %252 = vst [vmem:[%s466_s2 + $0x78] sm:$0xff] %v320_v29  ;;  %v193_v30 = vpop.f32.mrb[7].mxu0  ;;  %v225_v31 = vpop.f32.mrb[7].mxu1 }
 0x101   :  { %242 = vst [vmem:[%s466_s2 + $0x28] sm:$0xff] %v193_v30  ;;  %250 = vst [vmem:[%s466_s2 + $0x68] sm:$0xff] %v225_v31 }

// kernel: generator_forward.28
= control target key start
LH: loop header
LB: loop body
LE: loop exit
PB: predicated region body
PF: predicated region fallthrough
CT: control target
= control target key end

     0   :  { %s1788_s9 = smov 0   ;;  %s2203_s0 = inlined_call_operand.vmem [shape: bf16[2,10,10,128], index: 0, kind: input, shape index: {}]   ;;  %s2204_s1 = inlined_call_operand.vmem [shape: bf16[1152,128], index: 1, kind: input, shape index: {}]   ;;  %s2205_s2 = inlined_call_operand.vmem [shape: f32[2,64,128], index: 2, kind: output, shape index: {}]  }
   0x1 LB: > { %s1333_s10 = sadd.s32 4294967295, %s1771_s9   ;;  %p1337_p0 = scmp.ge.s32.totalorder %s1771_s9, 1  ;;  %s1771_s9 = sphi %s1788_s9, %s12_s9  }
   0x2   : > { %p112_p1 = scmp.lt.s32.totalorder %s1771_s9, 3 }
   0x4   : > { %p113_p2 = pnand %p1337_p0, %p112_p1 }
   0x5   : > { %v1674_v0 = vld [vmem:[%s2204_s1 + $0x40] sm:$0xff] (!%p113_p2)   ;;  %v1678_v4 = vld [vmem:[%s2204_s1 + $0x48] sm:$0xff] (!%p113_p2)   ;;  %v1682_v8 = vld [vmem:[%s2204_s1 + $0x50] sm:$0xff] (!%p113_p2)   ;;  %p134_p3 = scmp.lt.s32.totalorder (!%p113_p2), %s1333_s10, 1 }
   0x6   : > { %116 = sbr.rel (%p113_p2) target bundleno = 322 (0x142), region = 28  ;;  %v1675_v1 = vld [vmem:[%s2204_s1 + $0xc0] sm:$0xff] (!%p113_p2)   ;;  %1453 = vmatprep.subr.bf16.mxu0 (!%p113_p2), %v1674_v0  ;;  %v1679_v5 = vld [vmem:[%s2204_s1 + $0xc8] sm:$0xff] (!%p113_p2)   ;;  %v1683_v9 = vld [vmem:[%s2204_s1 + $0xd0] sm:$0xff] (!%p113_p2)  }
   0x7   : > { %v1676_v2 = vld [vmem:[%s2204_s1] sm:$0xff] (!%p113_p2)   ;;  %1493 = vmatprep.subr.bf16.mxu1 (!%p113_p2), %v1675_v1  ;;  %v1680_v6 = vld [vmem:[%s2204_s1 + $0x8] sm:$0xff] (!%p113_p2)   ;;  %v1684_v10 = vld [vmem:[%s2204_s1 + $0x10] sm:$0xff] (!%p113_p2)  }
   0x8   : > { %v1677_v3 = vld [vmem:[%s2204_s1 + $0x80] sm:$0xff] (!%p113_p2)   ;;  %1454 = vmatpush3.bf16.msra.mxu0 (!%p113_p2), %v1676_v2  ;;  %v1681_v7 = vld [vmem:[%s2204_s1 + $0x88] sm:$0xff] (!%p113_p2)   ;;  %v1685_v11 = vld [vmem:[%s2204_s1 + $0x90] sm:$0xff] (!%p113_p2)  }
   0x9   : > { %1494 = vmatpush3.bf16.msra.mxu1 (!%p113_p2), %v1677_v3  ;;  %1455 = vmatprep.subr.bf16.mxu0 (!%p113_p2), %v1678_v4  ;;  %v1686_v12 = vld [vmem:[%s2204_s1 + $0x58] sm:$0xff] (!%p113_p2)   ;;  %v1690_v16 = vld [vmem:[%s2204_s1 + $0x60] sm:$0xff] (!%p113_p2)   ;;  %v1694_v20 = vld [vmem:[%s2204_s1 + $0x68] sm:$0xff] (!%p113_p2)  }
   0xa   : > { %1495 = vmatprep.subr.bf16.mxu1 (!%p113_p2), %v1679_v5  ;;  %v1687_v13 = vld [vmem:[%s2204_s1 + $0xd8] sm:$0xff] (!%p113_p2)   ;;  %v1691_v17 = vld [vmem:[%s2204_s1 + $0xe0] sm:$0xff] (!%p113_p2)   ;;  %v1695_v21 = vld [vmem:[%s2204_s1 + $0xe8] sm:$0xff] (!%p113_p2)  }
   0xb   : > { %v1688_v14 = vld [vmem:[%s2204_s1 + $0x18] sm:$0xff] (!%p113_p2)   ;;  %v1692_v18 = vld [vmem:[%s2204_s1 + $0x20] sm:$0xff] (!%p113_p2)   ;;  %v1696_v22 = vld [vmem:[%s2204_s1 + $0x28] sm:$0xff] (!%p113_p2)  }
   0xc   : > { %1456 = vmatpush3.bf16.msra.mxu0 (!%p113_p2), %v1680_v6  ;;  %v1689_v15 = vld [vmem:[%s2204_s1 + $0x98] sm:$0xff] (!%p113_p2)   ;;  %v1693_v19 = vld [vmem:[%s2204_s1 + $0xa0] sm:$0xff] (!%p113_p2)   ;;  %v1697_v23 = vld [vmem:[%s2204_s1 + $0xa8] sm:$0xff] (!%p113_p2)  }
   0xd   : > { %1496 = vmatpush3.bf16.msra.mxu1 %v1681_v7  ;;  %1457 = vmatprep.subr.bf16.mxu0 %v1682_v8  ;;  %s2207_s10 = smov (!%p134_p3, %s1333_s10), 1  ;;  %v1698_v24 = vld [vmem:[%s2204_s1 + $0x70] sm:$0xff]   ;;  %v1702_v28 = vld [vmem:[%s2204_s1 + $0x78] sm:$0xff]   ;;  %v1711_v41 = vld [vmem:[%s2204_s1 + $0x140] sm:$0xff]  }
   0xe   : > { %1497 = vmatprep.subr.bf16.mxu1 %v1683_v9  ;;  %v1699_v25 = vld [vmem:[%s2204_s1 + $0xf0] sm:$0xff]   ;;  %s1665_s11 = smul.u32 80, %s2207_s10  ;;  %v1703_v29 = vld [vmem:[%s2204_s1 + $0xf8] sm:$0xff]   ;;  %v1712_v45 = vld [vmem:[%s2204_s1 + $0x1c0] sm:$0xff]   ;;  %s1452_s3 = sshll.u32 %s2207_s10, 6 }
   0xf   : > { %v1700_v26 = vld [vmem:[%s2204_s1 + $0x30] sm:$0xff]   ;;  %v1704_v30 = vld [vmem:[%s2204_s1 + $0x38] sm:$0xff]   ;;  %v1714_v51 = vld [vmem:[%s2204_s1 + $0x180] sm:$0xff]   ;;  %s143_s6 = scalar_lea.vmem %s2205_s2, %s1452_s3 }
  0x10   : > { %1458 = vmatpush3.bf16.msra.mxu0 %v1684_v10  ;;  %v1701_v27 = vld [vmem:[%s2204_s1 + $0xb0] sm:$0xff]   ;;  %s1896_s22 = scalar_lea.vmem %s2203_s0, %s1665_s11  ;;  %v1705_v31 = vld [vmem:[%s2204_s1 + $0xb8] sm:$0xff]   ;;  %v1713_v56 = vld [vmem:[%s2204_s1 + $0x100] sm:$0xff]  }
  0x11   : > { %1498 = vmatpush3.bf16.msra.mxu1 %v1685_v11  ;;  %1459 = vmatprep.subr.bf16.mxu0 %v1686_v12  ;;  %v145_v32 = vld [vmem:[%s1896_s22] sm:$0xf]  ;;  %v146_v33 = vld [vmem:[%s1896_s22 + $0x4] sm:$0x1]  ;;  %v147_v34 = vld [vmem:[%s1896_s22 + $0x8] sm:$0xf] }
  0x12   : > { %1499 = vmatprep.subr.bf16.mxu1 %v1687_v13  ;;  %v148_v35 = vld [vmem:[%s1896_s22 + $0xc] sm:$0x1]  ;;  %v1341_v36 = vcombine.low %v145_v32, %v146_v33  ;;  %v1909_v37 = vld [vmem:[%s1896_s22 + $0x10] sm:$0xf]  ;;  %v150_v38 = vld [vmem:[%s1896_s22 + $0x14] sm:$0x1]  ;;  %v1351_v58 = vcombine.low %v145_v32, %v147_v34 }
  0x13   : > { %v1912_v39 = vcombine.low %v147_v34, %v148_v35  ;;  %v1354_v40 = vcombine.low %v147_v34, %v1909_v37  ;;  %v1925_v50 = vcombine.low %v1909_v37, %v150_v38  ;;  %v1716_v57 = vld [vmem:[%s2204_s1 + $0x1c8] sm:$0xff]   ;;  %v151_v63 = vld [vmem:[%s1896_s22 + $0x18] sm:$0xf]  ;;  %v152_v1 = vld [vmem:[%s1896_s22 + $0x1c] sm:$0x1] }
  0x14   : > { %1460 = vmatpush3.bf16.msra.mxu0 %v1688_v14  ;;  %v206_v42 = vshrl.u32 %v1341_v36, 16  ;;  %v208_v43 = vshll.u32 %v1341_v36, 16  ;;  %v261_v44 = vrot.slane %v1341_v36, 1  ;;  %v1715_v59 = vld [vmem:[%s2204_s1 + $0x148] sm:$0xff]   ;;  %v1952_v3 = vld [vmem:[%s1896_s22 + $0x20] sm:$0xf]  ;;  %v1958_v6 = vcombine.low %v151_v63, %v152_v1 }
  0x15   : > { %1500 = vmatpush3.bf16.msra.mxu1 %v1689_v15  ;;  %1461 = vmatprep.subr.bf16.mxu0 %v1690_v16  ;;  %v213_v46 = vshrl.u32 %v1912_v39, 16  ;;  %v215_v47 = vshll.u32 %v1912_v39, 16  ;;  %v262_v48 = vrot.slane %v1912_v39, 1  ;;  %v222_v60 = vshll.u32 %v1925_v50, 16  ;;  %v1718_v62 = vld [vmem:[%s2204_s1 + $0x188] sm:$0xff]   ;;  %v1724_v9 = vld [vmem:[%s2204_s1 + $0x1d0] sm:$0xff]  }
  0x16   : > { %1501 = vmatprep.subr.bf16.mxu1 %v1691_v17  ;;  %1042 = vmatprep.mubr.bf16.mxu1 %v1354_v40  ;;  %v210_v49 = vrot.slane %v208_v43, 1  ;;  %v220_v0 = vshrl.u32 %v1925_v50, 16  ;;  %v263_v4 = vrot.slane %v1925_v50, 1  ;;  %v1717_v5 = vld [vmem:[%s2204_s1 + $0x108] sm:$0xff]   ;;  %v154_v7 = vld [vmem:[%s1896_s22 + $0x24] sm:$0x1]  ;;  %v1360_v8 = vcombine.low %v151_v63, %v1952_v3 }
  0x17   : > { %v217_v52 = vrot.slane %v215_v47, 1  ;;  %v1353_v53 = vcombine.low %v261_v44, %v262_v48  ;;  %v224_v2 = vrot.slane %v222_v60, 1  ;;  %v227_v10 = vshrl.u32 %v1958_v6, 16  ;;  %v1723_v14 = vld [vmem:[%s2204_s1 + $0x150] sm:$0xff]   ;;  %v1736_v43 = vld [vmem:[%s2204_s1 + $0x1e0] sm:$0xff]   ;;  %v1756_v39 = vld [vmem:[%s2204_s1 + $0x208] sm:$0xff]  }
  0x18   : > { %1462 = vmatpush3.bf16.msra.mxu0 %v1692_v18  ;;  %v211_v54 = vor.u32 %v210_v49, %v206_v42  ;;  %v229_v11 = vshll.u32 %v1958_v6, 16  ;;  %v1968_v12 = vcombine.low %v1952_v3, %v154_v7  ;;  %v264_v13 = vrot.slane %v1958_v6, 1  ;;  %v1725_v18 = vld [vmem:[%s2204_s1 + $0x110] sm:$0xff]   ;;  %v1737_v44 = vld [vmem:[%s2204_s1 + $0x120] sm:$0xff]  }
  0x19   : > { %1502 = vmatpush3.bf16.msra.mxu1 %v1693_v19  ;;  %1463 = vmatprep.subr.bf16.mxu0 %v1694_v20  ;;  %v1932_v55 = vor.u32 %v217_v52, %v213_v46  ;;  %v1974_v15 = vor.u32 %v224_v2, %v220_v0  ;;  %v1726_v19 = vld [vmem:[%s2204_s1 + $0x190] sm:$0xff]   ;;  %v1727_v20 = vld [vmem:[%s2204_s1 + $0x158] sm:$0xff]   ;;  %v1738_v49 = vld [vmem:[%s2204_s1 + $0x1a0] sm:$0xff]  }
  0x1a   : > { %1503 = vmatprep.subr.bf16.mxu1 %v1695_v21  ;;  %v231_v16 = vrot.slane %v229_v11, 1  ;;  %v1980_v17 = vcombine.low %v263_v4, %v264_v13  ;;  %v2018_v34 = vld [vmem:[%s1896_s22 + $0x30] sm:$0xf]  ;;  %v158_v35 = vld [vmem:[%s1896_s22 + $0x34] sm:$0x1] }
  0x1b   : > { %v1352_v61 = vcombine.low %v211_v54, %v1932_v55  ;;  %v1749_v11 = vld [vmem:[%s2204_s1 + $0x130] sm:$0xff]  }
  0x1c   : > { %1464 = vmatpush3.bf16.msra.mxu0 %v1696_v22  ;;  %v1991_v21 = vor.u32 %v231_v16, %v227_v10  ;;  %v1728_v22 = vld [vmem:[%s2204_s1 + $0x1d8] sm:$0xff]   ;;  %v1748_v10 = vld [vmem:[%s2204_s1 + $0x1f0] sm:$0xff]  }
  0x1d   : > { %1504 = vmatpush3.bf16.msra.mxu1 %v1697_v23  ;;  %1465 = vmatprep.subr.bf16.mxu0 %v1698_v24  ;;  %v236_v23 = vshll.u32 %v1968_v12, 16  ;;  %v1999_v24 = vcombine.low %v1909_v37, %v151_v63  ;;  %v1735_v37 = vld [vmem:[%s2204_s1 + $0x160] sm:$0xff]  }
  0x1e   : > { %1505 = vmatprep.subr.bf16.mxu1 %v1699_v25  ;;  %977 = vmatprep.mubr.bf16.mxu0 %v1352_v61  ;;  %v234_v25 = vshrl.u32 %v1968_v12, 16  ;;  %v159_v61 = vld [vmem:[%s1896_s22 + $0x38] sm:$0xf]  ;;  %v2075_v63 = vld [vmem:[%s1896_s22 + $0x40] sm:$0xf] }
  0x1f   : > { %v238_v32 = vrot.slane %v236_v23, 1  ;;  %v1372_v2 = vcombine.low %v159_v61, %v2075_v63 }
  0x20   : > { %1466 = vmatpush3.bf16.msra.mxu0 %v1700_v26  ;;  %v265_v26 = vrot.slane %v1968_v12, 1  ;;  %v1758_v12 = vld [vmem:[%s2204_s1 + $0x218] sm:$0xff]  }
  0x21   : > { %1506 = vmatpush3.bf16.msra.mxu1 %v1701_v27  ;;  %1467 = vmatprep.subr.bf16.mxu0 %v1702_v28  ;;  %v2005_v27 = vcombine.low %v1974_v15, %v1991_v21  ;;  %v1729_v28 = vld [vmem:[%s2204_s1 + $0x118] sm:$0xff]  }
  0x22   : > { %1507 = vmatprep.subr.bf16.mxu1 %v1703_v29  ;;  %v1730_v29 = vld [vmem:[%s2204_s1 + $0x198] sm:$0xff]  }
  0x24   : > { %1468 = vmatpush3.bf16.msra.mxu0 %v1704_v30  ;;  %v155_v30 = vld [vmem:[%s1896_s22 + $0x28] sm:$0xf] }
  0x25   : > { %1508 = vmatpush3.bf16.msra.mxu1 %v1705_v31  ;;  %1533 = vmatprep.subr.bf16.mxu0 %v1711_v41  ;;  %v156_v31 = vld [vmem:[%s1896_s22 + $0x2c] sm:$0x1]  ;;  %v1366_v36 = vcombine.low %v155_v30, %v2018_v34  ;;  %v2030_v41 = vcombine.low %v2018_v34, %v158_v35 }
  0x26   : > { %1573 = vmatprep.subr.bf16.mxu1 %v1712_v45  ;;  %v2015_v33 = vcombine.low %v155_v30, %v156_v31  ;;  %v2039_v45 = vor.u32 %v238_v32, %v234_v25  ;;  %v1752_v25 = vld [vmem:[%s2204_s1 + $0x1f8] sm:$0xff]   ;;  %v1356_v32 = vcombine.low %v262_v48, %v263_v4  ;;  %v163_v48 = vld [vmem:[%s1896_s22 + $0x48] sm:$0xf]  ;;  %v1355_v4 = vcombine.low %v1932_v55, %v1974_v15 }
  0x27   : > { %978 = vmatmul.mubr.bf16.vlgmr.msra.gmra.mrb[0].mxu0 %v1351_v58  ;;  %v250_v54 = vshll.u32 %v2030_v41, 16  ;;  %v248_v60 = vshrl.u32 %v2030_v41, 16  ;;  %v1754_v31 = vld [vmem:[%s2204_s1 + $0x1b8] sm:$0xff]  }
  0x28   : > { %1043 = vmatmul.mubr.bf16.vlgmr.msra.gmra.mrb[0].mxu1 %v1353_v53  ;;  %1534 = vmatpush3.bf16.msra.mxu0 %v1713_v56  ;;  %v241_v38 = vshrl.u32 %v2015_v33, 16  ;;  %v243_v40 = vshll.u32 %v2015_v33, 16  ;;  %v266_v42 = vrot.slane %v2015_v33, 1  ;;  %v1740_v53 = vld [vmem:[%s2204_s1 + $0x1e8] sm:$0xff]   ;;  %v2061_v56 = vcombine.low %v1952_v3, %v155_v30 }
  0x29   : > { %1574 = vmatpush3.bf16.msra.mxu1 %v1714_v51  ;;  %1050 = vmatprep.mubr.bf16.mxu1 %v1360_v8  ;;  %v1739_v51 = vld [vmem:[%s2204_s1 + $0x168] sm:$0xff]   ;;  %v252_v1 = vrot.slane %v250_v54, 1  ;;  %v267_v3 = vrot.slane %v2030_v41, 1 }
  0x2a   : > { %1575 = vmatprep.subr.bf16.mxu1 %v1716_v57  ;;  %1535 = vmatprep.subr.bf16.mxu0 %v1715_v59  ;;  %v245_v46 = vrot.slane %v243_v40, 1  ;;  %v2045_v47 = vcombine.low %v265_v26, %v266_v42  ;;  %v1741_v57 = vld [vmem:[%s2204_s1 + $0x128] sm:$0xff]  }
  0x2b   : > { %985 = vmatprep.mubr.bf16.mxu0 %v2005_v27  ;;  %v1742_v59 = vld [vmem:[%s2204_s1 + $0x1a8] sm:$0xff]  }
  0x2c   : > { %1536 = vmatpush3.bf16.msra.mxu0 %v1717_v5  ;;  %v2053_v52 = vor.u32 %v245_v46, %v241_v38  ;;  %v1747_v5 = vld [vmem:[%s2204_s1 + $0x170] sm:$0xff]   ;;  %v1759_v46 = vld [vmem:[%s2204_s1 + $0x220] sm:$0xff]  }
  0x2d   : > { %1576 = vmatpush3.bf16.msra.mxu1 %v1718_v62  ;;  %1537 = vmatprep.subr.bf16.mxu0 %v1723_v14  ;;  %v160_v62 = vld [vmem:[%s1896_s22 + $0x3c] sm:$0x1]  ;;  %v2094_v14 = vor.u32 %v252_v1, %v248_v60 }
  0x2e   : > { %1577 = vmatprep.subr.bf16.mxu1 %v1724_v9  ;;  %v1364_v58 = vcombine.low %v2039_v45, %v2053_v52  ;;  %v2077_v0 = vcombine.low %v159_v61, %v160_v62 }
  0x2f   : > { %986 = vmatmul.mubr.bf16.gmra.mrb[4].mxu0 %v1999_v24  ;;  %v1367_v33 = vcombine.low %v2053_v52, %v2094_v14  ;;  %v1764_v52 = vld [vmem:[%s2204_s1 + $0x238] sm:$0xff]  }
  0x30   : > { %1051 = vmatmul.mubr.bf16.gmra.mrb[4].mxu1 %v1980_v17  ;;  %1538 = vmatpush3.bf16.msra.mxu0 %v1725_v18  ;;  %v255_v7 = vshrl.u32 %v2077_v0, 16  ;;  %v257_v8 = vshll.u32 %v2077_v0, 16  ;;  %v268_v9 = vrot.slane %v2077_v0, 1 }
  0x31   : > { %1578 = vmatpush3.bf16.msra.mxu1 %v1726_v19  ;;  %1539 = vmatprep.subr.bf16.mxu0 %v1727_v20  ;;  %v1750_v19 = vld [vmem:[%s2204_s1 + $0x1b0] sm:$0xff]   ;;  %v162_v20 = vld [vmem:[%s1896_s22 + $0x44] sm:$0x1] }
  0x32   : > { %1579 = vmatprep.subr.bf16.mxu1 %v1728_v22  ;;  %1058 = vmatprep.mubr.bf16.mxu1 %v1366_v36  ;;  %v259_v16 = vrot.slane %v257_v8, 1  ;;  %v2100_v18 = vcombine.low %v267_v3, %v268_v9  ;;  %v1751_v22 = vld [vmem:[%s2204_s1 + $0x178] sm:$0xff]   ;;  %v2133_v35 = vcombine.low %v2075_v63, %v162_v20  ;;  %v1362_v36 = vcombine.low %v264_v13, %v265_v26 }
  0x33   : > { %993 = vmatprep.mubr.bf16.mxu0 %v1364_v58  ;;  %v1361_v13 = vcombine.low %v1991_v21, %v2039_v45  ;;  %v1760_v21 = vld [vmem:[%s2204_s1 + $0x228] sm:$0xff]  }
  0x34   : > { %1540 = vmatpush3.bf16.msra.mxu0 %v1729_v28  ;;  %v2109_v23 = vor.u32 %v259_v16, %v255_v7  ;;  %v1369_v28 = vcombine.low %v2018_v34, %v159_v61  ;;  %v1755_v34 = vld [vmem:[%s2204_s1 + $0x200] sm:$0xff]   ;;  %v277_v50 = vshll.u32 %v2133_v35, 16  ;;  %v275_v40 = vshrl.u32 %v2133_v35, 16 }
  0x35   : > { %1580 = vmatpush3.bf16.msra.mxu1 %v1730_v29  ;;  %1541 = vmatprep.subr.bf16.mxu0 %v1735_v37  ;;  %v1753_v29 = vld [vmem:[%s2204_s1 + $0x138] sm:$0xff]   ;;  %v281_v45 = vrot.slane %v2133_v35, 1 }
  0x36   : > { %1581 = vmatprep.subr.bf16.mxu1 %v1736_v43  ;;  %v1370_v30 = vcombine.low %v2094_v14, %v2109_v23  ;;  %v279_v55 = vrot.slane %v277_v50, 1 }
  0x37   : > { %994 = vmatmul.mubr.bf16.gmra.mrb[8].mxu0 %v2061_v56  ;;  %v1374_v41 = vcombine.low %v268_v9, %v281_v45 }
  0x38   : > { %1059 = vmatmul.mubr.bf16.gmra.mrb[8].mxu1 %v2045_v47  ;;  %1542 = vmatpush3.bf16.msra.mxu0 %v1737_v44  ;;  %v280_v26 = vor.u32 %v279_v55, %v275_v40  ;;  %v1368_v44 = vcombine.low %v266_v42, %v267_v3  ;;  %v1763_v42 = vld [vmem:[%s2204_s1 + $0x230] sm:$0xff]  }
  0x39   : > { %1582 = vmatpush3.bf16.msra.mxu1 %v1738_v49  ;;  %1543 = vmatprep.subr.bf16.mxu0 %v1739_v51  ;;  %v1375_v51 = vcombine.low %v2075_v63, %v163_v48 }
  0x3a   : > { %1583 = vmatprep.subr.bf16.mxu1 %v1740_v53  ;;  %1066 = vmatprep.mubr.bf16.mxu1 %v1372_v2  ;;  %v1373_v54 = vcombine.low %v2109_v23, %v280_v26 }
  0x3b   : > { %1001 = vmatprep.mubr.bf16.mxu0 %v1370_v30 }
  0x3c   : > { %1544 = vmatpush3.bf16.msra.mxu0 %v1741_v57 }
  0x3d   : > { %1584 = vmatpush3.bf16.msra.mxu1 %v1742_v59  ;;  %1545 = vmatprep.subr.bf16.mxu0 %v1747_v5 }
  0x3e   : > { %1585 = vmatprep.subr.bf16.mxu1 %v1748_v10 }
  0x3f   : > { %1002 = vmatmul.mubr.bf16.gmra.mrb[12].mxu0 %v1369_v28 }
  0x40   : > { %1067 = vmatmul.mubr.bf16.gmra.mrb[12].mxu1 %v2100_v18  ;;  %1546 = vmatpush3.bf16.msra.mxu0 %v1749_v11 }
  0x41   : > { %1586 = vmatpush3.bf16.msra.mxu1 %v1750_v19  ;;  %1547 = vmatprep.subr.bf16.mxu0 %v1751_v22 }
  0x42   : > { %1587 = vmatprep.subr.bf16.mxu1 %v1752_v25  ;;  %1172 = vmatprep.mubr.bf16.mxu1 %v2005_v27  ;;  %v164_v27 = vld [vmem:[%s1896_s22 + $0x4c] sm:$0x1] }
  0x43   : > { %1107 = vmatprep.mubr.bf16.mxu0 %v1356_v32  ;;  %v1350_v37 = vcombine.low %v163_v48, %v164_v27 }
  0x44   : > { %1548 = vmatpush3.bf16.msra.mxu0 %v1753_v29 }
  0x45   : > { %1588 = vmatpush3.bf16.msra.mxu1 %v1754_v31  ;;  %1625 = vmatprep.subr.bf16.mxu0 %v1755_v34  ;;  %v290_v38 = vshll.u32 %v1350_v37, 16  ;;  %v288_v15 = vshrl.u32 %v1350_v37, 16  ;;  %v294_v53 = vrot.slane %v1350_v37, 1 }
  0x46   : > { %1649 = vmatprep.subr.bf16.mxu1 %v1755_v34 }
  0x47   : > { %1108 = vmatmul.mubr.bf16.vlgmr.msra.gmra.mrb[16].mxu0 %v1355_v4  ;;  %v292_v6 = vrot.slane %v290_v38, 1 }
  0x48   : > { %1173 = vmatmul.mubr.bf16.vlgmr.msra.gmra.mrb[16].mxu1 %v1999_v24  ;;  %v1757_v24 = vld [vmem:[%s2204_s1 + $0x210] sm:$0xff]   ;;  %1626 = vmatpush3.bf16.msra.mxu0 %v1755_v34 }
  0x49   : > { %1657 = vmatpush3.bf16.msra.mxu1 %v1755_v34  ;;  %1180 = vmatprep.mubr.bf16.mxu1 %v1364_v58  ;;  %v293_v43 = vor.u32 %v292_v6, %v288_v15 }
  0x4a   : > { %1650 = vmatprep.subr.bf16.mxu1 %v1756_v39  ;;  %1115 = vmatprep.mubr.bf16.mxu0 %v1362_v36 }
  0x4b   : > { %1627 = vmatprep.subr.bf16.mxu0 %v1756_v39  ;;  %v1376_v49 = vcombine.low %v280_v26, %v293_v43 }
  0x4c   : > { %1628 = vmatpush3.bf16.msra.mxu0 %v1756_v39 }
  0x4d   : > { %1658 = vmatpush3.bf16.msra.mxu1 %v1756_v39  ;;  %1629 = vmatprep.subr.bf16.mxu0 %v1757_v24 }
  0x4e   : > { %1651 = vmatprep.subr.bf16.mxu1 %v1757_v24 }
  0x4f   : > { %1116 = vmatmul.mubr.bf16.gmra.mrb[20].mxu0 %v1361_v13 }
  0x50   : > { %1181 = vmatmul.mubr.bf16.gmra.mrb[20].mxu1 %v2061_v56  ;;  %1630 = vmatpush3.bf16.msra.mxu0 %v1757_v24  ;;  %v1377_v56 = vcombine.low %v281_v45, %v294_v53 }
  0x51   : > { %1659 = vmatpush3.bf16.msra.mxu1 %v1757_v24  ;;  %1188 = vmatprep.mubr.bf16.mxu1 %v1370_v30 }
  0x52   : > { %1652 = vmatprep.subr.bf16.mxu1 %v1758_v12  ;;  %1123 = vmatprep.mubr.bf16.mxu0 %v1368_v44 }
  0x53   : > { %1631 = vmatprep.subr.bf16.mxu0 %v1758_v12 }
  0x54   : > { %1632 = vmatpush3.bf16.msra.mxu0 %v1758_v12 }
  0x55   : > { %1660 = vmatpush3.bf16.msra.mxu1 %v1758_v12  ;;  %1633 = vmatprep.subr.bf16.mxu0 %v1759_v46 }
  0x56   : > { %1653 = vmatprep.subr.bf16.mxu1 %v1759_v46 }
  0x57   : > { %1124 = vmatmul.mubr.bf16.gmra.mrb[24].mxu0 %v1367_v33 }
  0x58   : > { %1189 = vmatmul.mubr.bf16.gmra.mrb[24].mxu1 %v1369_v28  ;;  %1634 = vmatpush3.bf16.msra.mxu0 %v1759_v46 }
  0x59   : > { %1661 = vmatpush3.bf16.msra.mxu1 %v1759_v46  ;;  %1196 = vmatprep.mubr.bf16.mxu1 %v1376_v49 }
  0x5a   : > { %1654 = vmatprep.subr.bf16.mxu1 %v1760_v21  ;;  %1131 = vmatprep.mubr.bf16.mxu0 %v1374_v41 }
  0x5b   : > { %1635 = vmatprep.subr.bf16.mxu0 %v1760_v21 }
  0x5c   : > { %1636 = vmatpush3.bf16.msra.mxu0 %v1760_v21 }
  0x5d   : > { %1662 = vmatpush3.bf16.msra.mxu1 %v1760_v21  ;;  %1637 = vmatprep.subr.bf16.mxu0 %v1763_v42 }
  0x5e   : > { %1655 = vmatprep.subr.bf16.mxu1 %v1763_v42 }
  0x5f   : > { %1132 = vmatmul.mubr.bf16.gmra.mrb[28].mxu0 %v1373_v54 }
  0x60   : > { %1197 = vmatmul.mubr.bf16.gmra.mrb[28].mxu1 %v1375_v51  ;;  %1638 = vmatpush3.bf16.msra.mxu0 %v1763_v42 }
  0x61   : > { %1663 = vmatpush3.bf16.msra.mxu1 %v1763_v42  ;;  %1645 = vmatprep.mubr.bf16.mxu1 %v2100_v18 }
  0x62   : > { %1656 = vmatprep.subr.bf16.mxu1 %v1764_v52  ;;  %1641 = vmatprep.mubr.bf16.mxu0 %v1980_v17 }
  0x63   : > { %1639 = vmatprep.subr.bf16.mxu0 %v1764_v52 }
  0x64   : > { %1640 = vmatpush3.bf16.msra.mxu0 %v1764_v52 }
  0x65   : > { %1664 = vmatpush3.bf16.msra.mxu1 %v1764_v52 }
  0x67   : > { %1642 = vmatmul.mubr.bf16.vlgmr.msra.gmra.mrb[32].mxu0 %v2045_v47 }
  0x68   : > { %1646 = vmatmul.mubr.bf16.vlgmr.msra.gmra.mrb[32].mxu1 %v1377_v56 }
  0xfa   : > { %v1469_v63 = vpop.f32.mrb[0].mxu0 }
  0xfb   : > { %v1509_v57 = vpop.f32.mrb[0].mxu1  ;;  %v1470_v0 = vpop.f32.mrb[1].mxu0 }
  0xfc   : > { %v1510_v58 = vpop.f32.mrb[1].mxu1  ;;  %v1471_v1 = vadd.f32 %v1470_v0, %v1469_v63  ;;  %v1472_v2 = vpop.f32.mrb[2].mxu0 }
  0xfd   : > { %v1511_v59 = vadd.f32 %v1510_v58, %v1509_v57  ;;  %v1512_v60 = vpop.f32.mrb[2].mxu1  ;;  %v1473_v3 = vpop.f32.mrb[3].mxu0 }
  0xfe   : > { %v1513_v61 = vpop.f32.mrb[3].mxu1  ;;  %v1474_v7 = vadd.f32 %v1473_v3, %v1472_v2 }
  0xff   : > { %v1514_v62 = vadd.f32 %v1513_v61, %v1512_v60  ;;  %v1045_v5 = vadd.f32 %v1511_v59, %v1471_v1 }
 0x101   : > { %v1048_v17 = vadd.f32 %v1514_v62, %v1474_v7 }
 0x102   : > { %v1475_v16 = vpop.f32.mrb[4].mxu0 }
 0x103   : > { %v1515_v8 = vpop.f32.mrb[4].mxu1  ;;  %v1476_v18 = vpop.f32.mrb[5].mxu0 }
 0x104   : > { %v1516_v9 = vpop.f32.mrb[5].mxu1  ;;  %v1477_v19 = vadd.f32 %v1476_v18, %v1475_v16  ;;  %v1478_v20 = vpop.f32.mrb[6].mxu0 }
 0x105   : > { %v1517_v10 = vadd.f32 %v1516_v9, %v1515_v8  ;;  %v1518_v11 = vpop.f32.mrb[6].mxu1  ;;  %v1479_v22 = vpop.f32.mrb[7].mxu0 }
 0x106   : > { %v1519_v14 = vpop.f32.mrb[7].mxu1  ;;  %v1480_v25 = vadd.f32 %v1479_v22, %v1478_v20 }
 0x107   : > { %v1520_v47 = vadd.f32 %v1519_v14, %v1518_v11  ;;  %v1053_v23 = vadd.f32 %v1517_v10, %v1477_v19 }
 0x109   : > { %v1056_v30 = vadd.f32 %v1520_v47, %v1480_v25 }
 0x10a   : > { %v1481_v39 = vpop.f32.mrb[8].mxu0 }
 0x10b   : > { %v1521_v28 = vpop.f32.mrb[8].mxu1  ;;  %v1482_v48 = vpop.f32.mrb[9].mxu0 }
 0x10c   : > { %v1522_v29 = vpop.f32.mrb[9].mxu1  ;;  %v1483_v50 = vadd.f32 %v1482_v48, %v1481_v39  ;;  %v1484_v4 = vpop.f32.mrb[10].mxu0 }
 0x10d   : > { %v1523_v31 = vadd.f32 %v1522_v29, %v1521_v28  ;;  %v1524_v32 = vpop.f32.mrb[10].mxu1  ;;  %v1485_v27 = vpop.f32.mrb[11].mxu0 }
 0x10e   : > { %v1525_v34 = vpop.f32.mrb[11].mxu1  ;;  %v1486_v37 = vadd.f32 %v1485_v27, %v1484_v4 }
 0x10f   : > { %v1526_v35 = vadd.f32 %v1525_v34, %v1524_v32  ;;  %v1061_v36 = vadd.f32 %v1523_v31, %v1483_v50 }
 0x111   : > { %v2184_v38 = vadd.f32 %v1526_v35, %v1486_v37 }
 0x112   : > { %v1487_v13 = vpop.f32.mrb[12].mxu0 }
 0x113   : > { %v1527_v24 = vpop.f32.mrb[12].mxu1  ;;  %v1488_v26 = vpop.f32.mrb[13].mxu0 }
 0x114   : > { %v1528_v40 = vpop.f32.mrb[13].mxu1  ;;  %v1489_v43 = vadd.f32 %v1488_v26, %v1487_v13  ;;  %v1490_v44 = vpop.f32.mrb[14].mxu0 }
 0x115   : > { %v1529_v55 = vadd.f32 %v1528_v40, %v1527_v24  ;;  %v1530_v15 = vpop.f32.mrb[14].mxu1  ;;  %v1491_v46 = vpop.f32.mrb[15].mxu0 }
 0x116   : > { %v1531_v12 = vpop.f32.mrb[15].mxu1  ;;  %v1492_v45 = vadd.f32 %v1491_v46, %v1490_v44 }
 0x117   : > { %v1532_v6 = vadd.f32 %v1531_v12, %v1530_v15  ;;  %v2186_v21 = vadd.f32 %v1529_v55, %v1489_v43 }
 0x119   : > { %v2188_v51 = vadd.f32 %v1532_v6, %v1492_v45 }
 0x11a   : > { %v1549_v54 = vpop.f32.mrb[16].mxu0 }
 0x11b   : > { %v1589_v49 = vpop.f32.mrb[16].mxu1  ;;  %v1550_v56 = vpop.f32.mrb[17].mxu0 }
 0x11c   : > { %v1590_v33 = vpop.f32.mrb[17].mxu1  ;;  %v1551_v57 = vadd.f32 %v1550_v56, %v1549_v54  ;;  %v1552_v58 = vpop.f32.mrb[18].mxu0 }
 0x11d   : > { %v1591_v41 = vadd.f32 %v1590_v33, %v1589_v49  ;;  %v1592_v42 = vpop.f32.mrb[18].mxu1  ;;  %v1553_v59 = vpop.f32.mrb[19].mxu0 }
 0x11e   : > { %v1593_v52 = vpop.f32.mrb[19].mxu1  ;;  %v1110_v61 = vadd.f32 %v1551_v57, %v1045_v5  ;;  %v1554_v62 = vadd.f32 %v1553_v59, %v1552_v58 }
 0x11f   : > { %v1594_v53 = vadd.f32 %v1593_v52, %v1592_v42 }
 0x120   : > { %v1113_v2 = vadd.f32 %v1554_v62, %v1048_v17  ;;  %v1175_v7 = vadd.f32 %v1591_v41, %v1110_v61 }
 0x122   : > { %v1555_v9 = vpop.f32.mrb[20].mxu0  ;;  %v2190_v10 = vadd.f32 %v1594_v53, %v1113_v2 }
 0x123   : > { %v1595_v60 = vpop.f32.mrb[20].mxu1  ;;  %v1556_v11 = vpop.f32.mrb[21].mxu0 }
 0x124   : > { %v1596_v63 = vpop.f32.mrb[21].mxu1  ;;  %v1557_v14 = vadd.f32 %v1556_v11, %v1555_v9  ;;  %v1558_v47 = vpop.f32.mrb[22].mxu0 }
 0x125   : > { %v1597_v0 = vadd.f32 %v1596_v63, %v1595_v60  ;;  %v1598_v1 = vpop.f32.mrb[22].mxu1  ;;  %v1559_v16 = vpop.f32.mrb[23].mxu0 }
 0x126   : > { %v1599_v3 = vpop.f32.mrb[23].mxu1  ;;  %v1118_v19 = vadd.f32 %v1557_v14, %v1053_v23  ;;  %v1560_v20 = vadd.f32 %v1559_v16, %v1558_v47 }
 0x127   : > { %v1600_v8 = vadd.f32 %v1599_v3, %v1598_v1 }
 0x128   : > { %v1121_v28 = vadd.f32 %v1560_v20, %v1056_v30  ;;  %v1183_v31 = vadd.f32 %v1597_v0, %v1118_v19 }
 0x12a   : > { %v1561_v32 = vpop.f32.mrb[24].mxu0  ;;  %v1186_v34 = vadd.f32 %v1600_v8, %v1121_v28 }
 0x12b   : > { %v1601_v18 = vpop.f32.mrb[24].mxu1  ;;  %v1562_v35 = vpop.f32.mrb[25].mxu0 }
 0x12c   : > { %v1602_v22 = vpop.f32.mrb[25].mxu1  ;;  %v1563_v39 = vadd.f32 %v1562_v35, %v1561_v32  ;;  %v1564_v48 = vpop.f32.mrb[26].mxu0 }
 0x12d   : > { %v1603_v5 = vadd.f32 %v1602_v22, %v1601_v18  ;;  %v1604_v25 = vpop.f32.mrb[26].mxu1  ;;  %v1565_v50 = vpop.f32.mrb[27].mxu0 }
 0x12e   : > { %v1605_v29 = vpop.f32.mrb[27].mxu1  ;;  %v1126_v27 = vadd.f32 %v1563_v39, %v1061_v36  ;;  %v1566_v37 = vadd.f32 %v1565_v50, %v1564_v48 }
 0x12f   : > { %v1606_v17 = vadd.f32 %v1605_v29, %v1604_v25 }
 0x130   : > { %v1129_v55 = vadd.f32 %v1566_v37, %v2184_v38  ;;  %v1191_v30 = vadd.f32 %v1603_v5, %v1126_v27 }
 0x132   : > { %v1567_v6 = vpop.f32.mrb[28].mxu0  ;;  %v1194_v13 = vadd.f32 %v1606_v17, %v1129_v55 }
 0x133   : > { %v1607_v4 = vpop.f32.mrb[28].mxu1  ;;  %v1568_v26 = vpop.f32.mrb[29].mxu0 }
 0x134   : > { %v1608_v24 = vpop.f32.mrb[29].mxu1  ;;  %v1569_v43 = vadd.f32 %v1568_v26, %v1567_v6  ;;  %v1570_v44 = vpop.f32.mrb[30].mxu0 }
 0x135   : > { %v1609_v23 = vadd.f32 %v1608_v24, %v1607_v4  ;;  %v1610_v40 = vpop.f32.mrb[30].mxu1  ;;  %v1571_v46 = vpop.f32.mrb[31].mxu0 }
 0x136   : > { %v1611_v15 = vpop.f32.mrb[31].mxu1  ;;  %v1134_v45 = vadd.f32 %v1569_v43, %v2186_v21  ;;  %v1572_v36 = vadd.f32 %v1571_v46, %v1570_v44 }
 0x137   : > { %v1612_v12 = vadd.f32 %v1611_v15, %v1610_v40 }
 0x138   : > { %v1137_v42 = vadd.f32 %v1572_v36, %v2188_v51  ;;  %v1199_v52 = vadd.f32 %v1609_v23, %v1134_v45 }
 0x13a   : > { %v1643_v56 = vpop.f32.mrb[32].mxu0  ;;  %v1202_v58 = vadd.f32 %v1612_v12, %v1137_v42 }
 0x13b   : > { %v1647_v49 = vpop.f32.mrb[32].mxu1  ;;  %v1248_v59 = vadd.f32 %v1643_v56, %v1183_v31  ;;  %v1239_v60 = vpop.f32.mrb[33].mxu0 }
 0x13c   : > { %v1255_v33 = vpop.f32.mrb[33].mxu1  ;;  %v1264_v57 = vadd.f32 %v1647_v49, %v1199_v52  ;;  %v1240_v21 = vadd.f32 %v1239_v60, %v1175_v7  ;;  %v1644_v61 = vpop.f32.mrb[34].mxu0 }
 0x13d   : > { %v1256_v38 = vadd.f32 %v1255_v33, %v1191_v30  ;;  %v1648_v41 = vpop.f32.mrb[34].mxu1  ;;  %1272 = vst [vmem:[%s143_s6 + $0x10] sm:$0xff] %v1248_v59  ;;  %v1251_v63 = vadd.f32 %v1644_v61, %v1186_v34  ;;  %v1242_v0 = vpop.f32.mrb[35].mxu0 }
 0x13e   : > { %v1258_v53 = vpop.f32.mrb[35].mxu1  ;;  %1276 = vst [vmem:[%s143_s6 + $0x30] sm:$0xff] %v1264_v57  ;;  %v1267_v62 = vadd.f32 %v1648_v41, %v1202_v58  ;;  %1270 = vst [vmem:[%s143_s6] sm:$0xff] %v1240_v21  ;;  %v1243_v51 = vadd.f32 %v1242_v0, %v2190_v10 }
 0x13f   : > { %1274 = vst [vmem:[%s143_s6 + $0x20] sm:$0xff] %v1256_v38  ;;  %v1259_v54 = vadd.f32 %v1258_v53, %v1194_v13  ;;  %1273 = vst [vmem:[%s143_s6 + $0x18] sm:$0xff] %v1251_v63 }
 0x140   : > { %1277 = vst [vmem:[%s143_s6 + $0x38] sm:$0xff] %v1267_v62  ;;  %1271 = vst [vmem:[%s143_s6 + $0x8] sm:$0xff] %v1243_v51 }
 0x141   : > { %1275 = vst [vmem:[%s143_s6 + $0x28] sm:$0xff] %v1259_v54 }
 0x142 PF: > { %s12_s9 = sadd.s32 1, %s1771_s9  }
 0x143   : > { %p9_p4 = scmp.ge.s32.totalorder %s12_s9, 4  }
 0x145   :  { %11 = sbr.rel (!%p9_p4) target bundleno = 1 (0x1), region = 58 }

</bundles_post_ra>
